<compile_context>
chip_gen: v7x
topology: tpu7x:2x2x1
jax: 0.10.0
libtpu: 0.0.40
codegen_flags: <defaults>
</compile_context>

<pallas_src>
import functools

import jax
import jax.numpy as jnp
from jax.experimental import pallas as pl
from jax.experimental.pallas import tpu as pltpu


def _round_up(x, m):
    return ((x + m - 1) // m) * m


# ----------------------------------------------------------------------------
# Fused Pallas kernel:
#   R x (embedded sequence -> LSTM stack) -> (head Linear ∘ MLP-L1 folded) ->
#   ReLU -> MLP-L2, all in one kernel invocation per batch tile.
# ----------------------------------------------------------------------------
def make_fused_kernel(*, num_layers: int, seq_len: int, lane_pad: int,
                      batch_tile: int):
    L, S, P, BT = num_layers, seq_len, lane_pad, batch_tile
    G = 4 * P

    def cell(gates, c):
        # Gate groups are 128-lane aligned -> whole-vreg EUP/VPU passes.
        i_g = jax.nn.sigmoid(gates[:, 0 * P:1 * P])
        f_g = jax.nn.sigmoid(gates[:, 1 * P:2 * P])
        g_g = jnp.tanh(gates[:, 2 * P:3 * P])
        o_g = jax.nn.sigmoid(gates[:, 3 * P:4 * P])
        c_new = f_g * c + i_g * g_g
        h_new = o_g * jnp.tanh(c_new)
        return h_new, c_new

    def kernel(*refs):
        if L > 1:
            (x_ref, wih0_ref, wihr_ref, whh_ref, b_ref,
             wcomb_ref, bcomb_ref, w2_ref, b2_ref,
             out_ref, gx_ref, hs_ref) = refs
        else:
            (x_ref, wih0_ref, whh_ref, b_ref,
             wcomb_ref, bcomb_ref, w2_ref, b2_ref,
             out_ref, gx_ref) = refs
            wihr_ref = None
            hs_ref = None

        # Layer-0 input: (S*BT, R*E), time-major rows, branch-major lanes.
        # BT is a multiple of 8 -> sublane-tile preserving reshape (no relayout).
        layer_in = x_ref[...].reshape(S * BT, x_ref.shape[2])

        h = None
        for layer in range(L):                                # static unroll
            w_in = wih0_ref[...] if layer == 0 else wihr_ref[layer - 1]
            bias = b_ref[layer]                               # (1, 4P)
            whh = whh_ref[layer]                              # (P, 4P) blockdiag

            # Hoisted input projection for all timesteps/branches, staged in
            # VMEM scratch so only a (BT, 4P) slice is live per step.
            gx_ref[...] = (jnp.dot(layer_in, w_in,
                                   preferred_element_type=jnp.float32) + bias)

            # t = 0 peeled: h == 0 -> skip the recurrent matmul.
            h, c = cell(gx_ref[0:BT, :], jnp.zeros((BT, P), jnp.float32))
            if layer < L - 1:
                hs_ref[0:BT, :] = h

            for t in range(1, S):                             # static unroll
                gates = gx_ref[t * BT:(t + 1) * BT, :] + jnp.dot(
                    h, whh, preferred_element_type=jnp.float32)
                h, c = cell(gates, c)
                if layer < L - 1:
                    hs_ref[t * BT:(t + 1) * BT, :] = h        # aligned vst

            if layer < L - 1:
                layer_in = hs_ref[...]                        # (S*BT, P)

        # Head Linear folded into MLP layer-1 offline -> one matmul; 128-lane
        # padded hidden/output keep the epilogue whole-vreg.
        hid = jnp.maximum(
            jnp.dot(h, wcomb_ref[...], preferred_element_type=jnp.float32)
            + bcomb_ref[...], 0.0)
        out_ref[...] = (jnp.dot(hid, w2_ref[...],
                                preferred_element_type=jnp.float32)
                        + b2_ref[...])

    return kernel


# ----------------------------------------------------------------------------
# Wrapper (glue: embedding gather + batch padding + single pallas_call)
# ----------------------------------------------------------------------------
def ratings_embedder_forward(x_idx, packed, *, num_layers, lane_pad,
                             output_size, max_batch_tile=256):
    # nn.Embedding lookup (data-dependent gather) kept in plain JAX glue.
    emb = jax.vmap(lambda tbl, idx: tbl[idx], in_axes=(0, 1), out_axes=0)(
        packed["emb"], x_idx)                         # (R, B, S, E)
    emb = jnp.transpose(emb, (2, 1, 0, 3))            # (S, B, R, E) time-major
    S, B, R, E = emb.shape
    x_packed = emb.reshape(S, B, R * E)               # branch-major lanes

    # Pad batch to the 8-sublane tile, then to a multiple of the batch tile.
    BT = min(_round_up(B, 8), max_batch_tile)
    B_pad = _round_up(_round_up(B, 8), BT)
    if B_pad != B:
        x_packed = jnp.pad(x_packed, ((0, 0), (0, B_pad - B), (0, 0)))

    in0 = R * E
    P = lane_pad
    G = 4 * P
    h1p = packed["wcomb_p"].shape[1]
    out_pad = packed["b2_p"].shape[1]

    operands = [x_packed, packed["wih0_p"]]
    in_specs = [
        pl.BlockSpec((S, BT, in0), lambda b: (0, b, 0)),
        pl.BlockSpec((in0, G), lambda b: (0, 0)),
    ]
    if num_layers > 1:
        operands.append(packed["wihr_p"])
        in_specs.append(
            pl.BlockSpec((num_layers - 1, P, G), lambda b: (0, 0, 0)))
    operands += [packed["whh_p"], packed["b_p"], packed["wcomb_p"],
                 packed["bcomb_p"], packed["w2_p"], packed["b2_p"]]
    in_specs += [
        pl.BlockSpec((num_layers, P, G), lambda b: (0, 0, 0)),
        pl.BlockSpec((num_layers, 1, G), lambda b: (0, 0, 0)),
        pl.BlockSpec((P, h1p), lambda b: (0, 0)),
        pl.BlockSpec((1, h1p), lambda b: (0, 0)),
        pl.BlockSpec((h1p, out_pad), lambda b: (0, 0)),
        pl.BlockSpec((1, out_pad), lambda b: (0, 0)),
    ]

    scratch_shapes = [pltpu.VMEM((S * BT, G), jnp.float32)]    # staged gx
    if num_layers > 1:
        scratch_shapes.append(pltpu.VMEM((S * BT, P), jnp.float32))  # hidden seq

    out = pl.pallas_call(
        make_fused_kernel(num_layers=num_layers, seq_len=S, lane_pad=P,
                          batch_tile=BT),
        out_shape=jax.ShapeDtypeStruct((B_pad, out_pad), jnp.float32),
        grid=(B_pad // BT,),
        in_specs=in_specs,
        out_specs=pl.BlockSpec((BT, out_pad), lambda b: (b, 0)),
        scratch_shapes=scratch_shapes,
        compiler_params=pltpu.CompilerParams(
            dimension_semantics=("parallel",),
            vmem_limit_bytes=32 * 1024 * 1024),
    )(*operands)
    return out[:B, :output_size]


# ----------------------------------------------------------------------------
# One-time weight packing: block-diagonal, 128-lane-aligned gate groups.
# Packed gate layout along lanes: [i(all R, pad) | f(...) | g(...) | o(...)],
# each group of width P = round_up(R*H, 128); branch r occupies lanes
# [k*P + r*H : k*P + (r+1)*H] of gate k. Padding rows/cols are zero, keeping
# padded h/c lanes exactly zero throughout the recurrence.
# The per-branch head Linear is folded into MLP layer-1 (exact composition)
# and the MLP hidden / output dims are zero-padded to whole 128-lane tiles.
# ----------------------------------------------------------------------------
def pack_params(params, *, num_ratings, hidden, num_layers, word_size):
    R, H, L, W = num_ratings, hidden, num_layers, word_size
    E = params["wih0_T"].shape[1]
    P = _round_up(R * H, 128)
    G = 4 * P

    def pack_cols(w_r, r):
        # w_r: (in, 4H) with gate order i,f,g,o -> (in, 4P) at branch r's lanes.
        out = jnp.zeros((w_r.shape[0], G), jnp.float32)
        for k in range(4):
            out = out.at[:, k * P + r * H:k * P + (r + 1) * H].set(
                w_r[:, k * H:(k + 1) * H])
        return out

    wih0_p = jnp.zeros((R * E, G), jnp.float32)
    for r in range(R):
        wih0_p = wih0_p.at[r * E:(r + 1) * E, :].set(
            pack_cols(params["wih0_T"][r], r))

    whh_p = jnp.zeros((L, P, G), jnp.float32)
    for l in range(L):
        for r in range(R):
            whh_p = whh_p.at[l, r * H:(r + 1) * H, :].set(
                pack_cols(params["whh_T"][r, l], r))

    b_p = jnp.zeros((L, 1, G), jnp.float32)
    for l in range(L):
        for r in range(R):
            for k in range(4):
                b_p = b_p.at[l, 0, k * P + r * H:k * P + (r + 1) * H].set(
                    params["b"][r, l, 0, k * H:(k + 1) * H])

    # Per-branch head Linear, block-diagonal packed ...
    whead_p = jnp.zeros((P, R * W), jnp.float32)
    bhead_p = jnp.zeros((1, R * W), jnp.float32)
    for r in range(R):
        whead_p = whead_p.at[r * H:(r + 1) * H, r * W:(r + 1) * W].set(
            params["wout_T"][r])
        bhead_p = bhead_p.at[0, r * W:(r + 1) * W].set(params["bout"][r, 0])

    # ... algebraically folded into the first MLP Linear (exact: no nonlinearity
    # between them), then zero-padded to whole 128-lane tiles.
    mlp_hidden = params["w1_T"].shape[1]
    output_size = params["w2_T"].shape[1]
    h1p = _round_up(mlp_hidden, 128)
    outp = _round_up(output_size, 128)

    wcomb = whead_p @ params["w1_T"]                      # (P, mlp_hidden)
    bcomb = bhead_p @ params["w1_T"] + params["b1"]       # (1, mlp_hidden)
    wcomb_p = jnp.zeros((P, h1p), jnp.float32).at[:, :mlp_hidden].set(wcomb)
    bcomb_p = jnp.zeros((1, h1p), jnp.float32).at[:, :mlp_hidden].set(bcomb)
    w2_p = jnp.zeros((h1p, outp), jnp.float32
                     ).at[:mlp_hidden, :output_size].set(params["w2_T"])
    b2_p = jnp.zeros((1, outp), jnp.float32).at[:, :output_size].set(params["b2"])

    packed = dict(emb=params["emb"], wih0_p=wih0_p, whh_p=whh_p, b_p=b_p,
                  wcomb_p=wcomb_p, bcomb_p=bcomb_p, w2_p=w2_p, b2_p=b2_p)
    if L > 1:
        wihr_p = jnp.zeros((L - 1, P, G), jnp.float32)
        for l in range(L - 1):
            for r in range(R):
                wihr_p = wihr_p.at[l, r * H:(r + 1) * H, :].set(
                    pack_cols(params["wihr_T"][r, l], r))
        packed["wihr_p"] = wihr_p
    return packed, P


# ----------------------------------------------------------------------------
# Pure-JAX reference (per-branch, unpacked weights) for correctness check.
# ----------------------------------------------------------------------------
def ratings_embedder_reference(x_idx, params, *, num_layers, hidden, word_size,
                               output_size):
    batch, num_ratings, seq = x_idx.shape
    H, L = hidden, num_layers
    outs = []
    for r in range(num_ratings):
        inp = params["emb"][r][x_idx[:, r, :]]        # (batch, seq, E)
        h = None
        for layer in range(L):
            wih = params["wih0_T"][r] if layer == 0 else params["wihr_T"][r, layer - 1]
            whh = params["whh_T"][r, layer]
            bias = params["b"][r, layer]
            h = jnp.zeros((batch, H), jnp.float32)
            c = jnp.zeros((batch, H), jnp.float32)
            hs = []
            for t in range(seq):
                gates = inp[:, t, :] @ wih + h @ whh + bias
                i = jax.nn.sigmoid(gates[:, :H])
                f = jax.nn.sigmoid(gates[:, H:2 * H])
                g = jnp.tanh(gates[:, 2 * H:3 * H])
                o = jax.nn.sigmoid(gates[:, 3 * H:])
                c = f * c + i * g
                h = o * jnp.tanh(c)
                hs.append(h)
            inp = jnp.stack(hs, axis=1)
        outs.append(h @ params["wout_T"][r] + params["bout"][r])
    feat = jnp.stack(outs, axis=1).reshape(batch, -1)
    h1 = jnp.maximum(feat @ params["w1_T"] + params["b1"], 0.0)
    return h1 @ params["w2_T"] + params["b2"]


# ----------------------------------------------------------------------------
# Deterministic parameter construction (natural / unpacked layout).
# ----------------------------------------------------------------------------
def init_params(key, *, num_embeddings, embedding_dim, num_ratings,
                lstm_hidden_size, lstm_num_layers, word_size,
                final_mlp_factor, output_size):
    R, E, H, L, W = (num_ratings, embedding_dim, lstm_hidden_size,
                     lstm_num_layers, word_size)
    keys = iter(jax.random.split(key, 64))

    def unif(shape, scale):
        return jax.random.uniform(next(keys), shape, jnp.float32, -scale, scale)

    k_lstm = 1.0 / jnp.sqrt(H)
    params = {
        "emb": jax.random.normal(next(keys), (R, num_embeddings, E), jnp.float32),
        # LSTM weights stored pre-transposed: (in_features, 4H), gates i,f,g,o
        "wih0_T": unif((R, E, 4 * H), k_lstm),
        "whh_T": unif((R, L, H, 4 * H), k_lstm),
        # combined b_ih + b_hh per layer
        "b": unif((R, L, 1, 4 * H), k_lstm) + unif((R, L, 1, 4 * H), k_lstm),
        # LSTMNet head Linear(H -> W)
        "wout_T": unif((R, H, W), 1.0 / jnp.sqrt(H)),
        "bout": unif((R, 1, W), 1.0 / jnp.sqrt(H)),
    }
    if L > 1:
        params["wihr_T"] = unif((R, L - 1, H, 4 * H), k_lstm)

    mlp_in = R * W
    mlp_hidden = mlp_in * final_mlp_factor
    params.update({
        "w1_T": unif((mlp_in, mlp_hidden), 1.0 / jnp.sqrt(mlp_in)),
        "b1": unif((1, mlp_hidden), 1.0 / jnp.sqrt(mlp_in)),
        "w2_T": unif((mlp_hidden, output_size), 1.0 / jnp.sqrt(mlp_hidden)),
        "b2": unif((1, output_size), 1.0 / jnp.sqrt(mlp_hidden)),
    })
    return params


# ----------------------------------------------------------------------------
if __name__ == "__main__":
    cfg = dict(
        num_embeddings=50,
        embedding_dim=16,
        num_ratings=3,
        lstm_hidden_size=32,
        lstm_num_layers=2,
        word_size=16,
        final_mlp_factor=2,
        output_size=8,
    )
    batch, rating_size = 2, 8

    key = jax.random.PRNGKey(0)
    k_param, k_input = jax.random.split(key)
    params = init_params(k_param, **cfg)
    packed, lane_pad = pack_params(
        params,
        num_ratings=cfg["num_ratings"],
        hidden=cfg["lstm_hidden_size"],
        num_layers=cfg["lstm_num_layers"],
        word_size=cfg["word_size"],
    )

    # x: (batch, num_ratings, rating_size) integer token ids
    x = jax.random.randint(k_input, (batch, cfg["num_ratings"], rating_size),
                           0, cfg["num_embeddings"], dtype=jnp.int32)

    fwd = functools.partial(
        ratings_embedder_forward,
        num_layers=cfg["lstm_num_layers"],
        lane_pad=lane_pad,
        output_size=cfg["output_size"],
    )
    out = jax.block_until_ready(fwd(x, packed))
    assert out.shape == (batch, cfg["output_size"]), out.shape

    ref = ratings_embedder_reference(
        x, params,
        num_layers=cfg["lstm_num_layers"],
        hidden=cfg["lstm_hidden_size"],
        word_size=cfg["word_size"],
        output_size=cfg["output_size"],
    )
    assert jnp.allclose(out, ref, atol=5e-3, rtol=5e-3), (
        float(jnp.max(jnp.abs(out - ref))))

    print("KERNEL_OK")
</pallas_src>

<mosaic_0001>
module attributes {stable_mosaic.version = 11 : i64} {
  func.func @kernel(%arg0: i32, %arg1: memref<8x8x48xf32, #tpu.memory_space<vmem>>, %arg2: memref<48x512xf32, #tpu.memory_space<vmem>>, %arg3: memref<1x128x512xf32, #tpu.memory_space<vmem>>, %arg4: memref<2x128x512xf32, #tpu.memory_space<vmem>>, %arg5: memref<2x1x512xf32, #tpu.memory_space<vmem>>, %arg6: memref<128x128xf32, #tpu.memory_space<vmem>>, %arg7: memref<1x128xf32, #tpu.memory_space<vmem>>, %arg8: memref<128x128xf32, #tpu.memory_space<vmem>>, %arg9: memref<1x128xf32, #tpu.memory_space<vmem>>, %arg10: memref<8x128xf32, #tpu.memory_space<vmem>>, %arg11: memref<64x512xf32, #tpu.memory_space<vmem>>, %arg12: memref<64x128xf32, #tpu.memory_space<vmem>>) attributes {dimension_semantics = [#tpu.dimension_semantics<parallel>], iteration_bounds = array<i64: 1>, scalar_prefetch = 0 : i64, scratch_operands = 2 : i64, tpu.core_type = #tpu.core_type<tc>, window_params = [{transform_indices = @transform_0, window_bounds = array<i64: 8, 8, 48>}, {pipeline_mode = #tpu.pipeline_mode<synchronous>, transform_indices = @transform_1, window_bounds = array<i64: 48, 512>}, {pipeline_mode = #tpu.pipeline_mode<synchronous>, transform_indices = @transform_2, window_bounds = array<i64: 1, 128, 512>}, {pipeline_mode = #tpu.pipeline_mode<synchronous>, transform_indices = @transform_3, window_bounds = array<i64: 2, 128, 512>}, {pipeline_mode = #tpu.pipeline_mode<synchronous>, transform_indices = @transform_4, window_bounds = array<i64: 2, 1, 512>}, {pipeline_mode = #tpu.pipeline_mode<synchronous>, transform_indices = @transform_5, window_bounds = array<i64: 128, 128>}, {pipeline_mode = #tpu.pipeline_mode<synchronous>, transform_indices = @transform_6, window_bounds = array<i64: 1, 128>}, {pipeline_mode = #tpu.pipeline_mode<synchronous>, transform_indices = @transform_7, window_bounds = array<i64: 128, 128>}, {pipeline_mode = #tpu.pipeline_mode<synchronous>, transform_indices = @transform_8, window_bounds = array<i64: 1, 128>}, {transform_indices = @transform_9, window_bounds = array<i64: 8, 128>}]} {
    %c0 = arith.constant 0 : index
    %c0_0 = arith.constant 0 : index
    %c0_1 = arith.constant 0 : index
    %0 = vector.load %arg1[%c0, %c0_0, %c0_1] : memref<8x8x48xf32, #tpu.memory_space<vmem>>, vector<8x8x48xf32>
    %1 = vector.shape_cast %0 : vector<8x8x48xf32> to vector<64x48xf32>
    %c0_2 = arith.constant 0 : index
    %c0_3 = arith.constant 0 : index
    %2 = vector.load %arg2[%c0_2, %c0_3] : memref<48x512xf32, #tpu.memory_space<vmem>>, vector<48x512xf32>
    %c0_4 = arith.constant 0 : index
    %c0_5 = arith.constant 0 : index
    %c0_6 = arith.constant 0 : index
    %3 = vector.load %arg5[%c0_4, %c0_5, %c0_6] : memref<2x1x512xf32, #tpu.memory_space<vmem>>, vector<1x1x512xf32>
    %4 = vector.shape_cast %3 : vector<1x1x512xf32> to vector<1x512xf32>
    %c0_7 = arith.constant 0 : index
    %c0_8 = arith.constant 0 : index
    %c0_9 = arith.constant 0 : index
    %5 = vector.load %arg4[%c0_7, %c0_8, %c0_9] : memref<2x128x512xf32, #tpu.memory_space<vmem>>, vector<1x128x512xf32>
    %6 = vector.shape_cast %5 : vector<1x128x512xf32> to vector<128x512xf32>
    %cst = arith.constant dense<0.000000e+00> : vector<64x512xf32>
    %7 = tpu.matmul %1, %2, %cst {dimension_numbers = #tpu.dot_dimension_numbers<[1], [0], [0], [1], [0, 0, 1, 1], [], []>} : vector<64x48xf32>, vector<48x512xf32>, vector<64x512xf32> -> vector<64x512xf32>
    %8 = vector.broadcast %4 : vector<1x512xf32> to vector<64x512xf32>
    %9 = arith.addf %7, %8 : vector<64x512xf32>
    %c0_10 = arith.constant 0 : index
    %c0_11 = arith.constant 0 : index
    %10 = vector.load %arg11[%c0_10, %c0_11] : memref<64x512xf32, #tpu.memory_space<vmem>>, vector<64x512xf32>
    tpu.vector_store %arg11[%c0_10, %c0_11], %9 {strides = array<i32>} : memref<64x512xf32, #tpu.memory_space<vmem>>, vector<64x512xf32>,
    %c0_12 = arith.constant 0 : index
    %c0_13 = arith.constant 0 : index
    %11 = vector.load %arg11[%c0_12, %c0_13] : memref<64x512xf32, #tpu.memory_space<vmem>>, vector<8x512xf32>
    %cst_14 = arith.constant 0.000000e+00 : f32
    %12 = vector.broadcast %cst_14 : f32 to vector<8x128xf32>
    %13 = vector.extract_strided_slice %11 {offsets = [0, 0], sizes = [8, 128], strides = [1, 1]} : vector<8x512xf32> to vector<8x128xf32>
    %14 = arith.negf %13 : vector<8x128xf32>
    %15 = math.exp %14 : vector<8x128xf32>
    %cst_15 = arith.constant 1.000000e+00 : f32
    %16 = vector.broadcast %cst_15 : f32 to vector<8x128xf32>
    %17 = arith.addf %16, %15 : vector<8x128xf32>
    %18 = arith.divf %16, %17 : vector<8x128xf32>
    %19 = vector.extract_strided_slice %11 {offsets = [0, 128], sizes = [8, 128], strides = [1, 1]} : vector<8x512xf32> to vector<8x128xf32>
    %20 = arith.negf %19 : vector<8x128xf32>
    %21 = math.exp %20 : vector<8x128xf32>
    %cst_16 = arith.constant 1.000000e+00 : f32
    %22 = vector.broadcast %cst_16 : f32 to vector<8x128xf32>
    %23 = arith.addf %22, %21 : vector<8x128xf32>
    %24 = arith.divf %22, %23 : vector<8x128xf32>
    %25 = vector.extract_strided_slice %11 {offsets = [0, 256], sizes = [8, 128], strides = [1, 1]} : vector<8x512xf32> to vector<8x128xf32>
    %26 = math.tanh %25 : vector<8x128xf32>
    %27 = vector.extract_strided_slice %11 {offsets = [0, 384], sizes = [8, 128], strides = [1, 1]} : vector<8x512xf32> to vector<8x128xf32>
    %28 = arith.negf %27 : vector<8x128xf32>
    %29 = math.exp %28 : vector<8x128xf32>
    %cst_17 = arith.constant 1.000000e+00 : f32
    %30 = vector.broadcast %cst_17 : f32 to vector<8x128xf32>
    %31 = arith.addf %30, %29 : vector<8x128xf32>
    %32 = arith.divf %30, %31 : vector<8x128xf32>
    %33 = arith.mulf %24, %12 : vector<8x128xf32>
    %34 = arith.mulf %18, %26 : vector<8x128xf32>
    %35 = arith.addf %33, %34 : vector<8x128xf32>
    %36 = math.tanh %35 : vector<8x128xf32>
    %37 = arith.mulf %32, %36 : vector<8x128xf32>
    %c0_18 = arith.constant 0 : index
    %c0_19 = arith.constant 0 : index
    %38 = vector.load %arg12[%c0_18, %c0_19] : memref<64x128xf32, #tpu.memory_space<vmem>>, vector<8x128xf32>
    tpu.vector_store %arg12[%c0_18, %c0_19], %37 {strides = array<i32>} : memref<64x128xf32, #tpu.memory_space<vmem>>, vector<8x128xf32>,
    %c8 = arith.constant 8 : index
    %c0_20 = arith.constant 0 : index
    %39 = vector.load %arg11[%c8, %c0_20] : memref<64x512xf32, #tpu.memory_space<vmem>>, vector<8x512xf32>
    %cst_21 = arith.constant dense<0.000000e+00> : vector<8x512xf32>
    %40 = tpu.matmul %37, %6, %cst_21 {dimension_numbers = #tpu.dot_dimension_numbers<[1], [0], [0], [1], [0, 0, 1, 1], [], []>} : vector<8x128xf32>, vector<128x512xf32>, vector<8x512xf32> -> vector<8x512xf32>
    %41 = arith.addf %39, %40 : vector<8x512xf32>
    %42 = vector.extract_strided_slice %41 {offsets = [0, 0], sizes = [8, 128], strides = [1, 1]} : vector<8x512xf32> to vector<8x128xf32>
    %43 = arith.negf %42 : vector<8x128xf32>
    %44 = math.exp %43 : vector<8x128xf32>
    %cst_22 = arith.constant 1.000000e+00 : f32
    %45 = vector.broadcast %cst_22 : f32 to vector<8x128xf32>
    %46 = arith.addf %45, %44 : vector<8x128xf32>
    %47 = arith.divf %45, %46 : vector<8x128xf32>
    %48 = vector.extract_strided_slice %41 {offsets = [0, 128], sizes = [8, 128], strides = [1, 1]} : vector<8x512xf32> to vector<8x128xf32>
    %49 = arith.negf %48 : vector<8x128xf32>
    %50 = math.exp %49 : vector<8x128xf32>
    %cst_23 = arith.constant 1.000000e+00 : f32
    %51 = vector.broadcast %cst_23 : f32 to vector<8x128xf32>
    %52 = arith.addf %51, %50 : vector<8x128xf32>
    %53 = arith.divf %51, %52 : vector<8x128xf32>
    %54 = vector.extract_strided_slice %41 {offsets = [0, 256], sizes = [8, 128], strides = [1, 1]} : vector<8x512xf32> to vector<8x128xf32>
    %55 = math.tanh %54 : vector<8x128xf32>
    %56 = vector.extract_strided_slice %41 {offsets = [0, 384], sizes = [8, 128], strides = [1, 1]} : vector<8x512xf32> to vector<8x128xf32>
    %57 = arith.negf %56 : vector<8x128xf32>
    %58 = math.exp %57 : vector<8x128xf32>
    %cst_24 = arith.constant 1.000000e+00 : f32
    %59 = vector.broadcast %cst_24 : f32 to vector<8x128xf32>
    %60 = arith.addf %59, %58 : vector<8x128xf32>
    %61 = arith.divf %59, %60 : vector<8x128xf32>
    %62 = arith.mulf %53, %35 : vector<8x128xf32>
    %63 = arith.mulf %47, %55 : vector<8x128xf32>
    %64 = arith.addf %62, %63 : vector<8x128xf32>
    %65 = math.tanh %64 : vector<8x128xf32>
    %66 = arith.mulf %61, %65 : vector<8x128xf32>
    %c8_25 = arith.constant 8 : index
    %c0_26 = arith.constant 0 : index
    %67 = vector.load %arg12[%c8_25, %c0_26] : memref<64x128xf32, #tpu.memory_space<vmem>>, vector<8x128xf32>
    tpu.vector_store %arg12[%c8_25, %c0_26], %66 {strides = array<i32>} : memref<64x128xf32, #tpu.memory_space<vmem>>, vector<8x128xf32>,
    %c16 = arith.constant 16 : index
    %c0_27 = arith.constant 0 : index
    %68 = vector.load %arg11[%c16, %c0_27] : memref<64x512xf32, #tpu.memory_space<vmem>>, vector<8x512xf32>
    %cst_28 = arith.constant dense<0.000000e+00> : vector<8x512xf32>
    %69 = tpu.matmul %66, %6, %cst_28 {dimension_numbers = #tpu.dot_dimension_numbers<[1], [0], [0], [1], [0, 0, 1, 1], [], []>} : vector<8x128xf32>, vector<128x512xf32>, vector<8x512xf32> -> vector<8x512xf32>
    %70 = arith.addf %68, %69 : vector<8x512xf32>
    %71 = vector.extract_strided_slice %70 {offsets = [0, 0], sizes = [8, 128], strides = [1, 1]} : vector<8x512xf32> to vector<8x128xf32>
    %72 = arith.negf %71 : vector<8x128xf32>
    %73 = math.exp %72 : vector<8x128xf32>
    %cst_29 = arith.constant 1.000000e+00 : f32
    %74 = vector.broadcast %cst_29 : f32 to vector<8x128xf32>
    %75 = arith.addf %74, %73 : vector<8x128xf32>
    %76 = arith.divf %74, %75 : vector<8x128xf32>
    %77 = vector.extract_strided_slice %70 {offsets = [0, 128], sizes = [8, 128], strides = [1, 1]} : vector<8x512xf32> to vector<8x128xf32>
    %78 = arith.negf %77 : vector<8x128xf32>
    %79 = math.exp %78 : vector<8x128xf32>
    %cst_30 = arith.constant 1.000000e+00 : f32
    %80 = vector.broadcast %cst_30 : f32 to vector<8x128xf32>
    %81 = arith.addf %80, %79 : vector<8x128xf32>
    %82 = arith.divf %80, %81 : vector<8x128xf32>
    %83 = vector.extract_strided_slice %70 {offsets = [0, 256], sizes = [8, 128], strides = [1, 1]} : vector<8x512xf32> to vector<8x128xf32>
    %84 = math.tanh %83 : vector<8x128xf32>
    %85 = vector.extract_strided_slice %70 {offsets = [0, 384], sizes = [8, 128], strides = [1, 1]} : vector<8x512xf32> to vector<8x128xf32>
    %86 = arith.negf %85 : vector<8x128xf32>
    %87 = math.exp %86 : vector<8x128xf32>
    %cst_31 = arith.constant 1.000000e+00 : f32
    %88 = vector.broadcast %cst_31 : f32 to vector<8x128xf32>
    %89 = arith.addf %88, %87 : vector<8x128xf32>
    %90 = arith.divf %88, %89 : vector<8x128xf32>
    %91 = arith.mulf %82, %64 : vector<8x128xf32>
    %92 = arith.mulf %76, %84 : vector<8x128xf32>
    %93 = arith.addf %91, %92 : vector<8x128xf32>
    %94 = math.tanh %93 : vector<8x128xf32>
    %95 = arith.mulf %90, %94 : vector<8x128xf32>
    %c16_32 = arith.constant 16 : index
    %c0_33 = arith.constant 0 : index
    %96 = vector.load %arg12[%c16_32, %c0_33] : memref<64x128xf32, #tpu.memory_space<vmem>>, vector<8x128xf32>
    tpu.vector_store %arg12[%c16_32, %c0_33], %95 {strides = array<i32>} : memref<64x128xf32, #tpu.memory_space<vmem>>, vector<8x128xf32>,
    %c24 = arith.constant 24 : index
    %c0_34 = arith.constant 0 : index
    %97 = vector.load %arg11[%c24, %c0_34] : memref<64x512xf32, #tpu.memory_space<vmem>>, vector<8x512xf32>
    %cst_35 = arith.constant dense<0.000000e+00> : vector<8x512xf32>
    %98 = tpu.matmul %95, %6, %cst_35 {dimension_numbers = #tpu.dot_dimension_numbers<[1], [0], [0], [1], [0, 0, 1, 1], [], []>} : vector<8x128xf32>, vector<128x512xf32>, vector<8x512xf32> -> vector<8x512xf32>
    %99 = arith.addf %97, %98 : vector<8x512xf32>
    %100 = vector.extract_strided_slice %99 {offsets = [0, 0], sizes = [8, 128], strides = [1, 1]} : vector<8x512xf32> to vector<8x128xf32>
    %101 = arith.negf %100 : vector<8x128xf32>
    %102 = math.exp %101 : vector<8x128xf32>
    %cst_36 = arith.constant 1.000000e+00 : f32
    %103 = vector.broadcast %cst_36 : f32 to vector<8x128xf32>
    %104 = arith.addf %103, %102 : vector<8x128xf32>
    %105 = arith.divf %103, %104 : vector<8x128xf32>
    %106 = vector.extract_strided_slice %99 {offsets = [0, 128], sizes = [8, 128], strides = [1, 1]} : vector<8x512xf32> to vector<8x128xf32>
    %107 = arith.negf %106 : vector<8x128xf32>
    %108 = math.exp %107 : vector<8x128xf32>
    %cst_37 = arith.constant 1.000000e+00 : f32
    %109 = vector.broadcast %cst_37 : f32 to vector<8x128xf32>
    %110 = arith.addf %109, %108 : vector<8x128xf32>
    %111 = arith.divf %109, %110 : vector<8x128xf32>
    %112 = vector.extract_strided_slice %99 {offsets = [0, 256], sizes = [8, 128], strides = [1, 1]} : vector<8x512xf32> to vector<8x128xf32>
    %113 = math.tanh %112 : vector<8x128xf32>
    %114 = vector.extract_strided_slice %99 {offsets = [0, 384], sizes = [8, 128], strides = [1, 1]} : vector<8x512xf32> to vector<8x128xf32>
    %115 = arith.negf %114 : vector<8x128xf32>
    %116 = math.exp %115 : vector<8x128xf32>
    %cst_38 = arith.constant 1.000000e+00 : f32
    %117 = vector.broadcast %cst_38 : f32 to vector<8x128xf32>
    %118 = arith.addf %117, %116 : vector<8x128xf32>
    %119 = arith.divf %117, %118 : vector<8x128xf32>
    %120 = arith.mulf %111, %93 : vector<8x128xf32>
    %121 = arith.mulf %105, %113 : vector<8x128xf32>
    %122 = arith.addf %120, %121 : vector<8x128xf32>
    %123 = math.tanh %122 : vector<8x128xf32>
    %124 = arith.mulf %119, %123 : vector<8x128xf32>
    %c24_39 = arith.constant 24 : index
    %c0_40 = arith.constant 0 : index
    %125 = vector.load %arg12[%c24_39, %c0_40] : memref<64x128xf32, #tpu.memory_space<vmem>>, vector<8x128xf32>
    tpu.vector_store %arg12[%c24_39, %c0_40], %124 {strides = array<i32>} : memref<64x128xf32, #tpu.memory_space<vmem>>, vector<8x128xf32>,
    %c32 = arith.constant 32 : index
    %c0_41 = arith.constant 0 : index
    %126 = vector.load %arg11[%c32, %c0_41] : memref<64x512xf32, #tpu.memory_space<vmem>>, vector<8x512xf32>
    %cst_42 = arith.constant dense<0.000000e+00> : vector<8x512xf32>
    %127 = tpu.matmul %124, %6, %cst_42 {dimension_numbers = #tpu.dot_dimension_numbers<[1], [0], [0], [1], [0, 0, 1, 1], [], []>} : vector<8x128xf32>, vector<128x512xf32>, vector<8x512xf32> -> vector<8x512xf32>
    %128 = arith.addf %126, %127 : vector<8x512xf32>
    %129 = vector.extract_strided_slice %128 {offsets = [0, 0], sizes = [8, 128], strides = [1, 1]} : vector<8x512xf32> to vector<8x128xf32>
    %130 = arith.negf %129 : vector<8x128xf32>
    %131 = math.exp %130 : vector<8x128xf32>
    %cst_43 = arith.constant 1.000000e+00 : f32
    %132 = vector.broadcast %cst_43 : f32 to vector<8x128xf32>
    %133 = arith.addf %132, %131 : vector<8x128xf32>
    %134 = arith.divf %132, %133 : vector<8x128xf32>
    %135 = vector.extract_strided_slice %128 {offsets = [0, 128], sizes = [8, 128], strides = [1, 1]} : vector<8x512xf32> to vector<8x128xf32>
    %136 = arith.negf %135 : vector<8x128xf32>
    %137 = math.exp %136 : vector<8x128xf32>
    %cst_44 = arith.constant 1.000000e+00 : f32
    %138 = vector.broadcast %cst_44 : f32 to vector<8x128xf32>
    %139 = arith.addf %138, %137 : vector<8x128xf32>
    %140 = arith.divf %138, %139 : vector<8x128xf32>
    %141 = vector.extract_strided_slice %128 {offsets = [0, 256], sizes = [8, 128], strides = [1, 1]} : vector<8x512xf32> to vector<8x128xf32>
    %142 = math.tanh %141 : vector<8x128xf32>
    %143 = vector.extract_strided_slice %128 {offsets = [0, 384], sizes = [8, 128], strides = [1, 1]} : vector<8x512xf32> to vector<8x128xf32>
    %144 = arith.negf %143 : vector<8x128xf32>
    %145 = math.exp %144 : vector<8x128xf32>
    %cst_45 = arith.constant 1.000000e+00 : f32
    %146 = vector.broadcast %cst_45 : f32 to vector<8x128xf32>
    %147 = arith.addf %146, %145 : vector<8x128xf32>
    %148 = arith.divf %146, %147 : vector<8x128xf32>
    %149 = arith.mulf %140, %122 : vector<8x128xf32>
    %150 = arith.mulf %134, %142 : vector<8x128xf32>
    %151 = arith.addf %149, %150 : vector<8x128xf32>
    %152 = math.tanh %151 : vector<8x128xf32>
    %153 = arith.mulf %148, %152 : vector<8x128xf32>
    %c32_46 = arith.constant 32 : index
    %c0_47 = arith.constant 0 : index
    %154 = vector.load %arg12[%c32_46, %c0_47] : memref<64x128xf32, #tpu.memory_space<vmem>>, vector<8x128xf32>
    tpu.vector_store %arg12[%c32_46, %c0_47], %153 {strides = array<i32>} : memref<64x128xf32, #tpu.memory_space<vmem>>, vector<8x128xf32>,
    %c40 = arith.constant 40 : index
    %c0_48 = arith.constant 0 : index
    %155 = vector.load %arg11[%c40, %c0_48] : memref<64x512xf32, #tpu.memory_space<vmem>>, vector<8x512xf32>
    %cst_49 = arith.constant dense<0.000000e+00> : vector<8x512xf32>
    %156 = tpu.matmul %153, %6, %cst_49 {dimension_numbers = #tpu.dot_dimension_numbers<[1], [0], [0], [1], [0, 0, 1, 1], [], []>} : vector<8x128xf32>, vector<128x512xf32>, vector<8x512xf32> -> vector<8x512xf32>
    %157 = arith.addf %155, %156 : vector<8x512xf32>
    %158 = vector.extract_strided_slice %157 {offsets = [0, 0], sizes = [8, 128], strides = [1, 1]} : vector<8x512xf32> to vector<8x128xf32>
    %159 = arith.negf %158 : vector<8x128xf32>
    %160 = math.exp %159 : vector<8x128xf32>
    %cst_50 = arith.constant 1.000000e+00 : f32
    %161 = vector.broadcast %cst_50 : f32 to vector<8x128xf32>
    %162 = arith.addf %161, %160 : vector<8x128xf32>
    %163 = arith.divf %161, %162 : vector<8x128xf32>
    %164 = vector.extract_strided_slice %157 {offsets = [0, 128], sizes = [8, 128], strides = [1, 1]} : vector<8x512xf32> to vector<8x128xf32>
    %165 = arith.negf %164 : vector<8x128xf32>
    %166 = math.exp %165 : vector<8x128xf32>
    %cst_51 = arith.constant 1.000000e+00 : f32
    %167 = vector.broadcast %cst_51 : f32 to vector<8x128xf32>
    %168 = arith.addf %167, %166 : vector<8x128xf32>
    %169 = arith.divf %167, %168 : vector<8x128xf32>
    %170 = vector.extract_strided_slice %157 {offsets = [0, 256], sizes = [8, 128], strides = [1, 1]} : vector<8x512xf32> to vector<8x128xf32>
    %171 = math.tanh %170 : vector<8x128xf32>
    %172 = vector.extract_strided_slice %157 {offsets = [0, 384], sizes = [8, 128], strides = [1, 1]} : vector<8x512xf32> to vector<8x128xf32>
    %173 = arith.negf %172 : vector<8x128xf32>
    %174 = math.exp %173 : vector<8x128xf32>
    %cst_52 = arith.constant 1.000000e+00 : f32
    %175 = vector.broadcast %cst_52 : f32 to vector<8x128xf32>
    %176 = arith.addf %175, %174 : vector<8x128xf32>
    %177 = arith.divf %175, %176 : vector<8x128xf32>
    %178 = arith.mulf %169, %151 : vector<8x128xf32>
    %179 = arith.mulf %163, %171 : vector<8x128xf32>
    %180 = arith.addf %178, %179 : vector<8x128xf32>
    %181 = math.tanh %180 : vector<8x128xf32>
    %182 = arith.mulf %177, %181 : vector<8x128xf32>
    %c40_53 = arith.constant 40 : index
    %c0_54 = arith.constant 0 : index
    %183 = vector.load %arg12[%c40_53, %c0_54] : memref<64x128xf32, #tpu.memory_space<vmem>>, vector<8x128xf32>
    tpu.vector_store %arg12[%c40_53, %c0_54], %182 {strides = array<i32>} : memref<64x128xf32, #tpu.memory_space<vmem>>, vector<8x128xf32>,
    %c48 = arith.constant 48 : index
    %c0_55 = arith.constant 0 : index
    %184 = vector.load %arg11[%c48, %c0_55] : memref<64x512xf32, #tpu.memory_space<vmem>>, vector<8x512xf32>
    %cst_56 = arith.constant dense<0.000000e+00> : vector<8x512xf32>
    %185 = tpu.matmul %182, %6, %cst_56 {dimension_numbers = #tpu.dot_dimension_numbers<[1], [0], [0], [1], [0, 0, 1, 1], [], []>} : vector<8x128xf32>, vector<128x512xf32>, vector<8x512xf32> -> vector<8x512xf32>
    %186 = arith.addf %184, %185 : vector<8x512xf32>
    %187 = vector.extract_strided_slice %186 {offsets = [0, 0], sizes = [8, 128], strides = [1, 1]} : vector<8x512xf32> to vector<8x128xf32>
    %188 = arith.negf %187 : vector<8x128xf32>
    %189 = math.exp %188 : vector<8x128xf32>
    %cst_57 = arith.constant 1.000000e+00 : f32
    %190 = vector.broadcast %cst_57 : f32 to vector<8x128xf32>
    %191 = arith.addf %190, %189 : vector<8x128xf32>
    %192 = arith.divf %190, %191 : vector<8x128xf32>
    %193 = vector.extract_strided_slice %186 {offsets = [0, 128], sizes = [8, 128], strides = [1, 1]} : vector<8x512xf32> to vector<8x128xf32>
    %194 = arith.negf %193 : vector<8x128xf32>
    %195 = math.exp %194 : vector<8x128xf32>
    %cst_58 = arith.constant 1.000000e+00 : f32
    %196 = vector.broadcast %cst_58 : f32 to vector<8x128xf32>
    %197 = arith.addf %196, %195 : vector<8x128xf32>
    %198 = arith.divf %196, %197 : vector<8x128xf32>
    %199 = vector.extract_strided_slice %186 {offsets = [0, 256], sizes = [8, 128], strides = [1, 1]} : vector<8x512xf32> to vector<8x128xf32>
    %200 = math.tanh %199 : vector<8x128xf32>
    %201 = vector.extract_strided_slice %186 {offsets = [0, 384], sizes = [8, 128], strides = [1, 1]} : vector<8x512xf32> to vector<8x128xf32>
    %202 = arith.negf %201 : vector<8x128xf32>
    %203 = math.exp %202 : vector<8x128xf32>
    %cst_59 = arith.constant 1.000000e+00 : f32
    %204 = vector.broadcast %cst_59 : f32 to vector<8x128xf32>
    %205 = arith.addf %204, %203 : vector<8x128xf32>
    %206 = arith.divf %204, %205 : vector<8x128xf32>
    %207 = arith.mulf %198, %180 : vector<8x128xf32>
    %208 = arith.mulf %192, %200 : vector<8x128xf32>
    %209 = arith.addf %207, %208 : vector<8x128xf32>
    %210 = math.tanh %209 : vector<8x128xf32>
    %211 = arith.mulf %206, %210 : vector<8x128xf32>
    %c48_60 = arith.constant 48 : index
    %c0_61 = arith.constant 0 : index
    %212 = vector.load %arg12[%c48_60, %c0_61] : memref<64x128xf32, #tpu.memory_space<vmem>>, vector<8x128xf32>
    tpu.vector_store %arg12[%c48_60, %c0_61], %211 {strides = array<i32>} : memref<64x128xf32, #tpu.memory_space<vmem>>, vector<8x128xf32>,
    %c56 = arith.constant 56 : index
    %c0_62 = arith.constant 0 : index
    %213 = vector.load %arg11[%c56, %c0_62] : memref<64x512xf32, #tpu.memory_space<vmem>>, vector<8x512xf32>
    %cst_63 = arith.constant dense<0.000000e+00> : vector<8x512xf32>
    %214 = tpu.matmul %211, %6, %cst_63 {dimension_numbers = #tpu.dot_dimension_numbers<[1], [0], [0], [1], [0, 0, 1, 1], [], []>} : vector<8x128xf32>, vector<128x512xf32>, vector<8x512xf32> -> vector<8x512xf32>
    %215 = arith.addf %213, %214 : vector<8x512xf32>
    %216 = vector.extract_strided_slice %215 {offsets = [0, 0], sizes = [8, 128], strides = [1, 1]} : vector<8x512xf32> to vector<8x128xf32>
    %217 = arith.negf %216 : vector<8x128xf32>
    %218 = math.exp %217 : vector<8x128xf32>
    %cst_64 = arith.constant 1.000000e+00 : f32
    %219 = vector.broadcast %cst_64 : f32 to vector<8x128xf32>
    %220 = arith.addf %219, %218 : vector<8x128xf32>
    %221 = arith.divf %219, %220 : vector<8x128xf32>
    %222 = vector.extract_strided_slice %215 {offsets = [0, 128], sizes = [8, 128], strides = [1, 1]} : vector<8x512xf32> to vector<8x128xf32>
    %223 = arith.negf %222 : vector<8x128xf32>
    %224 = math.exp %223 : vector<8x128xf32>
    %cst_65 = arith.constant 1.000000e+00 : f32
    %225 = vector.broadcast %cst_65 : f32 to vector<8x128xf32>
    %226 = arith.addf %225, %224 : vector<8x128xf32>
    %227 = arith.divf %225, %226 : vector<8x128xf32>
    %228 = vector.extract_strided_slice %215 {offsets = [0, 256], sizes = [8, 128], strides = [1, 1]} : vector<8x512xf32> to vector<8x128xf32>
    %229 = math.tanh %228 : vector<8x128xf32>
    %230 = vector.extract_strided_slice %215 {offsets = [0, 384], sizes = [8, 128], strides = [1, 1]} : vector<8x512xf32> to vector<8x128xf32>
    %231 = arith.negf %230 : vector<8x128xf32>
    %232 = math.exp %231 : vector<8x128xf32>
    %cst_66 = arith.constant 1.000000e+00 : f32
    %233 = vector.broadcast %cst_66 : f32 to vector<8x128xf32>
    %234 = arith.addf %233, %232 : vector<8x128xf32>
    %235 = arith.divf %233, %234 : vector<8x128xf32>
    %236 = arith.mulf %227, %209 : vector<8x128xf32>
    %237 = arith.mulf %221, %229 : vector<8x128xf32>
    %238 = arith.addf %236, %237 : vector<8x128xf32>
    %239 = math.tanh %238 : vector<8x128xf32>
    %240 = arith.mulf %235, %239 : vector<8x128xf32>
    %c56_67 = arith.constant 56 : index
    %c0_68 = arith.constant 0 : index
    %241 = vector.load %arg12[%c56_67, %c0_68] : memref<64x128xf32, #tpu.memory_space<vmem>>, vector<8x128xf32>
    tpu.vector_store %arg12[%c56_67, %c0_68], %240 {strides = array<i32>} : memref<64x128xf32, #tpu.memory_space<vmem>>, vector<8x128xf32>,
    %c0_69 = arith.constant 0 : index
    %c0_70 = arith.constant 0 : index
    %242 = vector.load %arg12[%c0_69, %c0_70] : memref<64x128xf32, #tpu.memory_space<vmem>>, vector<64x128xf32>
    %c0_71 = arith.constant 0 : index
    %c0_72 = arith.constant 0 : index
    %c0_73 = arith.constant 0 : index
    %243 = vector.load %arg3[%c0_71, %c0_72, %c0_73] : memref<1x128x512xf32, #tpu.memory_space<vmem>>, vector<1x128x512xf32>
    %244 = vector.shape_cast %243 : vector<1x128x512xf32> to vector<128x512xf32>
    %c1 = arith.constant 1 : index
    %c0_74 = arith.constant 0 : index
    %c0_75 = arith.constant 0 : index
    %245 = vector.load %arg5[%c1, %c0_74, %c0_75] : memref<2x1x512xf32, #tpu.memory_space<vmem>>, vector<1x1x512xf32>
    %246 = vector.shape_cast %245 : vector<1x1x512xf32> to vector<1x512xf32>
    %c1_76 = arith.constant 1 : index
    %c0_77 = arith.constant 0 : index
    %c0_78 = arith.constant 0 : index
    %247 = vector.load %arg4[%c1_76, %c0_77, %c0_78] : memref<2x128x512xf32, #tpu.memory_space<vmem>>, vector<1x128x512xf32>
    %248 = vector.shape_cast %247 : vector<1x128x512xf32> to vector<128x512xf32>
    %cst_79 = arith.constant dense<0.000000e+00> : vector<64x512xf32>
    %249 = tpu.matmul %242, %244, %cst_79 {dimension_numbers = #tpu.dot_dimension_numbers<[1], [0], [0], [1], [0, 0, 1, 1], [], []>} : vector<64x128xf32>, vector<128x512xf32>, vector<64x512xf32> -> vector<64x512xf32>
    %250 = vector.broadcast %246 : vector<1x512xf32> to vector<64x512xf32>
    %251 = arith.addf %249, %250 : vector<64x512xf32>
    %c0_80 = arith.constant 0 : index
    %c0_81 = arith.constant 0 : index
    %252 = vector.load %arg11[%c0_80, %c0_81] : memref<64x512xf32, #tpu.memory_space<vmem>>, vector<64x512xf32>
    tpu.vector_store %arg11[%c0_80, %c0_81], %251 {strides = array<i32>} : memref<64x512xf32, #tpu.memory_space<vmem>>, vector<64x512xf32>,
    %c0_82 = arith.constant 0 : index
    %c0_83 = arith.constant 0 : index
    %253 = vector.load %arg11[%c0_82, %c0_83] : memref<64x512xf32, #tpu.memory_space<vmem>>, vector<8x512xf32>
    %cst_84 = arith.constant 0.000000e+00 : f32
    %254 = vector.broadcast %cst_84 : f32 to vector<8x128xf32>
    %255 = vector.extract_strided_slice %253 {offsets = [0, 0], sizes = [8, 128], strides = [1, 1]} : vector<8x512xf32> to vector<8x128xf32>
    %256 = arith.negf %255 : vector<8x128xf32>
    %257 = math.exp %256 : vector<8x128xf32>
    %cst_85 = arith.constant 1.000000e+00 : f32
    %258 = vector.broadcast %cst_85 : f32 to vector<8x128xf32>
    %259 = arith.addf %258, %257 : vector<8x128xf32>
    %260 = arith.divf %258, %259 : vector<8x128xf32>
    %261 = vector.extract_strided_slice %253 {offsets = [0, 128], sizes = [8, 128], strides = [1, 1]} : vector<8x512xf32> to vector<8x128xf32>
    %262 = arith.negf %261 : vector<8x128xf32>
    %263 = math.exp %262 : vector<8x128xf32>
    %cst_86 = arith.constant 1.000000e+00 : f32
    %264 = vector.broadcast %cst_86 : f32 to vector<8x128xf32>
    %265 = arith.addf %264, %263 : vector<8x128xf32>
    %266 = arith.divf %264, %265 : vector<8x128xf32>
    %267 = vector.extract_strided_slice %253 {offsets = [0, 256], sizes = [8, 128], strides = [1, 1]} : vector<8x512xf32> to vector<8x128xf32>
    %268 = math.tanh %267 : vector<8x128xf32>
    %269 = vector.extract_strided_slice %253 {offsets = [0, 384], sizes = [8, 128], strides = [1, 1]} : vector<8x512xf32> to vector<8x128xf32>
    %270 = arith.negf %269 : vector<8x128xf32>
    %271 = math.exp %270 : vector<8x128xf32>
    %cst_87 = arith.constant 1.000000e+00 : f32
    %272 = vector.broadcast %cst_87 : f32 to vector<8x128xf32>
    %273 = arith.addf %272, %271 : vector<8x128xf32>
    %274 = arith.divf %272, %273 : vector<8x128xf32>
    %275 = arith.mulf %266, %254 : vector<8x128xf32>
    %276 = arith.mulf %260, %268 : vector<8x128xf32>
    %277 = arith.addf %275, %276 : vector<8x128xf32>
    %278 = math.tanh %277 : vector<8x128xf32>
    %279 = arith.mulf %274, %278 : vector<8x128xf32>
    %c8_88 = arith.constant 8 : index
    %c0_89 = arith.constant 0 : index
    %280 = vector.load %arg11[%c8_88, %c0_89] : memref<64x512xf32, #tpu.memory_space<vmem>>, vector<8x512xf32>
    %cst_90 = arith.constant dense<0.000000e+00> : vector<8x512xf32>
    %281 = tpu.matmul %279, %248, %cst_90 {dimension_numbers = #tpu.dot_dimension_numbers<[1], [0], [0], [1], [0, 0, 1, 1], [], []>} : vector<8x128xf32>, vector<128x512xf32>, vector<8x512xf32> -> vector<8x512xf32>
    %282 = arith.addf %280, %281 : vector<8x512xf32>
    %283 = vector.extract_strided_slice %282 {offsets = [0, 0], sizes = [8, 128], strides = [1, 1]} : vector<8x512xf32> to vector<8x128xf32>
    %284 = arith.negf %283 : vector<8x128xf32>
    %285 = math.exp %284 : vector<8x128xf32>
    %cst_91 = arith.constant 1.000000e+00 : f32
    %286 = vector.broadcast %cst_91 : f32 to vector<8x128xf32>
    %287 = arith.addf %286, %285 : vector<8x128xf32>
    %288 = arith.divf %286, %287 : vector<8x128xf32>
    %289 = vector.extract_strided_slice %282 {offsets = [0, 128], sizes = [8, 128], strides = [1, 1]} : vector<8x512xf32> to vector<8x128xf32>
    %290 = arith.negf %289 : vector<8x128xf32>
    %291 = math.exp %290 : vector<8x128xf32>
    %cst_92 = arith.constant 1.000000e+00 : f32
    %292 = vector.broadcast %cst_92 : f32 to vector<8x128xf32>
    %293 = arith.addf %292, %291 : vector<8x128xf32>
    %294 = arith.divf %292, %293 : vector<8x128xf32>
    %295 = vector.extract_strided_slice %282 {offsets = [0, 256], sizes = [8, 128], strides = [1, 1]} : vector<8x512xf32> to vector<8x128xf32>
    %296 = math.tanh %295 : vector<8x128xf32>
    %297 = vector.extract_strided_slice %282 {offsets = [0, 384], sizes = [8, 128], strides = [1, 1]} : vector<8x512xf32> to vector<8x128xf32>
    %298 = arith.negf %297 : vector<8x128xf32>
    %299 = math.exp %298 : vector<8x128xf32>
    %cst_93 = arith.constant 1.000000e+00 : f32
    %300 = vector.broadcast %cst_93 : f32 to vector<8x128xf32>
    %301 = arith.addf %300, %299 : vector<8x128xf32>
    %302 = arith.divf %300, %301 : vector<8x128xf32>
    %303 = arith.mulf %294, %277 : vector<8x128xf32>
    %304 = arith.mulf %288, %296 : vector<8x128xf32>
    %305 = arith.addf %303, %304 : vector<8x128xf32>
    %306 = math.tanh %305 : vector<8x128xf32>
    %307 = arith.mulf %302, %306 : vector<8x128xf32>
    %c16_94 = arith.constant 16 : index
    %c0_95 = arith.constant 0 : index
    %308 = vector.load %arg11[%c16_94, %c0_95] : memref<64x512xf32, #tpu.memory_space<vmem>>, vector<8x512xf32>
    %cst_96 = arith.constant dense<0.000000e+00> : vector<8x512xf32>
    %309 = tpu.matmul %307, %248, %cst_96 {dimension_numbers = #tpu.dot_dimension_numbers<[1], [0], [0], [1], [0, 0, 1, 1], [], []>} : vector<8x128xf32>, vector<128x512xf32>, vector<8x512xf32> -> vector<8x512xf32>
    %310 = arith.addf %308, %309 : vector<8x512xf32>
    %311 = vector.extract_strided_slice %310 {offsets = [0, 0], sizes = [8, 128], strides = [1, 1]} : vector<8x512xf32> to vector<8x128xf32>
    %312 = arith.negf %311 : vector<8x128xf32>
    %313 = math.exp %312 : vector<8x128xf32>
    %cst_97 = arith.constant 1.000000e+00 : f32
    %314 = vector.broadcast %cst_97 : f32 to vector<8x128xf32>
    %315 = arith.addf %314, %313 : vector<8x128xf32>
    %316 = arith.divf %314, %315 : vector<8x128xf32>
    %317 = vector.extract_strided_slice %310 {offsets = [0, 128], sizes = [8, 128], strides = [1, 1]} : vector<8x512xf32> to vector<8x128xf32>
    %318 = arith.negf %317 : vector<8x128xf32>
    %319 = math.exp %318 : vector<8x128xf32>
    %cst_98 = arith.constant 1.000000e+00 : f32
    %320 = vector.broadcast %cst_98 : f32 to vector<8x128xf32>
    %321 = arith.addf %320, %319 : vector<8x128xf32>
    %322 = arith.divf %320, %321 : vector<8x128xf32>
    %323 = vector.extract_strided_slice %310 {offsets = [0, 256], sizes = [8, 128], strides = [1, 1]} : vector<8x512xf32> to vector<8x128xf32>
    %324 = math.tanh %323 : vector<8x128xf32>
    %325 = vector.extract_strided_slice %310 {offsets = [0, 384], sizes = [8, 128], strides = [1, 1]} : vector<8x512xf32> to vector<8x128xf32>
    %326 = arith.negf %325 : vector<8x128xf32>
    %327 = math.exp %326 : vector<8x128xf32>
    %cst_99 = arith.constant 1.000000e+00 : f32
    %328 = vector.broadcast %cst_99 : f32 to vector<8x128xf32>
    %329 = arith.addf %328, %327 : vector<8x128xf32>
    %330 = arith.divf %328, %329 : vector<8x128xf32>
    %331 = arith.mulf %322, %305 : vector<8x128xf32>
    %332 = arith.mulf %316, %324 : vector<8x128xf32>
    %333 = arith.addf %331, %332 : vector<8x128xf32>
    %334 = math.tanh %333 : vector<8x128xf32>
    %335 = arith.mulf %330, %334 : vector<8x128xf32>
    %c24_100 = arith.constant 24 : index
    %c0_101 = arith.constant 0 : index
    %336 = vector.load %arg11[%c24_100, %c0_101] : memref<64x512xf32, #tpu.memory_space<vmem>>, vector<8x512xf32>
    %cst_102 = arith.constant dense<0.000000e+00> : vector<8x512xf32>
    %337 = tpu.matmul %335, %248, %cst_102 {dimension_numbers = #tpu.dot_dimension_numbers<[1], [0], [0], [1], [0, 0, 1, 1], [], []>} : vector<8x128xf32>, vector<128x512xf32>, vector<8x512xf32> -> vector<8x512xf32>
    %338 = arith.addf %336, %337 : vector<8x512xf32>
    %339 = vector.extract_strided_slice %338 {offsets = [0, 0], sizes = [8, 128], strides = [1, 1]} : vector<8x512xf32> to vector<8x128xf32>
    %340 = arith.negf %339 : vector<8x128xf32>
    %341 = math.exp %340 : vector<8x128xf32>
    %cst_103 = arith.constant 1.000000e+00 : f32
    %342 = vector.broadcast %cst_103 : f32 to vector<8x128xf32>
    %343 = arith.addf %342, %341 : vector<8x128xf32>
    %344 = arith.divf %342, %343 : vector<8x128xf32>
    %345 = vector.extract_strided_slice %338 {offsets = [0, 128], sizes = [8, 128], strides = [1, 1]} : vector<8x512xf32> to vector<8x128xf32>
    %346 = arith.negf %345 : vector<8x128xf32>
    %347 = math.exp %346 : vector<8x128xf32>
    %cst_104 = arith.constant 1.000000e+00 : f32
    %348 = vector.broadcast %cst_104 : f32 to vector<8x128xf32>
    %349 = arith.addf %348, %347 : vector<8x128xf32>
    %350 = arith.divf %348, %349 : vector<8x128xf32>
    %351 = vector.extract_strided_slice %338 {offsets = [0, 256], sizes = [8, 128], strides = [1, 1]} : vector<8x512xf32> to vector<8x128xf32>
    %352 = math.tanh %351 : vector<8x128xf32>
    %353 = vector.extract_strided_slice %338 {offsets = [0, 384], sizes = [8, 128], strides = [1, 1]} : vector<8x512xf32> to vector<8x128xf32>
    %354 = arith.negf %353 : vector<8x128xf32>
    %355 = math.exp %354 : vector<8x128xf32>
    %cst_105 = arith.constant 1.000000e+00 : f32
    %356 = vector.broadcast %cst_105 : f32 to vector<8x128xf32>
    %357 = arith.addf %356, %355 : vector<8x128xf32>
    %358 = arith.divf %356, %357 : vector<8x128xf32>
    %359 = arith.mulf %350, %333 : vector<8x128xf32>
    %360 = arith.mulf %344, %352 : vector<8x128xf32>
    %361 = arith.addf %359, %360 : vector<8x128xf32>
    %362 = math.tanh %361 : vector<8x128xf32>
    %363 = arith.mulf %358, %362 : vector<8x128xf32>
    %c32_106 = arith.constant 32 : index
    %c0_107 = arith.constant 0 : index
    %364 = vector.load %arg11[%c32_106, %c0_107] : memref<64x512xf32, #tpu.memory_space<vmem>>, vector<8x512xf32>
    %cst_108 = arith.constant dense<0.000000e+00> : vector<8x512xf32>
    %365 = tpu.matmul %363, %248, %cst_108 {dimension_numbers = #tpu.dot_dimension_numbers<[1], [0], [0], [1], [0, 0, 1, 1], [], []>} : vector<8x128xf32>, vector<128x512xf32>, vector<8x512xf32> -> vector<8x512xf32>
    %366 = arith.addf %364, %365 : vector<8x512xf32>
    %367 = vector.extract_strided_slice %366 {offsets = [0, 0], sizes = [8, 128], strides = [1, 1]} : vector<8x512xf32> to vector<8x128xf32>
    %368 = arith.negf %367 : vector<8x128xf32>
    %369 = math.exp %368 : vector<8x128xf32>
    %cst_109 = arith.constant 1.000000e+00 : f32
    %370 = vector.broadcast %cst_109 : f32 to vector<8x128xf32>
    %371 = arith.addf %370, %369 : vector<8x128xf32>
    %372 = arith.divf %370, %371 : vector<8x128xf32>
    %373 = vector.extract_strided_slice %366 {offsets = [0, 128], sizes = [8, 128], strides = [1, 1]} : vector<8x512xf32> to vector<8x128xf32>
    %374 = arith.negf %373 : vector<8x128xf32>
    %375 = math.exp %374 : vector<8x128xf32>
    %cst_110 = arith.constant 1.000000e+00 : f32
    %376 = vector.broadcast %cst_110 : f32 to vector<8x128xf32>
    %377 = arith.addf %376, %375 : vector<8x128xf32>
    %378 = arith.divf %376, %377 : vector<8x128xf32>
    %379 = vector.extract_strided_slice %366 {offsets = [0, 256], sizes = [8, 128], strides = [1, 1]} : vector<8x512xf32> to vector<8x128xf32>
    %380 = math.tanh %379 : vector<8x128xf32>
    %381 = vector.extract_strided_slice %366 {offsets = [0, 384], sizes = [8, 128], strides = [1, 1]} : vector<8x512xf32> to vector<8x128xf32>
    %382 = arith.negf %381 : vector<8x128xf32>
    %383 = math.exp %382 : vector<8x128xf32>
    %cst_111 = arith.constant 1.000000e+00 : f32
    %384 = vector.broadcast %cst_111 : f32 to vector<8x128xf32>
    %385 = arith.addf %384, %383 : vector<8x128xf32>
    %386 = arith.divf %384, %385 : vector<8x128xf32>
    %387 = arith.mulf %378, %361 : vector<8x128xf32>
    %388 = arith.mulf %372, %380 : vector<8x128xf32>
    %389 = arith.addf %387, %388 : vector<8x128xf32>
    %390 = math.tanh %389 : vector<8x128xf32>
    %391 = arith.mulf %386, %390 : vector<8x128xf32>
    %c40_112 = arith.constant 40 : index
    %c0_113 = arith.constant 0 : index
    %392 = vector.load %arg11[%c40_112, %c0_113] : memref<64x512xf32, #tpu.memory_space<vmem>>, vector<8x512xf32>
    %cst_114 = arith.constant dense<0.000000e+00> : vector<8x512xf32>
    %393 = tpu.matmul %391, %248, %cst_114 {dimension_numbers = #tpu.dot_dimension_numbers<[1], [0], [0], [1], [0, 0, 1, 1], [], []>} : vector<8x128xf32>, vector<128x512xf32>, vector<8x512xf32> -> vector<8x512xf32>
    %394 = arith.addf %392, %393 : vector<8x512xf32>
    %395 = vector.extract_strided_slice %394 {offsets = [0, 0], sizes = [8, 128], strides = [1, 1]} : vector<8x512xf32> to vector<8x128xf32>
    %396 = arith.negf %395 : vector<8x128xf32>
    %397 = math.exp %396 : vector<8x128xf32>
    %cst_115 = arith.constant 1.000000e+00 : f32
    %398 = vector.broadcast %cst_115 : f32 to vector<8x128xf32>
    %399 = arith.addf %398, %397 : vector<8x128xf32>
    %400 = arith.divf %398, %399 : vector<8x128xf32>
    %401 = vector.extract_strided_slice %394 {offsets = [0, 128], sizes = [8, 128], strides = [1, 1]} : vector<8x512xf32> to vector<8x128xf32>
    %402 = arith.negf %401 : vector<8x128xf32>
    %403 = math.exp %402 : vector<8x128xf32>
    %cst_116 = arith.constant 1.000000e+00 : f32
    %404 = vector.broadcast %cst_116 : f32 to vector<8x128xf32>
    %405 = arith.addf %404, %403 : vector<8x128xf32>
    %406 = arith.divf %404, %405 : vector<8x128xf32>
    %407 = vector.extract_strided_slice %394 {offsets = [0, 256], sizes = [8, 128], strides = [1, 1]} : vector<8x512xf32> to vector<8x128xf32>
    %408 = math.tanh %407 : vector<8x128xf32>
    %409 = vector.extract_strided_slice %394 {offsets = [0, 384], sizes = [8, 128], strides = [1, 1]} : vector<8x512xf32> to vector<8x128xf32>
    %410 = arith.negf %409 : vector<8x128xf32>
    %411 = math.exp %410 : vector<8x128xf32>
    %cst_117 = arith.constant 1.000000e+00 : f32
    %412 = vector.broadcast %cst_117 : f32 to vector<8x128xf32>
    %413 = arith.addf %412, %411 : vector<8x128xf32>
    %414 = arith.divf %412, %413 : vector<8x128xf32>
    %415 = arith.mulf %406, %389 : vector<8x128xf32>
    %416 = arith.mulf %400, %408 : vector<8x128xf32>
    %417 = arith.addf %415, %416 : vector<8x128xf32>
    %418 = math.tanh %417 : vector<8x128xf32>
    %419 = arith.mulf %414, %418 : vector<8x128xf32>
    %c48_118 = arith.constant 48 : index
    %c0_119 = arith.constant 0 : index
    %420 = vector.load %arg11[%c48_118, %c0_119] : memref<64x512xf32, #tpu.memory_space<vmem>>, vector<8x512xf32>
    %cst_120 = arith.constant dense<0.000000e+00> : vector<8x512xf32>
    %421 = tpu.matmul %419, %248, %cst_120 {dimension_numbers = #tpu.dot_dimension_numbers<[1], [0], [0], [1], [0, 0, 1, 1], [], []>} : vector<8x128xf32>, vector<128x512xf32>, vector<8x512xf32> -> vector<8x512xf32>
    %422 = arith.addf %420, %421 : vector<8x512xf32>
    %423 = vector.extract_strided_slice %422 {offsets = [0, 0], sizes = [8, 128], strides = [1, 1]} : vector<8x512xf32> to vector<8x128xf32>
    %424 = arith.negf %423 : vector<8x128xf32>
    %425 = math.exp %424 : vector<8x128xf32>
    %cst_121 = arith.constant 1.000000e+00 : f32
    %426 = vector.broadcast %cst_121 : f32 to vector<8x128xf32>
    %427 = arith.addf %426, %425 : vector<8x128xf32>
    %428 = arith.divf %426, %427 : vector<8x128xf32>
    %429 = vector.extract_strided_slice %422 {offsets = [0, 128], sizes = [8, 128], strides = [1, 1]} : vector<8x512xf32> to vector<8x128xf32>
    %430 = arith.negf %429 : vector<8x128xf32>
    %431 = math.exp %430 : vector<8x128xf32>
    %cst_122 = arith.constant 1.000000e+00 : f32
    %432 = vector.broadcast %cst_122 : f32 to vector<8x128xf32>
    %433 = arith.addf %432, %431 : vector<8x128xf32>
    %434 = arith.divf %432, %433 : vector<8x128xf32>
    %435 = vector.extract_strided_slice %422 {offsets = [0, 256], sizes = [8, 128], strides = [1, 1]} : vector<8x512xf32> to vector<8x128xf32>
    %436 = math.tanh %435 : vector<8x128xf32>
    %437 = vector.extract_strided_slice %422 {offsets = [0, 384], sizes = [8, 128], strides = [1, 1]} : vector<8x512xf32> to vector<8x128xf32>
    %438 = arith.negf %437 : vector<8x128xf32>
    %439 = math.exp %438 : vector<8x128xf32>
    %cst_123 = arith.constant 1.000000e+00 : f32
    %440 = vector.broadcast %cst_123 : f32 to vector<8x128xf32>
    %441 = arith.addf %440, %439 : vector<8x128xf32>
    %442 = arith.divf %440, %441 : vector<8x128xf32>
    %443 = arith.mulf %434, %417 : vector<8x128xf32>
    %444 = arith.mulf %428, %436 : vector<8x128xf32>
    %445 = arith.addf %443, %444 : vector<8x128xf32>
    %446 = math.tanh %445 : vector<8x128xf32>
    %447 = arith.mulf %442, %446 : vector<8x128xf32>
    %c56_124 = arith.constant 56 : index
    %c0_125 = arith.constant 0 : index
    %448 = vector.load %arg11[%c56_124, %c0_125] : memref<64x512xf32, #tpu.memory_space<vmem>>, vector<8x512xf32>
    %cst_126 = arith.constant dense<0.000000e+00> : vector<8x512xf32>
    %449 = tpu.matmul %447, %248, %cst_126 {dimension_numbers = #tpu.dot_dimension_numbers<[1], [0], [0], [1], [0, 0, 1, 1], [], []>} : vector<8x128xf32>, vector<128x512xf32>, vector<8x512xf32> -> vector<8x512xf32>
    %450 = arith.addf %448, %449 : vector<8x512xf32>
    %451 = vector.extract_strided_slice %450 {offsets = [0, 0], sizes = [8, 128], strides = [1, 1]} : vector<8x512xf32> to vector<8x128xf32>
    %452 = arith.negf %451 : vector<8x128xf32>
    %453 = math.exp %452 : vector<8x128xf32>
    %cst_127 = arith.constant 1.000000e+00 : f32
    %454 = vector.broadcast %cst_127 : f32 to vector<8x128xf32>
    %455 = arith.addf %454, %453 : vector<8x128xf32>
    %456 = arith.divf %454, %455 : vector<8x128xf32>
    %457 = vector.extract_strided_slice %450 {offsets = [0, 128], sizes = [8, 128], strides = [1, 1]} : vector<8x512xf32> to vector<8x128xf32>
    %458 = arith.negf %457 : vector<8x128xf32>
    %459 = math.exp %458 : vector<8x128xf32>
    %cst_128 = arith.constant 1.000000e+00 : f32
    %460 = vector.broadcast %cst_128 : f32 to vector<8x128xf32>
    %461 = arith.addf %460, %459 : vector<8x128xf32>
    %462 = arith.divf %460, %461 : vector<8x128xf32>
    %463 = vector.extract_strided_slice %450 {offsets = [0, 256], sizes = [8, 128], strides = [1, 1]} : vector<8x512xf32> to vector<8x128xf32>
    %464 = math.tanh %463 : vector<8x128xf32>
    %465 = vector.extract_strided_slice %450 {offsets = [0, 384], sizes = [8, 128], strides = [1, 1]} : vector<8x512xf32> to vector<8x128xf32>
    %466 = arith.negf %465 : vector<8x128xf32>
    %467 = math.exp %466 : vector<8x128xf32>
    %cst_129 = arith.constant 1.000000e+00 : f32
    %468 = vector.broadcast %cst_129 : f32 to vector<8x128xf32>
    %469 = arith.addf %468, %467 : vector<8x128xf32>
    %470 = arith.divf %468, %469 : vector<8x128xf32>
    %471 = arith.mulf %462, %445 : vector<8x128xf32>
    %472 = arith.mulf %456, %464 : vector<8x128xf32>
    %473 = arith.addf %471, %472 : vector<8x128xf32>
    %474 = math.tanh %473 : vector<8x128xf32>
    %475 = arith.mulf %470, %474 : vector<8x128xf32>
    %c0_130 = arith.constant 0 : index
    %c0_131 = arith.constant 0 : index
    %476 = vector.load %arg6[%c0_130, %c0_131] : memref<128x128xf32, #tpu.memory_space<vmem>>, vector<128x128xf32>
    %cst_132 = arith.constant dense<0.000000e+00> : vector<8x128xf32>
    %477 = tpu.matmul %475, %476, %cst_132 {dimension_numbers = #tpu.dot_dimension_numbers<[1], [0], [0], [1], [0, 0, 1, 1], [], []>} : vector<8x128xf32>, vector<128x128xf32>, vector<8x128xf32> -> vector<8x128xf32>
    %c0_133 = arith.constant 0 : index
    %c0_134 = arith.constant 0 : index
    %478 = vector.load %arg7[%c0_133, %c0_134] : memref<1x128xf32, #tpu.memory_space<vmem>>, vector<1x128xf32>
    %479 = vector.broadcast %478 : vector<1x128xf32> to vector<8x128xf32>
    %480 = arith.addf %477, %479 : vector<8x128xf32>
    %cst_135 = arith.constant 0.000000e+00 : f32
    %481 = vector.broadcast %cst_135 : f32 to vector<8x128xf32>
    %482 = arith.maximumf %480, %481 : vector<8x128xf32>
    %c0_136 = arith.constant 0 : index
    %c0_137 = arith.constant 0 : index
    %483 = vector.load %arg8[%c0_136, %c0_137] : memref<128x128xf32, #tpu.memory_space<vmem>>, vector<128x128xf32>
    %cst_138 = arith.constant dense<0.000000e+00> : vector<8x128xf32>
    %484 = tpu.matmul %482, %483, %cst_138 {dimension_numbers = #tpu.dot_dimension_numbers<[1], [0], [0], [1], [0, 0, 1, 1], [], []>} : vector<8x128xf32>, vector<128x128xf32>, vector<8x128xf32> -> vector<8x128xf32>
    %c0_139 = arith.constant 0 : index
    %c0_140 = arith.constant 0 : index
    %485 = vector.load %arg9[%c0_139, %c0_140] : memref<1x128xf32, #tpu.memory_space<vmem>>, vector<1x128xf32>
    %486 = vector.broadcast %485 : vector<1x128xf32> to vector<8x128xf32>
    %487 = arith.addf %484, %486 : vector<8x128xf32>
    %c0_141 = arith.constant 0 : index
    %c0_142 = arith.constant 0 : index
    %488 = vector.load %arg10[%c0_141, %c0_142] : memref<8x128xf32, #tpu.memory_space<vmem>>, vector<8x128xf32>
    tpu.vector_store %arg10[%c0_141, %c0_142], %487 {strides = array<i32>} : memref<8x128xf32, #tpu.memory_space<vmem>>, vector<8x128xf32>,
    return
  }
  func.func @transform_0(%arg0: i32) -> (i32, i32, i32) {
    %c0_i32 = arith.constant 0 : i32
    %c0_i32_0 = arith.constant 0 : i32
    %c0_i32_1 = arith.constant 0 : i32
    return %c0_i32, %arg0, %c0_i32_0 : i32, i32, i32
  }
  func.func @transform_1(%arg0: i32) -> (i32, i32) {
    %c0_i32 = arith.constant 0 : i32
    %c0_i32_0 = arith.constant 0 : i32
    %c0_i32_1 = arith.constant 0 : i32
    return %c0_i32, %c0_i32_0 : i32, i32
  }
  func.func @transform_2(%arg0: i32) -> (i32, i32, i32) {
    %c0_i32 = arith.constant 0 : i32
    %c0_i32_0 = arith.constant 0 : i32
    %c0_i32_1 = arith.constant 0 : i32
    %c0_i32_2 = arith.constant 0 : i32
    return %c0_i32, %c0_i32_0, %c0_i32_1 : i32, i32, i32
  }
  func.func @transform_3(%arg0: i32) -> (i32, i32, i32) {
    %c0_i32 = arith.constant 0 : i32
    %c0_i32_0 = arith.constant 0 : i32
    %c0_i32_1 = arith.constant 0 : i32
    %c0_i32_2 = arith.constant 0 : i32
    return %c0_i32, %c0_i32_0, %c0_i32_1 : i32, i32, i32
  }
  func.func @transform_4(%arg0: i32) -> (i32, i32, i32) {
    %c0_i32 = arith.constant 0 : i32
    %c0_i32_0 = arith.constant 0 : i32
    %c0_i32_1 = arith.constant 0 : i32
    %c0_i32_2 = arith.constant 0 : i32
    return %c0_i32, %c0_i32_0, %c0_i32_1 : i32, i32, i32
  }
  func.func @transform_5(%arg0: i32) -> (i32, i32) {
    %c0_i32 = arith.constant 0 : i32
    %c0_i32_0 = arith.constant 0 : i32
    %c0_i32_1 = arith.constant 0 : i32
    return %c0_i32, %c0_i32_0 : i32, i32
  }
  func.func @transform_6(%arg0: i32) -> (i32, i32) {
    %c0_i32 = arith.constant 0 : i32
    %c0_i32_0 = arith.constant 0 : i32
    %c0_i32_1 = arith.constant 0 : i32
    return %c0_i32, %c0_i32_0 : i32, i32
  }
  func.func @transform_7(%arg0: i32) -> (i32, i32) {
    %c0_i32 = arith.constant 0 : i32
    %c0_i32_0 = arith.constant 0 : i32
    %c0_i32_1 = arith.constant 0 : i32
    return %c0_i32, %c0_i32_0 : i32, i32
  }
  func.func @transform_8(%arg0: i32) -> (i32, i32) {
    %c0_i32 = arith.constant 0 : i32
    %c0_i32_0 = arith.constant 0 : i32
    %c0_i32_1 = arith.constant 0 : i32
    return %c0_i32, %c0_i32_0 : i32, i32
  }
  func.func @transform_9(%arg0: i32) -> (i32, i32) {
    %c0_i32 = arith.constant 0 : i32
    %c0_i32_0 = arith.constant 0 : i32
    return %arg0, %c0_i32 : i32, i32
  }
}

</mosaic_0001>

<bundles_post_ra>
// kernel: tpu_custom_call.1
= control target key start
LH: loop header
LB: loop body
LE: loop exit
PB: predicated region body
PF: predicated region fallthrough
CT: control target
= control target key end

     0   :  { %14 = vsyncpa [#allocation5], 0  ;;  %s6437_s0 = inlined_call_operand.hbm [shape: f32[8,8,48], index: 0, kind: input, shape index: {}]   ;;  %s6438_s1 = inlined_call_operand.hbm [shape: f32[48,512], index: 1, kind: input, shape index: {}]   ;;  %s6439_s2 = inlined_call_operand.hbm [shape: f32[1,128,512], index: 2, kind: input, shape index: {}]   ;;  %s6440_s3 = inlined_call_operand.hbm [shape: f32[2,128,512], index: 3, kind: input, shape index: {}]   ;;  %s6441_s4 = inlined_call_operand.vmem [shape: f32[2,1,512], index: 4, kind: input, shape index: {}]   ;;  %s6442_s5 = inlined_call_operand.hbm [shape: f32[128,128], index: 5, kind: input, shape index: {}]   ;;  %s6443_s6 = inlined_call_operand.vmem [shape: f32[1,128], index: 6, kind: input, shape index: {}]   ;;  %s6444_s7 = inlined_call_operand.hbm [shape: f32[128,128], index: 7, kind: input, shape index: {}]   ;;  %s6445_s8 = inlined_call_operand.vmem [shape: f32[1,128], index: 8, kind: input, shape index: {}]   ;;  %s6446_s9 = inlined_call_operand.hbm [shape: f32[8,128], index: 9, kind: output, shape index: {}]  }
   0x1   :  { %15 = vsyncpa [#allocation8], 0 }
   0x2   :  { %16 = vsyncpa [#allocation11], 0 }
   0x3   :  { %17 = vsyncpa [#allocation14], 0 }
   0x4   :  { %18 = vsyncpa [#allocation6], 0  ;;  %s5389_s30 = smov [#allocation7]   ;;  %s5225_s13 = scalar_lea.hbm %s6438_s1, 3072 }
   0x5   :  { %s36_s10 = sshll.u32 %s5389_s30, 4  ;;  %p5226_p0 = scmp.ne.s32.totalorder %s6438_s1, %s5225_s13  ;;  %s37_s10 = int_to_ptr.vmem [resolvable:$true] %s36_s10 }
   0x6   :  { %p5229_p1 = scmp.lt.u32.totalorder %s5225_s13, %s6438_s1 }
   0x8   :  { %p5231_p2 = pnand %p5229_p1, %p5226_p0 }
   0xa   :  { %5234 = shalt.err (!%p5231_p2)
}
   0xb   :  { %s5235_s18 = scalar_lea.vmem %s37_s10, 3072  ;;  %p5240_p4 = scmp.lt.s32.totalorder %s37_s10, %s37_s10 }
   0xc   :  { %p5236_p3 = scmp.ne.s32.totalorder %s37_s10, %s5235_s18  ;;  %p5241_p5 = scmp.lt.s32.totalorder %s5235_s18, %s5235_s18 }
   0xe   :  { %p5242_p6 = por %p5241_p5, %p5240_p4 }
  0x10   :  { %p5243_p7 = pnand %p5242_p6, %p5236_p3 }
  0x12   :  { %5246 = shalt.err (!%p5243_p7)
}
  0x13   :  { %s5390_s19 = smov 512   ;;  %s5391_s20 = smov 32  }
  0x14   :  { %42 = dma.hbm_to_vmem [thread:$0]  %s6438_s1, 3072, %s37_s10, [#allocation8], %s5390_s19, %s5390_s19, %s5391_s20  }
  0x15   :  { %s5392_s23 = smov [#allocation10]   ;;  %s5393_s25 = smov [#allocation4]  }
  0x16   :  { %s60_s24 = sshll.u32 %s5392_s23, 4  ;;  %s24_s26 = sshll.u32 %s5393_s25, 4  ;;  %s61_s24 = int_to_ptr.vmem [resolvable:$true] %s60_s24  ;;  %s25_s26 = int_to_ptr.vmem [resolvable:$true] %s24_s26 }
  0x17   :  { %s5247_s29 = scalar_lea.hbm %s6440_s3, 16384 }
  0x18   :  { %p5248_p8 = scmp.ne.s32.totalorder %s6440_s3, %s5247_s29  ;;  %p5251_p9 = scmp.lt.u32.totalorder %s5247_s29, %s6440_s3 }
  0x1a   :  { %p5253_p10 = pnand %p5251_p9, %p5248_p8 }
  0x1c   :  { %5256 = shalt.err (!%p5253_p10)
}
  0x1d   :  { %s5257_s1 = scalar_lea.vmem %s61_s24, 16384  ;;  %p5262_p12 = scmp.lt.s32.totalorder %s61_s24, %s61_s24 }
  0x1e   :  { %p5258_p11 = scmp.ne.s32.totalorder %s61_s24, %s5257_s1  ;;  %p5263_p13 = scmp.lt.s32.totalorder %s5257_s1, %s5257_s1 }
  0x20   :  { %p5264_p0 = por %p5263_p13, %p5262_p12 }
  0x22   :  { %p5265_p1 = pnand %p5264_p0, %p5258_p11 }
  0x24   :  { %5268 = shalt.err (!%p5265_p1)
}
  0x25   :  { %66 = dma.hbm_to_vmem [thread:$0]  %s6440_s3, 16384, %s61_s24, [#allocation11], %s5390_s19, %s5390_s19, %s5391_s20  }
  0x26   :  { %s5269_s17 = scalar_lea.hbm %s6437_s0, 1024 }
  0x27   :  { %p5270_p2 = scmp.ne.s32.totalorder %s6437_s0, %s5269_s17  ;;  %p5273_p3 = scmp.lt.u32.totalorder %s5269_s17, %s6437_s0 }
  0x29   :  { %p5275_p4 = pnand %p5273_p3, %p5270_p2 }
  0x2b   :  { %5278 = shalt.err (!%p5275_p4)
}
  0x2c   :  { %s5279_s25 = scalar_lea.vmem %s25_s26, 1024  ;;  %p5284_p6 = scmp.lt.s32.totalorder %s25_s26, %s25_s26 }
  0x2d   :  { %p5280_p5 = scmp.ne.s32.totalorder %s25_s26, %s5279_s25  ;;  %p5285_p7 = scmp.lt.s32.totalorder %s5279_s25, %s5279_s25 }
  0x2f   :  { %p5286_p8 = por %p5285_p7, %p5284_p6 }
  0x31   :  { %p5287_p9 = pnand %p5286_p8, %p5280_p5 }
  0x33   :  { %5290 = shalt.err (!%p5287_p9)
}
  0x34   :  { %s5394_s3 = smov 128   ;;  %s5395_s24 = smov 8  }
  0x35   :  { %30 = dma.hbm_to_vmem [thread:$0]  %s6437_s0, 1024, %s25_s26, [#allocation5], %s5394_s3, %s5394_s3, %s5395_s24  }
  0x36   :  { %s5396_s29 = smov [#allocation9]   ;;  %s5397_s11 = smov [#allocation12]  }
  0x37   :  { %s48_s30 = sshll.u32 %s5396_s29, 4  ;;  %s74_s12 = sshll.u32 %s5397_s11, 4  ;;  %s49_s30 = int_to_ptr.vmem [resolvable:$true] %s48_s30  ;;  %s75_s12 = int_to_ptr.vmem [resolvable:$true] %s74_s12 }
  0x38   :  { %s5291_s10 = scalar_lea.hbm %s6439_s2, 8192 }
  0x39   :  { %p5292_p10 = scmp.ne.s32.totalorder %s6439_s2, %s5291_s10  ;;  %p5295_p11 = scmp.lt.u32.totalorder %s5291_s10, %s6439_s2 }
  0x3b   :  { %p5297_p12 = pnand %p5295_p11, %p5292_p10 }
  0x3d   :  { %5300 = shalt.err (!%p5297_p12)
}
  0x3e   :  { %s5301_s0 = scalar_lea.vmem %s49_s30, 8192  ;;  %p5306_p0 = scmp.lt.s32.totalorder %s49_s30, %s49_s30 }
  0x3f   :  { %p5302_p13 = scmp.ne.s32.totalorder %s49_s30, %s5301_s0  ;;  %p5307_p1 = scmp.lt.s32.totalorder %s5301_s0, %s5301_s0 }
  0x41   :  { %p5308_p2 = por %p5307_p1, %p5306_p0 }
  0x43   :  { %p5309_p3 = pnand %p5308_p2, %p5302_p13 }
  0x45   :  { %5312 = shalt.err (!%p5309_p3)
}
  0x46   :  { %54 = dma.hbm_to_vmem [thread:$0]  %s6439_s2, 8192, %s49_s30, [#allocation8], %s5390_s19, %s5390_s19, %s5391_s20  }
  0x47   :  { %s5313_s23 = scalar_lea.hbm %s6442_s5, 2048 }
  0x48   :  { %p5314_p4 = scmp.ne.s32.totalorder %s6442_s5, %s5313_s23  ;;  %p5317_p5 = scmp.lt.u32.totalorder %s5313_s23, %s6442_s5 }
  0x4a   :  { %p5319_p6 = pnand %p5317_p5, %p5314_p4 }
  0x4c   :  { %5322 = shalt.err (!%p5319_p6)
}
  0x4d   :  { %s5323_s11 = scalar_lea.vmem %s75_s12, 2048  ;;  %p5328_p8 = scmp.lt.s32.totalorder %s75_s12, %s75_s12 }
  0x4e   :  { %p5324_p7 = scmp.ne.s32.totalorder %s75_s12, %s5323_s11  ;;  %p5329_p9 = scmp.lt.s32.totalorder %s5323_s11, %s5323_s11 }
  0x50   :  { %p5330_p10 = por %p5329_p9, %p5328_p8 }
  0x52   :  { %p5331_p11 = pnand %p5330_p10, %p5324_p7 }
  0x54   :  { %5334 = shalt.err (!%p5331_p11)
}
  0x55   :  { %80 = dma.hbm_to_vmem [thread:$0]  %s6442_s5, 2048, %s75_s12, [#allocation11], %s5394_s3, %s5394_s3, %s5395_s24  }
  0x56   :  { %s5398_s20 = smov [#allocation13]   ;;  %s5335_s10 = scalar_lea.hbm %s6444_s7, 2048 }
  0x57   :  { %s88_s30 = sshll.u32 %s5398_s20, 4  ;;  %p5336_p12 = scmp.ne.s32.totalorder %s6444_s7, %s5335_s10  ;;  %s89_s30 = int_to_ptr.vmem [resolvable:$true] %s88_s30 }
  0x58   :  { %p5339_p13 = scmp.lt.u32.totalorder %s5335_s10, %s6444_s7 }
  0x5a   :  { %p5341_p0 = pnand %p5339_p13, %p5336_p12 }
  0x5c   :  { %5344 = shalt.err (!%p5341_p0)
}
  0x5d   :  { %s5345_s0 = scalar_lea.vmem %s89_s30, 2048  ;;  %p5350_p2 = scmp.lt.s32.totalorder %s89_s30, %s89_s30 }
  0x5e   :  { %p5346_p1 = scmp.ne.s32.totalorder %s89_s30, %s5345_s0  ;;  %p5351_p3 = scmp.lt.s32.totalorder %s5345_s0, %s5345_s0 }
  0x60   :  { %p5352_p4 = por %p5351_p3, %p5350_p2 }
  0x62   :  { %p5353_p5 = pnand %p5352_p4, %p5346_p1 }
  0x64   :  { %5356 = shalt.err (!%p5353_p5)
}
  0x65   :  { %94 = dma.hbm_to_vmem [thread:$0]  %s6444_s7, 2048, %s89_s30, [#allocation14], %s5394_s3, %s5394_s3, %s5395_s24  }
  0x66   :  { %5379 = dma.done.wait [#allocation5], 1024  }
  0x67   :  { %5380 = vsyncadd [#allocation5], 4294966272 }
  0x68   :  { %5381 = dma.done.wait [#allocation8], 11264  }
  0x69   :  { %5382 = vsyncadd [#allocation8], 4294956032 }
  0x6a   :  { %5383 = dma.done.wait [#allocation11], 18432  }
  0x6b   :  { %5384 = vsyncadd [#allocation11], 4294948864 }
  0x6c   :  { %5385 = dma.done.wait [#allocation14], 2048  }
  0x6d   :  { %5386 = vsyncadd [#allocation14], 4294965248  ;;  %v5399_v0 = vmov 0.0   ;;  %v124_v1 = vld [vmem:[#allocation7 + $0x8] sm:$0xff]  ;;  %v123_v3 = vld [vmem:[#allocation7] sm:$0xff]  ;;  %vm233_vm0 = vcmask 392192  }
  0x6e   :  { %322 = vmatprep.mubr.f32.mxu0 %v5399_v0  ;;  %435 = vmatprep.mubr.f32.mxu1 %v5399_v0  ;;  %v128_v2 = vld [vmem:[#allocation7 + $0x28] sm:$0xff]  ;;  %v127_v5 = vld [vmem:[#allocation7 + $0x20] sm:$0xff]  ;;  %v126_v17 = vld [vmem:[#allocation7 + $0x18] sm:$0xff]  ;;  %vm5401_vm1 = vmmov 0   ;;  %s5402_s23 = smov [#allocation15]  }
  0x6f   :  { %v3811_v4 = vpack.c.bf16 %v128_v2, %v124_v1  ;;  %v132_v6 = vld [vmem:[#allocation7 + $0x48] sm:$0xff]  ;;  %v3813_v8 = vpack.c.bf16 %v127_v5, %v123_v3  ;;  %v131_v10 = vld [vmem:[#allocation7 + $0x40] sm:$0xff]  ;;  %v130_v18 = vld [vmem:[#allocation7 + $0x38] sm:$0xff]  ;;  %s3628_s25 = sshll.u32 %s5402_s23, 4  ;;  %s3629_s25 = int_to_ptr.vmem [resolvable:$true] %s3628_s25 }
  0x70   :  { %v136_v7 = vld [vmem:[#allocation7 + $0x68] sm:$0xff]  ;;  %v135_v11 = vld [vmem:[#allocation7 + $0x60] sm:$0xff]  ;;  %v3823_v20 = vpack.c.bf16 %v130_v18, %v126_v17  ;;  %v125_v21 = vld [vmem:[#allocation7 + $0x10] sm:$0xff]  ;;  %s5357_s27 = scalar_lea.vmem %s3629_s25, 128  ;;  %p5362_p7 = scmp.lt.s32.totalorder %s3629_s25, %s3629_s25 }
  0x71   :  { %v3815_v9 = vpack.c.bf16 %v136_v7, %v132_v6  ;;  %v140_v12 = vld [vmem:[#allocation7 + $0x88] sm:$0xff]  ;;  %3812 = vmatprep.subr.bf16.mxu0 %v3811_v4  ;;  %v139_v14 = vld [vmem:[#allocation7 + $0x80] sm:$0xff]  ;;  %v3817_v15 = vpack.c.bf16 %v135_v11, %v131_v10  ;;  %v129_v22 = vld [vmem:[#allocation7 + $0x30] sm:$0xff]  ;;  %p5358_p6 = scmp.ne.s32.totalorder %s3629_s25, %s5357_s27  ;;  %p5363_p8 = scmp.lt.s32.totalorder %s5357_s27, %s5357_s27 }
  0x72   :  { %v144_v13 = vld [vmem:[#allocation7 + $0xa8] sm:$0xff]  ;;  %3814 = vmatpush1.bf16.msra.mxu0 %v3813_v8  ;;  %v143_v16 = vld [vmem:[#allocation7 + $0xa0] sm:$0xff]  ;;  %v134_v23 = vld [vmem:[#allocation7 + $0x58] sm:$0xff]  ;;  %v3825_v24 = vpack.c.bf16 %v129_v22, %v125_v21  ;;  %3824 = vmatprep.subr.bf16.mxu1 %v3823_v20 }
  0x73   :  { %3816 = vmatprep.subr.bf16.mxu0 %v3815_v9  ;;  %v3819_v19 = vpack.c.bf16 %v144_v13, %v140_v12  ;;  %v138_v25 = vld [vmem:[#allocation7 + $0x78] sm:$0xff]  ;;  %v133_v26 = vld [vmem:[#allocation7 + $0x50] sm:$0xff]  ;;  %v3821_v31 = vpack.c.bf16 %v143_v16, %v139_v14  ;;  %v115_v36 = vld [vmem:[#allocation4] sm:$0xff]  ;;  %p5364_p9 = por %p5363_p8, %p5362_p7 }
  0x74   :  { %v137_v27 = vld [vmem:[#allocation7 + $0x70] sm:$0xff]  ;;  %v3827_v28 = vpack.c.bf16 %v138_v25, %v134_v23  ;;  %v142_v29 = vld [vmem:[#allocation7 + $0x98] sm:$0xff]  ;;  %3826 = vmatpush1.bf16.msra.mxu1 %v3825_v24  ;;  %v149_v38 = vld [vmem:[#allocation10 + $0x8] sm:$0xff] }
  0x75   :  { %v146_v30 = vld [vmem:[#allocation7 + $0xb8] sm:$0xff]  ;;  %v3829_v32 = vpack.c.bf16 %v137_v27, %v133_v26  ;;  %v141_v34 = vld [vmem:[#allocation7 + $0x90] sm:$0xff]  ;;  %v153_v39 = vld [vmem:[#allocation10 + $0x28] sm:$0xff]  ;;  %p5365_p10 = pnand %p5364_p9, %p5358_p6 }
  0x76   :  { %3818 = vmatpush1.bf16.msra.mxu0 %v3817_v15  ;;  %3828 = vmatprep.subr.bf16.mxu1 %v3827_v28  ;;  %v3831_v33 = vpack.c.bf16 %v146_v30, %v142_v29  ;;  %v145_v35 = vld [vmem:[#allocation7 + $0xb0] sm:$0xff]  ;;  %v151_v40 = vld [vmem:[#allocation10 + $0x18] sm:$0xff]  ;;  %v5549_v41 = vpack.c.bf16 %v153_v39, %v149_v38  ;;  %v148_v42 = vld [vmem:[#allocation10] sm:$0xff] }
  0x77   :  { %3820 = vmatprep.subr.bf16.mxu0 %v3819_v19  ;;  %v3833_v37 = vpack.c.bf16 %v145_v35, %v141_v34  ;;  %v152_v43 = vld [vmem:[#allocation10 + $0x20] sm:$0xff]  ;;  %v155_v44 = vld [vmem:[#allocation10 + $0x38] sm:$0xff]  ;;  %v150_v47 = vld [vmem:[#allocation10 + $0x10] sm:$0xff] }
  0x78   :  { %3830 = vmatpush1.bf16.msra.mxu1 %v3829_v32  ;;  %v5551_v45 = vpack.c.bf16 %v152_v43, %v148_v42  ;;  %v5553_v46 = vpack.c.bf16 %v155_v44, %v151_v40  ;;  %v154_v48 = vld [vmem:[#allocation10 + $0x30] sm:$0xff]  ;;  %v157_v50 = vld [vmem:[#allocation10 + $0x48] sm:$0xff]  ;;  %v159_v52 = vld [vmem:[#allocation10 + $0x58] sm:$0xff] }
  0x79   :  { %3832 = vmatprep.subr.bf16.mxu1 %v3831_v33  ;;  %v5556_v49 = vpack.c.bf16 %v154_v48, %v150_v47  ;;  %v161_v51 = vld [vmem:[#allocation10 + $0x68] sm:$0xff]  ;;  %v156_v54 = vld [vmem:[#allocation10 + $0x40] sm:$0xff]  ;;  %v163_v56 = vld [vmem:[#allocation10 + $0x78] sm:$0xff] }
  0x7a   :  { %3822 = vmatpush1.bf16.msra.mxu0 %v3821_v31  ;;  %v5561_v53 = vpack.c.bf16 %v161_v51, %v157_v50  ;;  %v160_v55 = vld [vmem:[#allocation10 + $0x60] sm:$0xff]  ;;  %v116_v57 = vld [vmem:[#allocation4 + $0x8] sm:$0xff]  ;;  %v5565_v59 = vpack.c.bf16 %v163_v56, %v159_v52  ;;  %v158_v60 = vld [vmem:[#allocation10 + $0x50] sm:$0xff] }
  0x7b   :  { %3836 = vmatprep.subr.bf16.mxu0 %v5549_v41  ;;  %v5563_v58 = vpack.c.bf16 %v160_v55, %v156_v54  ;;  %v162_v61 = vld [vmem:[#allocation10 + $0x70] sm:$0xff]  ;;  %v165_v63 = vld [vmem:[#allocation10 + $0x88] sm:$0xff]  ;;  %v167_v2 = vld [vmem:[#allocation10 + $0x98] sm:$0xff] }
  0x7c   :  { %3834 = vmatpush1.bf16.msra.mxu1 %v3833_v37  ;;  %v5569_v62 = vpack.c.bf16 %v162_v61, %v158_v60  ;;  %v169_v1 = vld [vmem:[#allocation10 + $0xa8] sm:$0xff]  ;;  %v164_v4 = vld [vmem:[#allocation10 + $0x80] sm:$0xff]  ;;  %v171_v6 = vld [vmem:[#allocation10 + $0xb8] sm:$0xff] }
  0x7d   :  { %3640 = vmatmul.mubr.msk.f32.vlgmr.msra.gmra.mrb[0].mxu0 %vm233_vm0, %v115_v36  ;;  %3868 = vmatprep.subr.bf16.mxu1 %v5553_v46  ;;  %v5575_v3 = vpack.c.bf16 %v169_v1, %v165_v63  ;;  %v168_v5 = vld [vmem:[#allocation10 + $0xa0] sm:$0xff]  ;;  %v117_v7 = vld [vmem:[#allocation4 + $0x10] sm:$0xff]  ;;  %v5581_v9 = vpack.c.bf16 %v171_v6, %v167_v2  ;;  %v173_v13 = vld [vmem:[#allocation10 + $0xc8] sm:$0xff] }
  0x7e   :  { %328 = vmatprep.mubr.f32.mxu0 %v5399_v0  ;;  %3838 = vmatpush1.bf16.msra.mxu0 %v5551_v45  ;;  %v5579_v8 = vpack.c.bf16 %v168_v5, %v164_v4  ;;  %v166_v10 = vld [vmem:[#allocation10 + $0x90] sm:$0xff]  ;;  %v177_v14 = vld [vmem:[#allocation10 + $0xe8] sm:$0xff]  ;;  %v175_v15 = vld [vmem:[#allocation10 + $0xd8] sm:$0xff] }
  0x7f   :  { %3648 = vmatmul.mubr.msk.f32.vlgmr.msra.gmra.mrb[0].mxu1 %vm233_vm0, %v115_v36  ;;  %3840 = vmatprep.subr.bf16.mxu0 %v5561_v53  ;;  %v170_v11 = vld [vmem:[#allocation10 + $0xb0] sm:$0xff]  ;;  %v5591_v16 = vpack.c.bf16 %v177_v14, %v173_v13  ;;  %v172_v17 = vld [vmem:[#allocation10 + $0xc0] sm:$0xff]  ;;  %v179_v19 = vld [vmem:[#allocation10 + $0xf8] sm:$0xff] }
  0x80   :  { %441 = vmatprep.mubr.f32.mxu1 %v5399_v0  ;;  %3870 = vmatpush1.bf16.msra.mxu1 %v5556_v49  ;;  %v5585_v12 = vpack.c.bf16 %v170_v11, %v166_v10  ;;  %v176_v18 = vld [vmem:[#allocation10 + $0xe0] sm:$0xff]  ;;  %v118_v20 = vld [vmem:[#allocation4 + $0x18] sm:$0xff]  ;;  %v5597_v22 = vpack.c.bf16 %v179_v19, %v175_v15  ;;  %v174_v23 = vld [vmem:[#allocation10 + $0xd0] sm:$0xff] }
  0x81   :  { %3641 = vmatmul.mubr.msk.f32.gmra.mrb[2].mxu0 %vm233_vm0, %v116_v57  ;;  %3872 = vmatprep.subr.bf16.mxu1 %v5565_v59  ;;  %v5595_v21 = vpack.c.bf16 %v176_v18, %v172_v17  ;;  %v178_v24 = vld [vmem:[#allocation10 + $0xf0] sm:$0xff]  ;;  %v181_v26 = vld [vmem:[#allocation10 + $0x108] sm:$0xff]  ;;  %v183_v28 = vld [vmem:[#allocation10 + $0x118] sm:$0xff] }
  0x82   :  { %3842 = vmatpush1.bf16.msra.mxu0 %v5563_v58  ;;  %334 = vmatprep.mubr.f32.mxu0 %v5399_v0  ;;  %v5601_v25 = vpack.c.bf16 %v178_v24, %v174_v23  ;;  %v185_v27 = vld [vmem:[#allocation10 + $0x128] sm:$0xff]  ;;  %v180_v30 = vld [vmem:[#allocation10 + $0x100] sm:$0xff]  ;;  %v187_v32 = vld [vmem:[#allocation10 + $0x138] sm:$0xff] }
  0x83   :  { %3649 = vmatmul.mubr.msk.f32.gmra.mrb[2].mxu1 %vm233_vm0, %v116_v57  ;;  %3844 = vmatprep.subr.bf16.mxu0 %v5575_v3  ;;  %v5607_v29 = vpack.c.bf16 %v185_v27, %v181_v26  ;;  %v184_v31 = vld [vmem:[#allocation10 + $0x120] sm:$0xff]  ;;  %v5613_v35 = vpack.c.bf16 %v187_v32, %v183_v28  ;;  %v182_v36 = vld [vmem:[#allocation10 + $0x110] sm:$0xff]  ;;  %v189_v39 = vld [vmem:[#allocation10 + $0x148] sm:$0xff]  ;;  %v213_v32 = vlaneseq }
  0x84   :  { %3874 = vmatpush1.bf16.msra.mxu1 %v5569_v62  ;;  %447 = vmatprep.mubr.f32.mxu1 %v5399_v0  ;;  %v119_v33 = vld [vmem:[#allocation4 + $0x20] sm:$0xff]  ;;  %v5611_v34 = vpack.c.bf16 %v184_v31, %v180_v30  ;;  %v186_v37 = vld [vmem:[#allocation10 + $0x130] sm:$0xff]  ;;  %v193_v40 = vld [vmem:[#allocation10 + $0x168] sm:$0xff] }
  0x85   :  { %3642 = vmatmul.mubr.msk.f32.gmra.mrb[4].mxu0 %vm233_vm0, %v117_v7  ;;  %3876 = vmatprep.subr.bf16.mxu1 %v5581_v9  ;;  %v5617_v38 = vpack.c.bf16 %v186_v37, %v182_v36  ;;  %v191_v42 = vld [vmem:[#allocation10 + $0x158] sm:$0xff]  ;;  %v5623_v43 = vpack.c.bf16 %v193_v40, %v189_v39  ;;  %v188_v44 = vld [vmem:[#allocation10 + $0x140] sm:$0xff]  ;;  %v120_v50 = vld [vmem:[#allocation4 + $0x28] sm:$0xff] }
  0x86   :  { %3846 = vmatpush1.bf16.msra.mxu0 %v5579_v8  ;;  %340 = vmatprep.mubr.f32.mxu0 %v5399_v0  ;;  %v192_v47 = vld [vmem:[#allocation10 + $0x160] sm:$0xff]  ;;  %v195_v48 = vld [vmem:[#allocation10 + $0x178] sm:$0xff]  ;;  %v190_v54 = vld [vmem:[#allocation10 + $0x150] sm:$0xff] }
  0x87   :  { %3650 = vmatmul.mubr.msk.f32.gmra.mrb[4].mxu1 %vm233_vm0, %v117_v7  ;;  %3848 = vmatprep.subr.bf16.mxu0 %v5591_v16  ;;  %v5627_v51 = vpack.c.bf16 %v192_v47, %v188_v44  ;;  %v5629_v52 = vpack.c.bf16 %v195_v48, %v191_v42  ;;  %v194_v55 = vld [vmem:[#allocation10 + $0x170] sm:$0xff]  ;;  %v197_v57 = vld [vmem:[#allocation10 + $0x188] sm:$0xff]  ;;  %v196_v1 = vld [vmem:[#allocation10 + $0x180] sm:$0xff] }
  0x88   :  { %3878 = vmatpush1.bf16.msra.mxu1 %v5585_v12  ;;  %453 = vmatprep.mubr.f32.mxu1 %v5399_v0  ;;  %v5633_v56 = vpack.c.bf16 %v194_v55, %v190_v54  ;;  %v201_v60 = vld [vmem:[#allocation10 + $0x1a8] sm:$0xff]  ;;  %v121_v61 = vld [vmem:[#allocation4 + $0x30] sm:$0xff]  ;;  %v200_v2 = vld [vmem:[#allocation10 + $0x1a0] sm:$0xff] }
  0x89   :  { %3643 = vmatmul.mubr.msk.f32.gmra.mrb[6].mxu0 %vm233_vm0, %v118_v20  ;;  %3880 = vmatprep.subr.bf16.mxu1 %v5597_v22  ;;  %v5637_v63 = vpack.c.bf16 %v201_v60, %v197_v57  ;;  %v199_v4 = vld [vmem:[#allocation10 + $0x198] sm:$0xff]  ;;  %v5641_v5 = vpack.c.bf16 %v200_v2, %v196_v1  ;;  %v198_v7 = vld [vmem:[#allocation10 + $0x190] sm:$0xff]  ;;  %v205_v14 = vld [vmem:[#allocation10 + $0x1c8] sm:$0xff] }
  0x8a   :  { %3850 = vmatpush1.bf16.msra.mxu0 %v5595_v21  ;;  %346 = vmatprep.mubr.f32.mxu0 %v5399_v0  ;;  %v203_v6 = vld [vmem:[#allocation10 + $0x1b8] sm:$0xff]  ;;  %v202_v10 = vld [vmem:[#allocation10 + $0x1b0] sm:$0xff]  ;;  %v209_v15 = vld [vmem:[#allocation10 + $0x1e8] sm:$0xff] }
  0x8b   :  { %3651 = vmatmul.mubr.msk.f32.gmra.mrb[6].mxu1 %vm233_vm0, %v118_v20  ;;  %3852 = vmatprep.subr.bf16.mxu0 %v5607_v29  ;;  %v5645_v11 = vpack.c.bf16 %v203_v6, %v199_v4  ;;  %v5647_v13 = vpack.c.bf16 %v202_v10, %v198_v7  ;;  %v122_v17 = vld [vmem:[#allocation4 + $0x38] sm:$0xff]  ;;  %v5651_v18 = vpack.c.bf16 %v209_v15, %v205_v14  ;;  %v204_v19 = vld [vmem:[#allocation10 + $0x1c0] sm:$0xff]  ;;  %v206_v27 = vld [vmem:[#allocation10 + $0x1d0] sm:$0xff] }
  0x8c   :  { %3882 = vmatpush1.bf16.msra.mxu1 %v5601_v25  ;;  %459 = vmatprep.mubr.f32.mxu1 %v5399_v0  ;;  %v208_v20 = vld [vmem:[#allocation10 + $0x1e0] sm:$0xff]  ;;  %v207_v23 = vld [vmem:[#allocation10 + $0x1d8] sm:$0xff]  ;;  %v210_v28 = vld [vmem:[#allocation10 + $0x1f0] sm:$0xff] }
  0x8d   :  { %3644 = vmatmul.mubr.msk.f32.gmra.mrb[8].mxu0 %vm233_vm0, %v119_v33  ;;  %3884 = vmatprep.subr.bf16.mxu1 %v5613_v35  ;;  %v5655_v24 = vpack.c.bf16 %v208_v20, %v204_v19  ;;  %v211_v26 = vld [vmem:[#allocation10 + $0x1f8] sm:$0xff]  ;;  %v5663_v31 = vpack.c.bf16 %v210_v28, %v206_v27  ;;  %v147_v37 = vld [vmem:[%s6441_s4] sm:$0xf] }
  0x8e   :  { %3854 = vmatpush1.bf16.msra.mxu0 %v5611_v34  ;;  %352 = vmatprep.mubr.f32.mxu0 %v5399_v0  ;;  %v5659_v30 = vpack.c.bf16 %v211_v26, %v207_v23 }
  0x8f   :  { %3652 = vmatmul.mubr.msk.f32.gmra.mrb[8].mxu1 %vm233_vm0, %v119_v33  ;;  %3856 = vmatprep.subr.bf16.mxu0 %v5623_v43  ;;  %v5675_v33 = vshrl.u32 %v213_v32, 7 }
  0x90   :  { %3886 = vmatpush1.bf16.msra.mxu1 %v5617_v38  ;;  %465 = vmatprep.mubr.f32.mxu1 %v5399_v0 }
  0x91   :  { %3645 = vmatmul.mubr.msk.f32.gmra.mrb[10].mxu0 %vm233_vm0, %v120_v50  ;;  %3888 = vmatprep.subr.bf16.mxu1 %v5629_v52  ;;  %v215_v36 = vsub.s32 0, %v5675_v33  ;;  %v219_v39 = vsub.s32 1, %v5675_v33  ;;  %v227_v44 = vsub.s32 3, %v5675_v33 }
  0x92   :  { %3858 = vmatpush1.bf16.msra.mxu0 %v5627_v51  ;;  %358 = vmatprep.mubr.f32.mxu0 %v5399_v0 }
  0x93   :  { %3653 = vmatmul.mubr.msk.f32.gmra.mrb[10].mxu1 %vm233_vm0, %v120_v50  ;;  %3860 = vmatprep.subr.bf16.mxu0 %v5637_v63  ;;  %v5684_v40 = vrot.slane %v147_v37, %v215_v36  ;;  %v5688_v42 = vrot.slane %v147_v37, %v219_v39  ;;  %v5695_v57 = vrot.slane %v147_v37, %v227_v44 }
  0x94   :  { %3890 = vmatpush1.bf16.msra.mxu1 %v5633_v56  ;;  %471 = vmatprep.mubr.f32.mxu1 %v5399_v0 }
  0x95   :  { %3646 = vmatmul.mubr.msk.f32.gmra.mrb[12].mxu0 %vm233_vm0, %v121_v61  ;;  %3892 = vmatprep.subr.bf16.mxu1 %v5645_v11 }
  0x96   :  { %3862 = vmatpush1.bf16.msra.mxu0 %v5641_v5  ;;  %364 = vmatprep.mubr.f32.mxu0 %v5399_v0 }
  0x97   :  { %3654 = vmatmul.mubr.msk.f32.gmra.mrb[12].mxu1 %vm233_vm0, %v121_v61  ;;  %3864 = vmatprep.subr.bf16.mxu0 %v5651_v18  ;;  %v223_v61 = vsub.s32 2, %v5675_v33 }
  0x98   :  { %3894 = vmatpush1.bf16.msra.mxu1 %v5647_v13  ;;  %477 = vmatprep.mubr.f32.mxu1 %v5399_v0 }
  0x99   :  { %3647 = vmatmul.mubr.msk.f32.gmra.mrb[14].mxu0 %vm233_vm0, %v122_v17  ;;  %3896 = vmatprep.subr.bf16.mxu1 %v5659_v30  ;;  %v5701_v6 = vrot.slane %v147_v37, %v223_v61 }
  0x9a   :  { %3866 = vmatpush1.bf16.msra.mxu0 %v5655_v24  ;;  %613 = vmatprep.mubr.f32.mxu0 %v5399_v0 }
  0x9b   :  { %3655 = vmatmul.mubr.msk.f32.gmra.mrb[14].mxu1 %vm233_vm0, %v122_v17  ;;  %3900 = vmatprep.subr.bf16.mxu0 %v5549_v41 }
  0x9c   :  { %3898 = vmatpush1.bf16.msra.mxu1 %v5663_v31  ;;  %684 = vmatprep.mubr.f32.mxu1 %v5399_v0 }
  0x9d   :  { %3932 = vmatprep.subr.bf16.mxu1 %v5553_v46 }
 0x150   :  { %v324_v47 = vpop.f32.mrb[0].mxu0 }
 0x151   :  { %v325_v48 = vadd.f32 %v324_v47, %v5684_v40  ;;  %v326_v50 = vpop.f32.mrb[1].mxu0 }
 0x152   :  { %v327_v54 = vadd.f32 %v326_v50, %v5688_v42  ;;  %v437_v1 = vpop.f32.mrb[0].mxu1 }
 0x153   :  { %v3656_v55 = vmul.f32 -1.442695, %v325_v48  ;;  %v439_v2 = vpop.f32.mrb[1].mxu1  ;;  %v438_v10 = vadd.f32 %v437_v1, %v5701_v6 }
 0x154   :  { %v3657_v60 = vmul.f32 -1.442695, %v327_v54  ;;  %v440_v4 = vadd.f32 %v439_v2, %v5695_v57 }
 0x155   :  { %4969 = vpow2.f32 %v3656_v55 }
 0x156   :  { %4971 = vpow2.f32 %v3657_v60  ;;  %v3658_v7 = vmul.f32 -1.442695, %v440_v4 }
 0x158   :  { %4973 = vpow2.f32 %v3658_v7 }
 0x159   :  { %4975 = vtanh.f32 %v438_v10 }
 0x15f   :  { %v4970_v14 = vpop.eup %4969 }
 0x160   :  { %v4972_v15 = vpop.eup %4971  ;;  %v523_v17 = vadd.f32 1.0, %v4970_v14 }
 0x161   :  { %v529_v19 = vadd.f32 1.0, %v4972_v15 }
 0x162   :  { %4977 = vrcp.f32 %v523_v17  ;;  %v4974_v20 = vpop.eup %4973 }
 0x163   :  { %4979 = vrcp.f32 %v529_v19  ;;  %v4976_v23 = vpop.eup %4975  ;;  %v536_v27 = vadd.f32 1.0, %v4974_v20 }
 0x165   :  { %4981 = vrcp.f32 %v536_v27 }
 0x16c   :  { %v4978_v26 = vpop.eup %4977 }
 0x16d   :  { %v4980_v28 = vpop.eup %4979  ;;  %v540_v32 = vmul.f32 %v4978_v26, %v4976_v23 }
 0x16e   :  { %v539_v47 = vmul.f32 0.0, %v4980_v28 }
 0x16f   :  { %v4982_v48 = vpop.eup %4981 }
 0x170   :  { %v5704_v37 = vadd.f32 %v540_v32, %v539_v47 }
 0x172   :  { %4983 = vtanh.f32 %v5704_v37 }
 0x17c   :  { %v4984_v50 = vpop.eup %4983 }
 0x17d   :  { %v5707_v54 = vmul.f32 %v4984_v50, %v4982_v48 }
 0x17f   :  { %614 = vmatmul.mubr.f32.vlgmr.msra.gmra.mrb[2].mxu0 %v5707_v54  ;;  %685 = vmatmul.mubr.f32.vlgmr.msra.gmra.mrb[2].mxu1 %v5707_v54 }
 0x180   :  { %3902 = vmatpush1.bf16.msra.mxu0 %v5551_v45  ;;  %3934 = vmatpush1.bf16.msra.mxu1 %v5556_v49 }
 0x181   :  { %3904 = vmatprep.subr.bf16.mxu0 %v5561_v53  ;;  %3936 = vmatprep.subr.bf16.mxu1 %v5565_v59 }
 0x182   :  { %788 = vmatprep.mubr.f32.mxu0 %v5399_v0  ;;  %859 = vmatprep.mubr.f32.mxu1 %v5399_v0 }
 0x184   :  { %3906 = vmatpush1.bf16.msra.mxu0 %v5563_v58  ;;  %3938 = vmatpush1.bf16.msra.mxu1 %v5569_v62 }
 0x185   :  { %3908 = vmatprep.subr.bf16.mxu0 %v5575_v3  ;;  %3940 = vmatprep.subr.bf16.mxu1 %v5581_v9 }
 0x188   :  { %3910 = vmatpush1.bf16.msra.mxu0 %v5579_v8  ;;  %3942 = vmatpush1.bf16.msra.mxu1 %v5585_v12 }
 0x189   :  { %3912 = vmatprep.subr.bf16.mxu0 %v5591_v16  ;;  %3944 = vmatprep.subr.bf16.mxu1 %v5597_v22 }
 0x18c   :  { %3914 = vmatpush1.bf16.msra.mxu0 %v5595_v21  ;;  %3946 = vmatpush1.bf16.msra.mxu1 %v5601_v25 }
 0x18d   :  { %3916 = vmatprep.subr.bf16.mxu0 %v5607_v29  ;;  %3948 = vmatprep.subr.bf16.mxu1 %v5613_v35 }
 0x190   :  { %3918 = vmatpush1.bf16.msra.mxu0 %v5611_v34  ;;  %3950 = vmatpush1.bf16.msra.mxu1 %v5617_v38 }
 0x191   :  { %3920 = vmatprep.subr.bf16.mxu0 %v5623_v43  ;;  %3952 = vmatprep.subr.bf16.mxu1 %v5629_v52 }
 0x194   :  { %3922 = vmatpush1.bf16.msra.mxu0 %v5627_v51  ;;  %3954 = vmatpush1.bf16.msra.mxu1 %v5633_v56 }
 0x195   :  { %3924 = vmatprep.subr.bf16.mxu0 %v5637_v63  ;;  %3956 = vmatprep.subr.bf16.mxu1 %v5645_v11 }
 0x198   :  { %3926 = vmatpush1.bf16.msra.mxu0 %v5641_v5  ;;  %3958 = vmatpush1.bf16.msra.mxu1 %v5647_v13 }
 0x199   :  { %3928 = vmatprep.subr.bf16.mxu0 %v5651_v18  ;;  %3960 = vmatprep.subr.bf16.mxu1 %v5659_v30 }
 0x19c   :  { %3930 = vmatpush1.bf16.msra.mxu0 %v5655_v24  ;;  %3962 = vmatpush1.bf16.msra.mxu1 %v5663_v31 }
 0x19d   :  { %3964 = vmatprep.subr.bf16.mxu0 %v5549_v41  ;;  %3996 = vmatprep.subr.bf16.mxu1 %v5553_v46 }
 0x252   :  { %v615_v55 = vpop.f32.mrb[2].mxu0  ;;  %v686_v60 = vpop.f32.mrb[2].mxu1 }
 0x253   :  { %v4843_v1 = vadd.f32 %v615_v55, %v5684_v40  ;;  %v617_v2 = vpop.f32.mrb[3].mxu0  ;;  %v688_v4 = vpop.f32.mrb[3].mxu1  ;;  %v4857_v19 = vadd.f32 %v686_v60, %v5701_v6 }
 0x254   :  { %v4844_v7 = vadd.f32 %v617_v2, %v5688_v42  ;;  %v4858_v15 = vadd.f32 %v688_v4, %v5695_v57 }
 0x255   :  { %v3659_v10 = vmul.f32 -1.442695, %v4843_v1 }
 0x256   :  { %v3660_v14 = vmul.f32 -1.442695, %v4844_v7  ;;  %v3661_v17 = vmul.f32 -1.442695, %v4858_v15 }
 0x257   :  { %4985 = vpow2.f32 %v3659_v10 }
 0x258   :  { %4987 = vpow2.f32 %v3660_v14 }
 0x259   :  { %4989 = vpow2.f32 %v3661_v17 }
 0x25a   :  { %4991 = vtanh.f32 %v4857_v19 }
 0x261   :  { %v4986_v20 = vpop.eup %4985 }
 0x262   :  { %v4988_v23 = vpop.eup %4987  ;;  %v698_v26 = vadd.f32 1.0, %v4986_v20 }
 0x263   :  { %v704_v27 = vadd.f32 1.0, %v4988_v23  ;;  %v4990_v28 = vpop.eup %4989 }
 0x264   :  { %4993 = vrcp.f32 %v698_v26  ;;  %v4992_v32 = vpop.eup %4991  ;;  %v711_v55 = vadd.f32 1.0, %v4990_v28 }
 0x265   :  { %4995 = vrcp.f32 %v704_v27 }
 0x266   :  { %4997 = vrcp.f32 %v711_v55 }
 0x26e   :  { %v4994_v47 = vpop.eup %4993 }
 0x26f   :  { %v4996_v48 = vpop.eup %4995  ;;  %v715_v50 = vmul.f32 %v4994_v47, %v4992_v32 }
 0x270   :  { %v714_v1 = vmul.f32 %v4996_v48, %v5704_v37  ;;  %v4998_v60 = vpop.eup %4997 }
 0x272   :  { %v5750_v2 = vadd.f32 %v715_v50, %v714_v1 }
 0x274   :  { %4999 = vtanh.f32 %v5750_v2 }
 0x27e   :  { %v5000_v4 = vpop.eup %4999 }
 0x27f   :  { %v5753_v7 = vmul.f32 %v5000_v4, %v4998_v60 }
 0x281   :  { %789 = vmatmul.mubr.f32.vlgmr.msra.gmra.mrb[4].mxu0 %v5753_v7  ;;  %860 = vmatmul.mubr.f32.vlgmr.msra.gmra.mrb[4].mxu1 %v5753_v7 }
 0x282   :  { %3966 = vmatpush1.bf16.msra.mxu0 %v5551_v45  ;;  %3998 = vmatpush1.bf16.msra.mxu1 %v5556_v49 }
 0x283   :  { %3968 = vmatprep.subr.bf16.mxu0 %v5561_v53  ;;  %4000 = vmatprep.subr.bf16.mxu1 %v5565_v59 }
 0x284   :  { %963 = vmatprep.mubr.f32.mxu0 %v5399_v0  ;;  %1034 = vmatprep.mubr.f32.mxu1 %v5399_v0 }
 0x286   :  { %3970 = vmatpush1.bf16.msra.mxu0 %v5563_v58  ;;  %4002 = vmatpush1.bf16.msra.mxu1 %v5569_v62 }
 0x287   :  { %3972 = vmatprep.subr.bf16.mxu0 %v5575_v3  ;;  %4004 = vmatprep.subr.bf16.mxu1 %v5581_v9 }
 0x28a   :  { %3974 = vmatpush1.bf16.msra.mxu0 %v5579_v8  ;;  %4006 = vmatpush1.bf16.msra.mxu1 %v5585_v12 }
 0x28b   :  { %3976 = vmatprep.subr.bf16.mxu0 %v5591_v16  ;;  %4008 = vmatprep.subr.bf16.mxu1 %v5597_v22 }
 0x28e   :  { %3978 = vmatpush1.bf16.msra.mxu0 %v5595_v21  ;;  %4010 = vmatpush1.bf16.msra.mxu1 %v5601_v25 }
 0x28f   :  { %3980 = vmatprep.subr.bf16.mxu0 %v5607_v29  ;;  %4012 = vmatprep.subr.bf16.mxu1 %v5613_v35 }
 0x292   :  { %3982 = vmatpush1.bf16.msra.mxu0 %v5611_v34  ;;  %4014 = vmatpush1.bf16.msra.mxu1 %v5617_v38 }
 0x293   :  { %3984 = vmatprep.subr.bf16.mxu0 %v5623_v43  ;;  %4016 = vmatprep.subr.bf16.mxu1 %v5629_v52 }
 0x296   :  { %3986 = vmatpush1.bf16.msra.mxu0 %v5627_v51  ;;  %4018 = vmatpush1.bf16.msra.mxu1 %v5633_v56 }
 0x297   :  { %3988 = vmatprep.subr.bf16.mxu0 %v5637_v63  ;;  %4020 = vmatprep.subr.bf16.mxu1 %v5645_v11 }
 0x29a   :  { %3990 = vmatpush1.bf16.msra.mxu0 %v5641_v5  ;;  %4022 = vmatpush1.bf16.msra.mxu1 %v5647_v13 }
 0x29b   :  { %3992 = vmatprep.subr.bf16.mxu0 %v5651_v18  ;;  %4024 = vmatprep.subr.bf16.mxu1 %v5659_v30 }
 0x29e   :  { %3994 = vmatpush1.bf16.msra.mxu0 %v5655_v24  ;;  %4026 = vmatpush1.bf16.msra.mxu1 %v5663_v31 }
 0x29f   :  { %4028 = vmatprep.subr.bf16.mxu0 %v5549_v41  ;;  %4060 = vmatprep.subr.bf16.mxu1 %v5553_v46 }
 0x354   :  { %v790_v37 = vpop.f32.mrb[4].mxu0  ;;  %v861_v10 = vpop.f32.mrb[4].mxu1 }
 0x355   :  { %v4845_v14 = vadd.f32 %v790_v37, %v5684_v40  ;;  %v792_v15 = vpop.f32.mrb[5].mxu0  ;;  %v863_v17 = vpop.f32.mrb[5].mxu1  ;;  %v4859_v28 = vadd.f32 %v861_v10, %v5701_v6 }
 0x356   :  { %v4846_v19 = vadd.f32 %v792_v15, %v5688_v42  ;;  %v4860_v26 = vadd.f32 %v863_v17, %v5695_v57 }
 0x357   :  { %v3662_v20 = vmul.f32 -1.442695, %v4845_v14 }
 0x358   :  { %v3663_v23 = vmul.f32 -1.442695, %v4846_v19  ;;  %v3664_v27 = vmul.f32 -1.442695, %v4860_v26 }
 0x359   :  { %5001 = vpow2.f32 %v3662_v20 }
 0x35a   :  { %5003 = vpow2.f32 %v3663_v23 }
 0x35b   :  { %5005 = vpow2.f32 %v3664_v27 }
 0x35c   :  { %5007 = vtanh.f32 %v4859_v28 }
 0x363   :  { %v5002_v32 = vpop.eup %5001 }
 0x364   :  { %v5004_v47 = vpop.eup %5003  ;;  %v873_v48 = vadd.f32 1.0, %v5002_v32 }
 0x365   :  { %v879_v50 = vadd.f32 1.0, %v5004_v47  ;;  %v5006_v55 = vpop.eup %5005 }
 0x366   :  { %5009 = vrcp.f32 %v873_v48  ;;  %v5008_v1 = vpop.eup %5007  ;;  %v886_v14 = vadd.f32 1.0, %v5006_v55 }
 0x367   :  { %5011 = vrcp.f32 %v879_v50 }
 0x368   :  { %5013 = vrcp.f32 %v886_v14 }
 0x370   :  { %v5010_v60 = vpop.eup %5009 }
 0x371   :  { %v5012_v4 = vpop.eup %5011  ;;  %v890_v37 = vmul.f32 %v5010_v60, %v5008_v1 }
 0x372   :  { %v889_v15 = vmul.f32 %v5012_v4, %v5750_v2  ;;  %v5014_v10 = vpop.eup %5013 }
 0x374   :  { %v5796_v17 = vadd.f32 %v890_v37, %v889_v15 }
 0x376   :  { %5015 = vtanh.f32 %v5796_v17 }
 0x380   :  { %v5016_v19 = vpop.eup %5015 }
 0x381   :  { %v5799_v20 = vmul.f32 %v5016_v19, %v5014_v10 }
 0x383   :  { %964 = vmatmul.mubr.f32.vlgmr.msra.gmra.mrb[6].mxu0 %v5799_v20  ;;  %1035 = vmatmul.mubr.f32.vlgmr.msra.gmra.mrb[6].mxu1 %v5799_v20 }
 0x384   :  { %4030 = vmatpush1.bf16.msra.mxu0 %v5551_v45  ;;  %4062 = vmatpush1.bf16.msra.mxu1 %v5556_v49 }
 0x385   :  { %4032 = vmatprep.subr.bf16.mxu0 %v5561_v53  ;;  %4064 = vmatprep.subr.bf16.mxu1 %v5565_v59 }
 0x386   :  { %1138 = vmatprep.mubr.f32.mxu0 %v5399_v0  ;;  %1209 = vmatprep.mubr.f32.mxu1 %v5399_v0 }
 0x388   :  { %4034 = vmatpush1.bf16.msra.mxu0 %v5563_v58  ;;  %4066 = vmatpush1.bf16.msra.mxu1 %v5569_v62 }
 0x389   :  { %4036 = vmatprep.subr.bf16.mxu0 %v5575_v3  ;;  %4068 = vmatprep.subr.bf16.mxu1 %v5581_v9 }
 0x38c   :  { %4038 = vmatpush1.bf16.msra.mxu0 %v5579_v8  ;;  %4070 = vmatpush1.bf16.msra.mxu1 %v5585_v12 }
 0x38d   :  { %4040 = vmatprep.subr.bf16.mxu0 %v5591_v16  ;;  %4072 = vmatprep.subr.bf16.mxu1 %v5597_v22 }
 0x390   :  { %4042 = vmatpush1.bf16.msra.mxu0 %v5595_v21  ;;  %4074 = vmatpush1.bf16.msra.mxu1 %v5601_v25 }
 0x391   :  { %4044 = vmatprep.subr.bf16.mxu0 %v5607_v29  ;;  %4076 = vmatprep.subr.bf16.mxu1 %v5613_v35 }
 0x394   :  { %4046 = vmatpush1.bf16.msra.mxu0 %v5611_v34  ;;  %4078 = vmatpush1.bf16.msra.mxu1 %v5617_v38 }
 0x395   :  { %4048 = vmatprep.subr.bf16.mxu0 %v5623_v43  ;;  %4080 = vmatprep.subr.bf16.mxu1 %v5629_v52 }
 0x398   :  { %4050 = vmatpush1.bf16.msra.mxu0 %v5627_v51  ;;  %4082 = vmatpush1.bf16.msra.mxu1 %v5633_v56 }
 0x399   :  { %4052 = vmatprep.subr.bf16.mxu0 %v5637_v63  ;;  %4084 = vmatprep.subr.bf16.mxu1 %v5645_v11 }
 0x39c   :  { %4054 = vmatpush1.bf16.msra.mxu0 %v5641_v5  ;;  %4086 = vmatpush1.bf16.msra.mxu1 %v5647_v13 }
 0x39d   :  { %4056 = vmatprep.subr.bf16.mxu0 %v5651_v18  ;;  %4088 = vmatprep.subr.bf16.mxu1 %v5659_v30 }
 0x3a0   :  { %4058 = vmatpush1.bf16.msra.mxu0 %v5655_v24  ;;  %4090 = vmatpush1.bf16.msra.mxu1 %v5663_v31 }
 0x3a1   :  { %4092 = vmatprep.subr.bf16.mxu0 %v5549_v41  ;;  %4124 = vmatprep.subr.bf16.mxu1 %v5553_v46 }
 0x456   :  { %v965_v2 = vpop.f32.mrb[6].mxu0  ;;  %v1036_v23 = vpop.f32.mrb[6].mxu1 }
 0x457   :  { %v4847_v26 = vadd.f32 %v965_v2, %v5684_v40  ;;  %v967_v27 = vpop.f32.mrb[7].mxu0  ;;  %v1038_v28 = vpop.f32.mrb[7].mxu1  ;;  %v4861_v1 = vadd.f32 %v1036_v23, %v5701_v6 }
 0x458   :  { %v4848_v32 = vadd.f32 %v967_v27, %v5688_v42  ;;  %v4862_v50 = vadd.f32 %v1038_v28, %v5695_v57 }
 0x459   :  { %v3665_v47 = vmul.f32 -1.442695, %v4847_v26 }
 0x45a   :  { %v3666_v48 = vmul.f32 -1.442695, %v4848_v32  ;;  %v3667_v55 = vmul.f32 -1.442695, %v4862_v50 }
 0x45b   :  { %5017 = vpow2.f32 %v3665_v47 }
 0x45c   :  { %5019 = vpow2.f32 %v3666_v48 }
 0x45d   :  { %5021 = vpow2.f32 %v3667_v55 }
 0x45e   :  { %5023 = vtanh.f32 %v4861_v1 }
 0x465   :  { %v5018_v60 = vpop.eup %5017 }
 0x466   :  { %v5020_v4 = vpop.eup %5019  ;;  %v1048_v37 = vadd.f32 1.0, %v5018_v60 }
 0x467   :  { %v1054_v14 = vadd.f32 1.0, %v5020_v4  ;;  %v5022_v15 = vpop.eup %5021 }
 0x468   :  { %5025 = vrcp.f32 %v1048_v37  ;;  %v5024_v10 = vpop.eup %5023  ;;  %v1061_v27 = vadd.f32 1.0, %v5022_v15 }
 0x469   :  { %5027 = vrcp.f32 %v1054_v14 }
 0x46a   :  { %5029 = vrcp.f32 %v1061_v27 }
 0x472   :  { %v5026_v19 = vpop.eup %5025 }
 0x473   :  { %v5028_v2 = vpop.eup %5027  ;;  %v1065_v26 = vmul.f32 %v5026_v19, %v5024_v10 }
 0x474   :  { %v1064_v32 = vmul.f32 %v5028_v2, %v5796_v17  ;;  %v5030_v23 = vpop.eup %5029 }
 0x476   :  { %v5842_v28 = vadd.f32 %v1065_v26, %v1064_v32 }
 0x478   :  { %5031 = vtanh.f32 %v5842_v28 }
 0x482   :  { %v5032_v47 = vpop.eup %5031 }
 0x483   :  { %v5845_v48 = vmul.f32 %v5032_v47, %v5030_v23 }
 0x485   :  { %1139 = vmatmul.mubr.f32.vlgmr.msra.gmra.mrb[8].mxu0 %v5845_v48  ;;  %1210 = vmatmul.mubr.f32.vlgmr.msra.gmra.mrb[8].mxu1 %v5845_v48 }
 0x486   :  { %4094 = vmatpush1.bf16.msra.mxu0 %v5551_v45  ;;  %4126 = vmatpush1.bf16.msra.mxu1 %v5556_v49 }
 0x487   :  { %4096 = vmatprep.subr.bf16.mxu0 %v5561_v53  ;;  %4128 = vmatprep.subr.bf16.mxu1 %v5565_v59 }
 0x488   :  { %1313 = vmatprep.mubr.f32.mxu0 %v5399_v0  ;;  %1384 = vmatprep.mubr.f32.mxu1 %v5399_v0 }
 0x48a   :  { %4098 = vmatpush1.bf16.msra.mxu0 %v5563_v58  ;;  %4130 = vmatpush1.bf16.msra.mxu1 %v5569_v62 }
 0x48b   :  { %4100 = vmatprep.subr.bf16.mxu0 %v5575_v3  ;;  %4132 = vmatprep.subr.bf16.mxu1 %v5581_v9 }
 0x48e   :  { %4102 = vmatpush1.bf16.msra.mxu0 %v5579_v8  ;;  %4134 = vmatpush1.bf16.msra.mxu1 %v5585_v12 }
 0x48f   :  { %4104 = vmatprep.subr.bf16.mxu0 %v5591_v16  ;;  %4136 = vmatprep.subr.bf16.mxu1 %v5597_v22 }
 0x492   :  { %4106 = vmatpush1.bf16.msra.mxu0 %v5595_v21  ;;  %4138 = vmatpush1.bf16.msra.mxu1 %v5601_v25 }
 0x493   :  { %4108 = vmatprep.subr.bf16.mxu0 %v5607_v29  ;;  %4140 = vmatprep.subr.bf16.mxu1 %v5613_v35 }
 0x496   :  { %4110 = vmatpush1.bf16.msra.mxu0 %v5611_v34  ;;  %4142 = vmatpush1.bf16.msra.mxu1 %v5617_v38 }
 0x497   :  { %4112 = vmatprep.subr.bf16.mxu0 %v5623_v43  ;;  %4144 = vmatprep.subr.bf16.mxu1 %v5629_v52 }
 0x49a   :  { %4114 = vmatpush1.bf16.msra.mxu0 %v5627_v51  ;;  %4146 = vmatpush1.bf16.msra.mxu1 %v5633_v56 }
 0x49b   :  { %4116 = vmatprep.subr.bf16.mxu0 %v5637_v63  ;;  %4148 = vmatprep.subr.bf16.mxu1 %v5645_v11 }
 0x49e   :  { %4118 = vmatpush1.bf16.msra.mxu0 %v5641_v5  ;;  %4150 = vmatpush1.bf16.msra.mxu1 %v5647_v13 }
 0x49f   :  { %4120 = vmatprep.subr.bf16.mxu0 %v5651_v18  ;;  %4152 = vmatprep.subr.bf16.mxu1 %v5659_v30 }
 0x4a2   :  { %4122 = vmatpush1.bf16.msra.mxu0 %v5655_v24  ;;  %4154 = vmatpush1.bf16.msra.mxu1 %v5663_v31 }
 0x4a3   :  { %4156 = vmatprep.subr.bf16.mxu0 %v5549_v41  ;;  %4188 = vmatprep.subr.bf16.mxu1 %v5553_v46 }
 0x558   :  { %v1140_v17 = vpop.f32.mrb[8].mxu0  ;;  %v1211_v50 = vpop.f32.mrb[8].mxu1 }
 0x559   :  { %v4849_v55 = vadd.f32 %v1140_v17, %v5684_v40  ;;  %v1142_v1 = vpop.f32.mrb[9].mxu0  ;;  %v1213_v60 = vpop.f32.mrb[9].mxu1  ;;  %v4863_v19 = vadd.f32 %v1211_v50, %v5701_v6 }
 0x55a   :  { %v4850_v4 = vadd.f32 %v1142_v1, %v5688_v42  ;;  %v4864_v15 = vadd.f32 %v1213_v60, %v5695_v57 }
 0x55b   :  { %v3668_v37 = vmul.f32 -1.442695, %v4849_v55 }
 0x55c   :  { %v3669_v14 = vmul.f32 -1.442695, %v4850_v4  ;;  %v3670_v10 = vmul.f32 -1.442695, %v4864_v15 }
 0x55d   :  { %5033 = vpow2.f32 %v3668_v37 }
 0x55e   :  { %5035 = vpow2.f32 %v3669_v14 }
 0x55f   :  { %5037 = vpow2.f32 %v3670_v10 }
 0x560   :  { %5039 = vtanh.f32 %v4863_v19 }
 0x567   :  { %v5034_v2 = vpop.eup %5033 }
 0x568   :  { %v5036_v26 = vpop.eup %5035  ;;  %v1223_v27 = vadd.f32 1.0, %v5034_v2 }
 0x569   :  { %v1229_v32 = vadd.f32 1.0, %v5036_v26  ;;  %v5038_v23 = vpop.eup %5037 }
 0x56a   :  { %5041 = vrcp.f32 %v1223_v27  ;;  %v5040_v47 = vpop.eup %5039  ;;  %v1236_v4 = vadd.f32 1.0, %v5038_v23 }
 0x56b   :  { %5043 = vrcp.f32 %v1229_v32 }
 0x56c   :  { %5045 = vrcp.f32 %v1236_v4 }
 0x574   :  { %v5042_v17 = vpop.eup %5041 }
 0x575   :  { %v5044_v55 = vpop.eup %5043  ;;  %v1240_v1 = vmul.f32 %v5042_v17, %v5040_v47 }
 0x576   :  { %v1239_v37 = vmul.f32 %v5044_v55, %v5842_v28  ;;  %v5046_v50 = vpop.eup %5045 }
 0x578   :  { %v5888_v60 = vadd.f32 %v1240_v1, %v1239_v37 }
 0x57a   :  { %5047 = vtanh.f32 %v5888_v60 }
 0x584   :  { %v5048_v14 = vpop.eup %5047 }
 0x585   :  { %v5891_v15 = vmul.f32 %v5048_v14, %v5046_v50 }
 0x587   :  { %1314 = vmatmul.mubr.f32.vlgmr.msra.gmra.mrb[10].mxu0 %v5891_v15  ;;  %1385 = vmatmul.mubr.f32.vlgmr.msra.gmra.mrb[10].mxu1 %v5891_v15 }
 0x588   :  { %4158 = vmatpush1.bf16.msra.mxu0 %v5551_v45  ;;  %4190 = vmatpush1.bf16.msra.mxu1 %v5556_v49 }
 0x589   :  { %4160 = vmatprep.subr.bf16.mxu0 %v5561_v53  ;;  %4192 = vmatprep.subr.bf16.mxu1 %v5565_v59 }
 0x58a   :  { %1488 = vmatprep.mubr.f32.mxu0 %v5399_v0  ;;  %1559 = vmatprep.mubr.f32.mxu1 %v5399_v0 }
 0x58c   :  { %4162 = vmatpush1.bf16.msra.mxu0 %v5563_v58  ;;  %4194 = vmatpush1.bf16.msra.mxu1 %v5569_v62 }
 0x58d   :  { %4164 = vmatprep.subr.bf16.mxu0 %v5575_v3  ;;  %4196 = vmatprep.subr.bf16.mxu1 %v5581_v9 }
 0x590   :  { %4166 = vmatpush1.bf16.msra.mxu0 %v5579_v8  ;;  %4198 = vmatpush1.bf16.msra.mxu1 %v5585_v12 }
 0x591   :  { %4168 = vmatprep.subr.bf16.mxu0 %v5591_v16  ;;  %4200 = vmatprep.subr.bf16.mxu1 %v5597_v22 }
 0x594   :  { %4170 = vmatpush1.bf16.msra.mxu0 %v5595_v21  ;;  %4202 = vmatpush1.bf16.msra.mxu1 %v5601_v25 }
 0x595   :  { %4172 = vmatprep.subr.bf16.mxu0 %v5607_v29  ;;  %4204 = vmatprep.subr.bf16.mxu1 %v5613_v35 }
 0x598   :  { %4174 = vmatpush1.bf16.msra.mxu0 %v5611_v34  ;;  %4206 = vmatpush1.bf16.msra.mxu1 %v5617_v38 }
 0x599   :  { %4176 = vmatprep.subr.bf16.mxu0 %v5623_v43  ;;  %4208 = vmatprep.subr.bf16.mxu1 %v5629_v52 }
 0x59c   :  { %4178 = vmatpush1.bf16.msra.mxu0 %v5627_v51  ;;  %4210 = vmatpush1.bf16.msra.mxu1 %v5633_v56 }
 0x59d   :  { %4180 = vmatprep.subr.bf16.mxu0 %v5637_v63  ;;  %4212 = vmatprep.subr.bf16.mxu1 %v5645_v11 }
 0x5a0   :  { %4182 = vmatpush1.bf16.msra.mxu0 %v5641_v5  ;;  %4214 = vmatpush1.bf16.msra.mxu1 %v5647_v13 }
 0x5a1   :  { %4184 = vmatprep.subr.bf16.mxu0 %v5651_v18  ;;  %4216 = vmatprep.subr.bf16.mxu1 %v5659_v30 }
 0x5a4   :  { %4186 = vmatpush1.bf16.msra.mxu0 %v5655_v24  ;;  %4218 = vmatpush1.bf16.msra.mxu1 %v5663_v31 }
 0x5a5   :  { %4220 = vmatprep.subr.bf16.mxu0 %v5549_v41  ;;  %4252 = vmatprep.subr.bf16.mxu1 %v5553_v46 }
 0x65a   :  { %v1315_v28 = vpop.f32.mrb[10].mxu0  ;;  %v1386_v10 = vpop.f32.mrb[10].mxu1 }
 0x65b   :  { %v4851_v19 = vadd.f32 %v1315_v28, %v5684_v40  ;;  %v1317_v2 = vpop.f32.mrb[11].mxu0  ;;  %v1388_v26 = vpop.f32.mrb[11].mxu1  ;;  %v4865_v55 = vadd.f32 %v1386_v10, %v5701_v6 }
 0x65c   :  { %v4852_v27 = vadd.f32 %v1317_v2, %v5688_v42  ;;  %v4866_v47 = vadd.f32 %v1388_v26, %v5695_v57 }
 0x65d   :  { %v3671_v32 = vmul.f32 -1.442695, %v4851_v19 }
 0x65e   :  { %v3672_v23 = vmul.f32 -1.442695, %v4852_v27  ;;  %v3673_v17 = vmul.f32 -1.442695, %v4866_v47  ;;  %v1780_v47 = vld [vmem:[#allocation9 + $0x10] sm:$0xff] }
 0x65f   :  { %5049 = vpow2.f32 %v3671_v32 }
 0x660   :  { %5051 = vpow2.f32 %v3672_v23 }
 0x661   :  { %5053 = vpow2.f32 %v3673_v17  ;;  %v1784_v17 = vld [vmem:[#allocation9 + $0x30] sm:$0xff] }
 0x662   :  { %5055 = vtanh.f32 %v4865_v55  ;;  %v1787_v55 = vld [vmem:[#allocation9 + $0x48] sm:$0xff] }
 0x669   :  { %v5050_v41 = vpop.eup %5049 }
 0x66a   :  { %v5052_v1 = vpop.eup %5051  ;;  %v1398_v46 = vadd.f32 1.0, %v5050_v41  ;;  %v1791_v41 = vld [vmem:[#allocation9 + $0x68] sm:$0xff] }
 0x66b   :  { %v1404_v4 = vadd.f32 1.0, %v5052_v1  ;;  %v5054_v37 = vpop.eup %5053  ;;  %v1789_v1 = vld [vmem:[#allocation9 + $0x58] sm:$0xff] }
 0x66c   :  { %5057 = vrcp.f32 %v1398_v46  ;;  %v5056_v50 = vpop.eup %5055  ;;  %v1411_v2 = vadd.f32 1.0, %v5054_v37  ;;  %v1793_v46 = vld [vmem:[#allocation9 + $0x78] sm:$0xff] }
 0x66d   :  { %5059 = vrcp.f32 %v1404_v4 }
 0x66e   :  { %5061 = vrcp.f32 %v1411_v2 }
 0x676   :  { %v5058_v14 = vpop.eup %5057 }
 0x677   :  { %v5060_v28 = vpop.eup %5059  ;;  %v1415_v19 = vmul.f32 %v5058_v14, %v5056_v50  ;;  %v4317_v14 = vpack.c.bf16 %v1784_v17, %v1780_v47  ;;  %v1810_v47 = vld [vmem:[#allocation9 + $0x100] sm:$0xff] }
 0x678   :  { %v1414_v27 = vmul.f32 %v5060_v28, %v5888_v60  ;;  %v5062_v10 = vpop.eup %5061  ;;  %v1782_v60 = vld [vmem:[#allocation9 + $0x20] sm:$0xff] }
 0x679   :  { %v1786_v28 = vld [vmem:[#allocation9 + $0x40] sm:$0xff] }
 0x67a   :  { %v5934_v26 = vadd.f32 %v1415_v19, %v1414_v27  ;;  %v1790_v19 = vld [vmem:[#allocation9 + $0x60] sm:$0xff]  ;;  %v4287_v27 = vpack.c.bf16 %v1791_v41, %v1787_v55 }
 0x67b   :  { %v1814_v17 = vld [vmem:[#allocation9 + $0x120] sm:$0xff] }
 0x67c   :  { %5063 = vtanh.f32 %v5934_v26 }
 0x686   :  { %v5064_v32 = vpop.eup %5063 }
 0x687   :  { %v5937_v23 = vmul.f32 %v5064_v32, %v5062_v10  ;;  %v1788_v10 = vld [vmem:[#allocation9 + $0x50] sm:$0xff] }
 0x688   :  { %v1792_v32 = vld [vmem:[#allocation9 + $0x70] sm:$0xff] }
 0x689   :  { %1489 = vmatmul.mubr.f32.vlgmr.msra.gmra.mrb[12].mxu0 %v5937_v23  ;;  %1560 = vmatmul.mubr.f32.vlgmr.msra.gmra.mrb[12].mxu1 %v5937_v23 }
 0x68a   :  { %4222 = vmatpush1.bf16.msra.mxu0 %v5551_v45  ;;  %4254 = vmatpush1.bf16.msra.mxu1 %v5556_v49  ;;  %v1779_v45 = vld [vmem:[#allocation9 + $0x8] sm:$0xff] }
 0x68b   :  { %4224 = vmatprep.subr.bf16.mxu0 %v5561_v53  ;;  %4256 = vmatprep.subr.bf16.mxu1 %v5565_v59  ;;  %v1783_v49 = vld [vmem:[#allocation9 + $0x28] sm:$0xff]  ;;  %v1781_v53 = vld [vmem:[#allocation9 + $0x18] sm:$0xff] }
 0x68c   :  { %1663 = vmatprep.mubr.f32.mxu0 %v5399_v0  ;;  %1734 = vmatprep.mubr.f32.mxu1 %v5399_v0  ;;  %v1785_v59 = vld [vmem:[#allocation9 + $0x38] sm:$0xff] }
 0x68e   :  { %4226 = vmatpush1.bf16.msra.mxu0 %v5563_v58  ;;  %4258 = vmatpush1.bf16.msra.mxu1 %v5569_v62  ;;  %v4283_v58 = vpack.c.bf16 %v1783_v49, %v1779_v45  ;;  %v4315_v62 = vpack.c.bf16 %v1785_v59, %v1781_v53  ;;  %v1795_v45 = vld [vmem:[#allocation9 + $0x88] sm:$0xff]  ;;  %v1797_v53 = vld [vmem:[#allocation9 + $0x98] sm:$0xff]  ;;  %v4289_v59 = vpack.c.bf16 %v1790_v19, %v1786_v28 }
 0x68f   :  { %4228 = vmatprep.subr.bf16.mxu0 %v5575_v3  ;;  %4260 = vmatprep.subr.bf16.mxu1 %v5581_v9  ;;  %v1799_v49 = vld [vmem:[#allocation9 + $0xa8] sm:$0xff]  ;;  %v4301_v28 = vpack.c.bf16 %v1814_v17, %v1810_v47  ;;  %v1847_v17 = vld [vmem:[#allocation10 + $0x210] sm:$0xff] }
 0x692   :  { %4230 = vmatpush1.bf16.msra.mxu0 %v5579_v8  ;;  %4262 = vmatpush1.bf16.msra.mxu1 %v5585_v12 }
 0x693   :  { %4232 = vmatprep.subr.bf16.mxu0 %v5591_v16  ;;  %4264 = vmatprep.subr.bf16.mxu1 %v5597_v22 }
 0x696   :  { %4234 = vmatpush1.bf16.msra.mxu0 %v5595_v21  ;;  %4266 = vmatpush1.bf16.msra.mxu1 %v5601_v25 }
 0x697   :  { %4236 = vmatprep.subr.bf16.mxu0 %v5607_v29  ;;  %4268 = vmatprep.subr.bf16.mxu1 %v5613_v35 }
 0x69a   :  { %4238 = vmatpush1.bf16.msra.mxu0 %v5611_v34  ;;  %4270 = vmatpush1.bf16.msra.mxu1 %v5617_v38 }
 0x69b   :  { %4240 = vmatprep.subr.bf16.mxu0 %v5623_v43  ;;  %4272 = vmatprep.subr.bf16.mxu1 %v5629_v52 }
 0x69e   :  { %4242 = vmatpush1.bf16.msra.mxu0 %v5627_v51  ;;  %4274 = vmatpush1.bf16.msra.mxu1 %v5633_v56 }
 0x69f   :  { %4244 = vmatprep.subr.bf16.mxu0 %v5637_v63  ;;  %4276 = vmatprep.subr.bf16.mxu1 %v5645_v11 }
 0x6a2   :  { %4246 = vmatpush1.bf16.msra.mxu0 %v5641_v5  ;;  %4278 = vmatpush1.bf16.msra.mxu1 %v5647_v13 }
 0x6a3   :  { %4248 = vmatprep.subr.bf16.mxu0 %v5651_v18  ;;  %4280 = vmatprep.subr.bf16.mxu1 %v5659_v30 }
 0x6a6   :  { %4250 = vmatpush1.bf16.msra.mxu0 %v5655_v24  ;;  %4282 = vmatpush1.bf16.msra.mxu1 %v5663_v31  ;;  %v1778_v31 = vld [vmem:[#allocation9] sm:$0xff] }
 0x6a7   :  { %4284 = vmatprep.subr.bf16.mxu0 %v4283_v58  ;;  %4316 = vmatprep.subr.bf16.mxu1 %v4315_v62  ;;  %v4285_v50 = vpack.c.bf16 %v1782_v60, %v1778_v31  ;;  %v1801_v58 = vld [vmem:[#allocation9 + $0xb8] sm:$0xff]  ;;  %v4321_v62 = vpack.c.bf16 %v1792_v32, %v1788_v10 }
 0x75c   :  { %v1490_v3 = vpop.f32.mrb[12].mxu0  ;;  %v1561_v8 = vpop.f32.mrb[12].mxu1 }
 0x75d   :  { %v4853_v9 = vadd.f32 %v1490_v3, %v5684_v40  ;;  %v1492_v12 = vpop.f32.mrb[13].mxu0  ;;  %v1563_v16 = vpop.f32.mrb[13].mxu1  ;;  %v4867_v35 = vadd.f32 %v1561_v8, %v5701_v6  ;;  %v1794_v3 = vld [vmem:[#allocation9 + $0x80] sm:$0xff] }
 0x75e   :  { %v4854_v21 = vadd.f32 %v1492_v12, %v5688_v42  ;;  %v4868_v29 = vadd.f32 %v1563_v16, %v5695_v57  ;;  %v1798_v8 = vld [vmem:[#allocation9 + $0xa0] sm:$0xff]  ;;  %v4323_v12 = vpack.c.bf16 %v1801_v58, %v1797_v53  ;;  %v1796_v16 = vld [vmem:[#allocation9 + $0x90] sm:$0xff]  ;;  %v1827_v53 = vld [vmem:[#allocation9 + $0x188] sm:$0xff] }
 0x75f   :  { %v3674_v22 = vmul.f32 -1.442695, %v4853_v9  ;;  %v4291_v9 = vpack.c.bf16 %v1799_v49, %v1795_v45  ;;  %v1820_v45 = vld [vmem:[#allocation9 + $0x150] sm:$0xff]  ;;  %v1831_v58 = vld [vmem:[#allocation9 + $0x1a8] sm:$0xff] }
 0x760   :  { %v3675_v25 = vmul.f32 -1.442695, %v4854_v21  ;;  %v3676_v34 = vmul.f32 -1.442695, %v4868_v29  ;;  %v1800_v21 = vld [vmem:[#allocation9 + $0xb0] sm:$0xff]  ;;  %v1805_v29 = vld [vmem:[#allocation9 + $0xd8] sm:$0xff] }
 0x761   :  { %5065 = vpow2.f32 %v3674_v22  ;;  %v1803_v22 = vld [vmem:[#allocation9 + $0xc8] sm:$0xff]  ;;  %v1824_v49 = vld [vmem:[#allocation9 + $0x170] sm:$0xff] }
 0x762   :  { %5067 = vpow2.f32 %v3675_v25  ;;  %v1807_v25 = vld [vmem:[#allocation9 + $0xe8] sm:$0xff] }
 0x763   :  { %5069 = vpow2.f32 %v3676_v34  ;;  %v1809_v34 = vld [vmem:[#allocation9 + $0xf8] sm:$0xff] }
 0x764   :  { %5071 = vtanh.f32 %v4867_v35  ;;  %v4293_v35 = vpack.c.bf16 %v1798_v8, %v1794_v3  ;;  %v4337_v8 = vpack.c.bf16 %v1824_v49, %v1820_v45  ;;  %v1866_v45 = vld [vmem:[#allocation10 + $0x2a8] sm:$0xff]  ;;  %v1864_v49 = vld [vmem:[#allocation10 + $0x298] sm:$0xff] }
 0x76b   :  { %v5066_v38 = vpop.eup %5065 }
 0x76c   :  { %v5068_v43 = vpop.eup %5067  ;;  %v1573_v51 = vadd.f32 1.0, %v5066_v38  ;;  %v4325_v38 = vpack.c.bf16 %v1800_v21, %v1796_v16  ;;  %v4307_v16 = vpack.c.bf16 %v1831_v58, %v1827_v53  ;;  %v1861_v58 = vld [vmem:[#allocation10 + $0x280] sm:$0xff] }
 0x76d   :  { %v1579_v52 = vadd.f32 1.0, %v5068_v43  ;;  %v5070_v56 = vpop.eup %5069  ;;  %v1802_v43 = vld [vmem:[#allocation9 + $0xc0] sm:$0xff] }
 0x76e   :  { %5073 = vrcp.f32 %v1573_v51  ;;  %v5072_v63 = vpop.eup %5071  ;;  %v1586_v18 = vadd.f32 1.0, %v5070_v56  ;;  %v1806_v51 = vld [vmem:[#allocation9 + $0xe0] sm:$0xff]  ;;  %v4327_v56 = vpack.c.bf16 %v1809_v34, %v1805_v29  ;;  %v1835_v29 = vld [vmem:[#allocation9 + $0x1c8] sm:$0xff] }
 0x76f   :  { %5075 = vrcp.f32 %v1579_v52  ;;  %v4295_v52 = vpack.c.bf16 %v1807_v25, %v1803_v22  ;;  %v4297_v31 = vpack.c.bf16 %v1806_v51, %v1802_v43  ;;  %v1828_v22 = vld [vmem:[#allocation9 + $0x190] sm:$0xff]  ;;  %v1839_v34 = vld [vmem:[#allocation9 + $0x1e8] sm:$0xff] }
 0x770   :  { %5077 = vrcp.f32 %v1586_v18  ;;  %v1813_v18 = vld [vmem:[#allocation9 + $0x118] sm:$0xff]  ;;  %v1832_v25 = vld [vmem:[#allocation9 + $0x1b0] sm:$0xff] }
 0x771   :  { %v4341_v51 = vpack.c.bf16 %v1832_v25, %v1828_v22  ;;  %v1874_v22 = vld [vmem:[#allocation10 + $0x2e8] sm:$0xff]  ;;  %v1872_v25 = vld [vmem:[#allocation10 + $0x2d8] sm:$0xff] }
 0x778   :  { %v5074_v5 = vpop.eup %5073 }
 0x779   :  { %v5076_v11 = vpop.eup %5075  ;;  %v1590_v13 = vmul.f32 %v5074_v5, %v5072_v63  ;;  %v1804_v63 = vld [vmem:[#allocation9 + $0xd0] sm:$0xff] }
 0x77a   :  { %v1589_v24 = vmul.f32 %v5076_v11, %v5934_v26  ;;  %v5078_v4 = vpop.eup %5077  ;;  %v4319_v26 = vpack.c.bf16 %v1793_v46, %v1789_v1  ;;  %v1808_v5 = vld [vmem:[#allocation9 + $0xf0] sm:$0xff]  ;;  %v1811_v11 = vld [vmem:[#allocation9 + $0x108] sm:$0xff] }
 0x77b   :  { %v4329_v60 = vpack.c.bf16 %v1808_v5, %v1804_v63  ;;  %v1812_v1 = vld [vmem:[#allocation9 + $0x110] sm:$0xff]  ;;  %v1838_v5 = vld [vmem:[#allocation9 + $0x1e0] sm:$0xff] }
 0x77c   :  { %v5978_v30 = vadd.f32 %v1590_v13, %v1589_v24  ;;  %v1815_v13 = vld [vmem:[#allocation9 + $0x128] sm:$0xff]  ;;  %v1817_v24 = vld [vmem:[#allocation9 + $0x138] sm:$0xff]  ;;  %v1816_v46 = vld [vmem:[#allocation9 + $0x130] sm:$0xff] }
 0x77d   :  { %v4299_v55 = vpack.c.bf16 %v1815_v13, %v1811_v11  ;;  %v4331_v41 = vpack.c.bf16 %v1817_v24, %v1813_v18  ;;  %v4333_v19 = vpack.c.bf16 %v1816_v46, %v1812_v1  ;;  %v1836_v11 = vld [vmem:[#allocation9 + $0x1d0] sm:$0xff]  ;;  %v1858_v1 = vld [vmem:[#allocation10 + $0x268] sm:$0xff]  ;;  %v1856_v46 = vld [vmem:[#allocation10 + $0x258] sm:$0xff] }
 0x77e   :  { %5079 = vtanh.f32 %v5978_v30  ;;  %v1840_v13 = vld [vmem:[#allocation9 + $0x1f0] sm:$0xff] }
 0x77f   :  { %v4345_v24 = vpack.c.bf16 %v1840_v13, %v1836_v11  ;;  %v1882_v11 = vld [vmem:[#allocation10 + $0x328] sm:$0xff]  ;;  %v1880_v13 = vld [vmem:[#allocation10 + $0x318] sm:$0xff] }
 0x788   :  { %v5080_v37 = vpop.eup %5079 }
 0x789   :  { %v5981_v2 = vmul.f32 %v5080_v37, %v5078_v4  ;;  %v1819_v4 = vld [vmem:[#allocation9 + $0x148] sm:$0xff] }
 0x78a   :  { %v1823_v37 = vld [vmem:[#allocation9 + $0x168] sm:$0xff] }
 0x78b   :  { %1664 = vmatmul.mubr.f32.vlgmr.msra.gmra.mrb[14].mxu0 %v5981_v2  ;;  %1735 = vmatmul.mubr.f32.vlgmr.msra.gmra.mrb[14].mxu1 %v5981_v2  ;;  %v4303_v10 = vpack.c.bf16 %v1823_v37, %v1819_v4  ;;  %v1853_v37 = vld [vmem:[#allocation10 + $0x240] sm:$0xff] }
 0x78c   :  { %4286 = vmatpush1.bf16.msra.mxu0 %v4285_v50  ;;  %4318 = vmatpush1.bf16.msra.mxu1 %v4317_v14  ;;  %v1821_v50 = vld [vmem:[#allocation9 + $0x158] sm:$0xff] }
 0x78d   :  { %4288 = vmatprep.subr.bf16.mxu0 %v4287_v27  ;;  %4320 = vmatprep.subr.bf16.mxu1 %v4319_v26  ;;  %v1825_v14 = vld [vmem:[#allocation9 + $0x178] sm:$0xff]  ;;  %v1818_v27 = vld [vmem:[#allocation9 + $0x140] sm:$0xff] }
 0x78e   :  { %1994 = vmatprep.mubr.f32.mxu0 %v5399_v0  ;;  %2107 = vmatprep.mubr.f32.mxu1 %v5399_v0  ;;  %v1822_v26 = vld [vmem:[#allocation9 + $0x160] sm:$0xff]  ;;  %v4335_v32 = vpack.c.bf16 %v1825_v14, %v1821_v50  ;;  %v1860_v14 = vld [vmem:[#allocation10 + $0x278] sm:$0xff] }
 0x78f   :  { %v4305_v3 = vpack.c.bf16 %v1822_v26, %v1818_v27  ;;  %v1857_v50 = vld [vmem:[#allocation10 + $0x260] sm:$0xff]  ;;  %v1855_v27 = vld [vmem:[#allocation10 + $0x250] sm:$0xff] }
 0x790   :  { %4290 = vmatpush1.bf16.msra.mxu0 %v4289_v59  ;;  %4322 = vmatpush1.bf16.msra.mxu1 %v4321_v62  ;;  %v1829_v59 = vld [vmem:[#allocation9 + $0x198] sm:$0xff]  ;;  %v1859_v26 = vld [vmem:[#allocation10 + $0x270] sm:$0xff] }
 0x791   :  { %4292 = vmatprep.subr.bf16.mxu0 %v4291_v9  ;;  %4324 = vmatprep.subr.bf16.mxu1 %v4323_v12  ;;  %v1833_v62 = vld [vmem:[#allocation9 + $0x1b8] sm:$0xff]  ;;  %v1826_v9 = vld [vmem:[#allocation9 + $0x180] sm:$0xff] }
 0x792   :  { %v1830_v12 = vld [vmem:[#allocation9 + $0x1a0] sm:$0xff]  ;;  %v4339_v21 = vpack.c.bf16 %v1833_v62, %v1829_v59  ;;  %v1868_v62 = vld [vmem:[#allocation10 + $0x2b8] sm:$0xff] }
 0x793   :  { %v4309_v43 = vpack.c.bf16 %v1830_v12, %v1826_v9  ;;  %v1865_v59 = vld [vmem:[#allocation10 + $0x2a0] sm:$0xff]  ;;  %v1863_v9 = vld [vmem:[#allocation10 + $0x290] sm:$0xff] }
 0x794   :  { %4294 = vmatpush1.bf16.msra.mxu0 %v4293_v35  ;;  %4326 = vmatpush1.bf16.msra.mxu1 %v4325_v38  ;;  %v1837_v35 = vld [vmem:[#allocation9 + $0x1d8] sm:$0xff]  ;;  %v1867_v12 = vld [vmem:[#allocation10 + $0x2b0] sm:$0xff] }
 0x795   :  { %4296 = vmatprep.subr.bf16.mxu0 %v4295_v52  ;;  %4328 = vmatprep.subr.bf16.mxu1 %v4327_v56  ;;  %v1841_v38 = vld [vmem:[#allocation9 + $0x1f8] sm:$0xff]  ;;  %v1834_v52 = vld [vmem:[#allocation9 + $0x1c0] sm:$0xff]  ;;  %v4311_v56 = vpack.c.bf16 %v1839_v34, %v1835_v29 }
 0x796   :  { %v4343_v63 = vpack.c.bf16 %v1841_v38, %v1837_v35  ;;  %v4313_v18 = vpack.c.bf16 %v1838_v5, %v1834_v52  ;;  %v1869_v34 = vld [vmem:[#allocation10 + $0x2c0] sm:$0xff]  ;;  %v1876_v38 = vld [vmem:[#allocation10 + $0x2f8] sm:$0xff]  ;;  %v1871_v52 = vld [vmem:[#allocation10 + $0x2d0] sm:$0xff] }
 0x797   :  { %v1873_v35 = vld [vmem:[#allocation10 + $0x2e0] sm:$0xff]  ;;  %v1878_v5 = vld [vmem:[#allocation10 + $0x308] sm:$0xff] }
 0x798   :  { %4298 = vmatpush1.bf16.msra.mxu0 %v4297_v31  ;;  %4330 = vmatpush1.bf16.msra.mxu1 %v4329_v60  ;;  %v1849_v31 = vld [vmem:[#allocation10 + $0x220] sm:$0xff] }
 0x799   :  { %4300 = vmatprep.subr.bf16.mxu0 %v4299_v55  ;;  %4332 = vmatprep.subr.bf16.mxu1 %v4331_v41  ;;  %v1851_v55 = vld [vmem:[#allocation10 + $0x230] sm:$0xff]  ;;  %v1854_v41 = vld [vmem:[#allocation10 + $0x248] sm:$0xff] }
 0x79a   :  { %v6027_v4 = vpack.c.bf16 %v1858_v1, %v1854_v41  ;;  %v1890_v41 = vld [vmem:[#allocation10 + $0x368] sm:$0xff]  ;;  %v1888_v1 = vld [vmem:[#allocation10 + $0x358] sm:$0xff] }
 0x79c   :  { %4302 = vmatpush1.bf16.msra.mxu0 %v4301_v28  ;;  %4334 = vmatpush1.bf16.msra.mxu1 %v4333_v19  ;;  %v6029_v28 = vpack.c.bf16 %v1857_v50, %v1853_v37  ;;  %v6031_v19 = vpack.c.bf16 %v1860_v14, %v1856_v46  ;;  %v1885_v37 = vld [vmem:[#allocation10 + $0x340] sm:$0xff]  ;;  %v1892_v14 = vld [vmem:[#allocation10 + $0x378] sm:$0xff] }
 0x79d   :  { %4304 = vmatprep.subr.bf16.mxu0 %v4303_v10  ;;  %4336 = vmatprep.subr.bf16.mxu1 %v4335_v32  ;;  %v6034_v10 = vpack.c.bf16 %v1859_v26, %v1855_v27  ;;  %v1862_v32 = vld [vmem:[#allocation10 + $0x288] sm:$0xff]  ;;  %v1889_v50 = vld [vmem:[#allocation10 + $0x360] sm:$0xff]  ;;  %v6079_v26 = vpack.c.bf16 %v1892_v14, %v1888_v1 }
 0x79e   :  { %v6039_v53 = vpack.c.bf16 %v1866_v45, %v1862_v32  ;;  %v6077_v27 = vpack.c.bf16 %v1889_v50, %v1885_v37  ;;  %v1887_v32 = vld [vmem:[#allocation10 + $0x350] sm:$0xff] }
 0x79f   :  { %v1891_v45 = vld [vmem:[#allocation10 + $0x370] sm:$0xff] }
 0x7a0   :  { %4306 = vmatpush1.bf16.msra.mxu0 %v4305_v3  ;;  %4338 = vmatpush1.bf16.msra.mxu1 %v4337_v8  ;;  %v6041_v3 = vpack.c.bf16 %v1865_v59, %v1861_v58  ;;  %v6043_v8 = vpack.c.bf16 %v1868_v62, %v1864_v49  ;;  %v1894_v49 = vld [vmem:[#allocation10 + $0x388] sm:$0xff]  ;;  %v6082_v58 = vpack.c.bf16 %v1891_v45, %v1887_v32  ;;  %v1893_v62 = vld [vmem:[#allocation10 + $0x380] sm:$0xff] }
 0x7a1   :  { %4308 = vmatprep.subr.bf16.mxu0 %v4307_v16  ;;  %4340 = vmatprep.subr.bf16.mxu1 %v4339_v21  ;;  %v6046_v16 = vpack.c.bf16 %v1867_v12, %v1863_v9  ;;  %v1870_v21 = vld [vmem:[#allocation10 + $0x2c8] sm:$0xff]  ;;  %v1897_v9 = vld [vmem:[#allocation10 + $0x3a0] sm:$0xff] }
 0x7a2   :  { %v6051_v29 = vpack.c.bf16 %v1874_v22, %v1870_v21  ;;  %v1898_v59 = vld [vmem:[#allocation10 + $0x3a8] sm:$0xff]  ;;  %v6088_v21 = vpack.c.bf16 %v1897_v9, %v1893_v62  ;;  %v1896_v22 = vld [vmem:[#allocation10 + $0x398] sm:$0xff] }
 0x7a3   :  { %v6086_v12 = vpack.c.bf16 %v1898_v59, %v1894_v49 }
 0x7a4   :  { %4310 = vmatpush1.bf16.msra.mxu0 %v4309_v43  ;;  %4342 = vmatpush1.bf16.msra.mxu1 %v4341_v51  ;;  %v6053_v43 = vpack.c.bf16 %v1873_v35, %v1869_v34  ;;  %v6055_v51 = vpack.c.bf16 %v1876_v38, %v1872_v25  ;;  %v1900_v25 = vld [vmem:[#allocation10 + $0x3b8] sm:$0xff]  ;;  %v1895_v34 = vld [vmem:[#allocation10 + $0x390] sm:$0xff] }
 0x7a5   :  { %4312 = vmatprep.subr.bf16.mxu0 %v4311_v56  ;;  %4344 = vmatprep.subr.bf16.mxu1 %v4343_v63  ;;  %v1875_v56 = vld [vmem:[#allocation10 + $0x2f0] sm:$0xff]  ;;  %v6091_v35 = vpack.c.bf16 %v1900_v25, %v1896_v22 }
 0x7a6   :  { %v6058_v63 = vpack.c.bf16 %v1875_v56, %v1871_v52  ;;  %v1899_v38 = vld [vmem:[#allocation10 + $0x3b0] sm:$0xff]  ;;  %v1902_v52 = vld [vmem:[#allocation10 + $0x3c8] sm:$0xff] }
 0x7a7   :  { %v1906_v56 = vld [vmem:[#allocation10 + $0x3e8] sm:$0xff] }
 0x7a8   :  { %4314 = vmatpush1.bf16.msra.mxu0 %v4313_v18  ;;  %4346 = vmatpush1.bf16.msra.mxu1 %v4345_v24  ;;  %v6063_v18 = vpack.c.bf16 %v1882_v11, %v1878_v5  ;;  %v1877_v24 = vld [vmem:[#allocation10 + $0x300] sm:$0xff]  ;;  %v6094_v5 = vpack.c.bf16 %v1899_v38, %v1895_v34  ;;  %v6096_v11 = vpack.c.bf16 %v1906_v56, %v1902_v52 }
 0x7ab   :  { %1995 = vmatmul.mubr.f32.vlgmr.msra.gmra.mrb[16].mxu0 %v5707_v54  ;;  %2108 = vmatmul.mubr.f32.vlgmr.msra.gmra.mrb[16].mxu1 %v5707_v54  ;;  %v1846_v54 = vld [vmem:[#allocation10 + $0x208] sm:$0xff] }
 0x7ac   :  { %2000 = vmatprep.mubr.f32.mxu0 %v5399_v0  ;;  %2113 = vmatprep.mubr.f32.mxu1 %v5399_v0 }
 0x7af   :  { %2001 = vmatmul.mubr.f32.gmra.mrb[18].mxu0 %v5753_v7  ;;  %2114 = vmatmul.mubr.f32.gmra.mrb[18].mxu1 %v5753_v7  ;;  %v1850_v7 = vld [vmem:[#allocation10 + $0x228] sm:$0xff] }
 0x7b0   :  { %2006 = vmatprep.mubr.f32.mxu0 %v5399_v0  ;;  %2119 = vmatprep.mubr.f32.mxu1 %v5399_v0 }
 0x7b3   :  { %2007 = vmatmul.mubr.f32.gmra.mrb[20].mxu0 %v5799_v20  ;;  %2120 = vmatmul.mubr.f32.gmra.mrb[20].mxu1 %v5799_v20  ;;  %v1848_v20 = vld [vmem:[#allocation10 + $0x218] sm:$0xff] }
 0x7b4   :  { %2012 = vmatprep.mubr.f32.mxu0 %v5399_v0  ;;  %2125 = vmatprep.mubr.f32.mxu1 %v5399_v0 }
 0x7b7   :  { %2013 = vmatmul.mubr.f32.gmra.mrb[22].mxu0 %v5845_v48  ;;  %2126 = vmatmul.mubr.f32.gmra.mrb[22].mxu1 %v5845_v48  ;;  %v6015_v48 = vpack.c.bf16 %v1850_v7, %v1846_v54  ;;  %v1881_v54 = vld [vmem:[#allocation10 + $0x320] sm:$0xff]  ;;  %v1884_v7 = vld [vmem:[#allocation10 + $0x338] sm:$0xff] }
 0x7b8   :  { %2018 = vmatprep.mubr.f32.mxu0 %v5399_v0  ;;  %2131 = vmatprep.mubr.f32.mxu1 %v5399_v0 }
 0x7b9   :  { %4348 = vmatprep.subr.bf16.mxu0 %v6015_v48 }
 0x7bb   :  { %2019 = vmatmul.mubr.f32.gmra.mrb[24].mxu0 %v5891_v15  ;;  %2132 = vmatmul.mubr.f32.gmra.mrb[24].mxu1 %v5891_v15  ;;  %v1845_v15 = vld [vmem:[#allocation10 + $0x200] sm:$0xff] }
 0x7bc   :  { %2024 = vmatprep.mubr.f32.mxu0 %v5399_v0  ;;  %2137 = vmatprep.mubr.f32.mxu1 %v5399_v0  ;;  %v6017_v60 = vpack.c.bf16 %v1849_v31, %v1845_v15  ;;  %v6067_v15 = vpack.c.bf16 %v1884_v7, %v1880_v13  ;;  %v1879_v31 = vld [vmem:[#allocation10 + $0x310] sm:$0xff]  ;;  %v1901_v13 = vld [vmem:[#allocation10 + $0x3c0] sm:$0xff]  ;;  %v1908_v7 = vld [vmem:[#allocation10 + $0x3f8] sm:$0xff] }
 0x7be   :  { %4350 = vmatpush1.bf16.msra.mxu0 %v6017_v60 }
 0x7bf   :  { %2025 = vmatmul.mubr.f32.gmra.mrb[26].mxu0 %v5937_v23  ;;  %2138 = vmatmul.mubr.f32.gmra.mrb[26].mxu1 %v5937_v23  ;;  %v1852_v23 = vld [vmem:[#allocation10 + $0x238] sm:$0xff] }
 0x7c0   :  { %2030 = vmatprep.mubr.f32.mxu0 %v5399_v0  ;;  %2143 = vmatprep.mubr.f32.mxu1 %v5399_v0  ;;  %v6019_v47 = vpack.c.bf16 %v1852_v23, %v1848_v20  ;;  %v6065_v20 = vpack.c.bf16 %v1881_v54, %v1877_v24  ;;  %v1883_v23 = vld [vmem:[#allocation10 + $0x330] sm:$0xff]  ;;  %v1905_v24 = vld [vmem:[#allocation10 + $0x3e0] sm:$0xff]  ;;  %v1904_v54 = vld [vmem:[#allocation10 + $0x3d8] sm:$0xff] }
 0x7c1   :  { %4352 = vmatprep.subr.bf16.mxu0 %v6027_v4 }
 0x7c2   :  { %4380 = vmatprep.subr.bf16.mxu1 %v6019_v47  ;;  %4354 = vmatpush1.bf16.msra.mxu0 %v6029_v28 }
 0x7c3   :  { %2031 = vmatmul.mubr.f32.gmra.mrb[28].mxu0 %v5981_v2  ;;  %2144 = vmatmul.mubr.f32.gmra.mrb[28].mxu1 %v5981_v2  ;;  %v6022_v2 = vpack.c.bf16 %v1851_v55, %v1847_v17  ;;  %v6070_v17 = vpack.c.bf16 %v1883_v23, %v1879_v31  ;;  %v1886_v55 = vld [vmem:[#allocation10 + $0x348] sm:$0xff]  ;;  %v1903_v31 = vld [vmem:[#allocation10 + $0x3d0] sm:$0xff] }
 0x7c4   :  { %2036 = vmatprep.mubr.f32.mxu0 %v5399_v0  ;;  %2149 = vmatprep.mubr.f32.mxu1 %v5399_v0  ;;  %v6075_v46 = vpack.c.bf16 %v1890_v41, %v1886_v55  ;;  %v1907_v23 = vld [vmem:[#allocation10 + $0x3f0] sm:$0xff]  ;;  %v6100_v55 = vpack.c.bf16 %v1905_v24, %v1901_v13  ;;  %v6102_v41 = vpack.c.bf16 %v1908_v7, %v1904_v54 }
 0x7c5   :  { %4382 = vmatpush1.bf16.msra.mxu1 %v6022_v2  ;;  %4356 = vmatprep.subr.bf16.mxu0 %v6039_v53  ;;  %v6106_v1 = vpack.c.bf16 %v1907_v23, %v1903_v31 }
 0x7c6   :  { %4384 = vmatprep.subr.bf16.mxu1 %v6031_v19  ;;  %4358 = vmatpush1.bf16.msra.mxu0 %v6041_v3 }
 0x7c7   :  { %4360 = vmatprep.subr.bf16.mxu0 %v6051_v29 }
 0x7c9   :  { %4386 = vmatpush1.bf16.msra.mxu1 %v6034_v10 }
 0x7ca   :  { %4388 = vmatprep.subr.bf16.mxu1 %v6043_v8  ;;  %4362 = vmatpush1.bf16.msra.mxu0 %v6053_v43 }
 0x7cb   :  { %4364 = vmatprep.subr.bf16.mxu0 %v6063_v18 }
 0x7cd   :  { %4390 = vmatpush1.bf16.msra.mxu1 %v6046_v16 }
 0x7ce   :  { %4392 = vmatprep.subr.bf16.mxu1 %v6055_v51  ;;  %4366 = vmatpush1.bf16.msra.mxu0 %v6065_v20 }
 0x7cf   :  { %4368 = vmatprep.subr.bf16.mxu0 %v6075_v46 }
 0x7d1   :  { %4394 = vmatpush1.bf16.msra.mxu1 %v6058_v63 }
 0x7d2   :  { %4396 = vmatprep.subr.bf16.mxu1 %v6067_v15  ;;  %4370 = vmatpush1.bf16.msra.mxu0 %v6077_v27 }
 0x7d3   :  { %4372 = vmatprep.subr.bf16.mxu0 %v6086_v12 }
 0x7d5   :  { %4398 = vmatpush1.bf16.msra.mxu1 %v6070_v17 }
 0x7d6   :  { %4400 = vmatprep.subr.bf16.mxu1 %v6079_v26  ;;  %4374 = vmatpush1.bf16.msra.mxu0 %v6088_v21 }
 0x7d7   :  { %4376 = vmatprep.subr.bf16.mxu0 %v6096_v11 }
 0x7d9   :  { %4402 = vmatpush1.bf16.msra.mxu1 %v6082_v58 }
 0x7da   :  { %4404 = vmatprep.subr.bf16.mxu1 %v6091_v35  ;;  %4378 = vmatpush1.bf16.msra.mxu0 %v6100_v55 }
 0x7db   :  { %4412 = vmatprep.subr.bf16.mxu0 %v6015_v48 }
 0x7dd   :  { %4406 = vmatpush1.bf16.msra.mxu1 %v6094_v5 }
 0x7de   :  { %4408 = vmatprep.subr.bf16.mxu1 %v6102_v41 }
 0x7e1   :  { %4410 = vmatpush1.bf16.msra.mxu1 %v6106_v1 }
 0x7e2   :  { %4444 = vmatprep.subr.bf16.mxu1 %v6019_v47 }
 0x85e   :  { %v1665_v37 = vpop.f32.mrb[14].mxu0  ;;  %v1736_v50 = vpop.f32.mrb[14].mxu1 }
 0x85f   :  { %v4855_v14 = vadd.f32 %v1665_v37, %v5684_v40  ;;  %v1667_v32 = vpop.f32.mrb[15].mxu0  ;;  %v1738_v45 = vpop.f32.mrb[15].mxu1  ;;  %v4869_v25 = vadd.f32 %v1736_v50, %v5701_v6 }
 0x860   :  { %v4856_v49 = vadd.f32 %v1667_v32, %v5688_v42  ;;  %v4870_v9 = vadd.f32 %v1738_v45, %v5695_v57  ;;  %v3680_v42 = vld [vmem:[%s6441_s4 + $0x4] sm:$0xf] }
 0x861   :  { %v3677_v59 = vmul.f32 -1.442695, %v4855_v14  ;;  %v6122_v6 = vrot.slane %v3680_v42, %v215_v36  ;;  %v6127_v23 = vrot.slane %v3680_v42, %v219_v39 }
 0x862   :  { %v3678_v62 = vmul.f32 -1.442695, %v4856_v49  ;;  %v3679_v22 = vmul.f32 -1.442695, %v4870_v9  ;;  %v6138_v9 = vrot.slane %v3680_v42, %v223_v61 }
 0x863   :  { %5081 = vpow2.f32 %v3677_v59 }
 0x864   :  { %5083 = vpow2.f32 %v3678_v62 }
 0x865   :  { %5085 = vpow2.f32 %v3679_v22 }
 0x866   :  { %5087 = vtanh.f32 %v4869_v25 }
 0x86d   :  { %v5082_v34 = vpop.eup %5081 }
 0x86e   :  { %v5084_v38 = vpop.eup %5083  ;;  %v1748_v52 = vadd.f32 1.0, %v5082_v34 }
 0x86f   :  { %v1754_v56 = vadd.f32 1.0, %v5084_v38  ;;  %v5086_v40 = vpop.eup %5085 }
 0x870   :  { %5089 = vrcp.f32 %v1748_v52  ;;  %v5088_v13 = vpop.eup %5087  ;;  %v1761_v7 = vadd.f32 1.0, %v5086_v40 }
 0x871   :  { %5091 = vrcp.f32 %v1754_v56 }
 0x872   :  { %5093 = vrcp.f32 %v1761_v7 }
 0x87a   :  { %v5090_v24 = vpop.eup %5089 }
 0x87b   :  { %v5092_v54 = vpop.eup %5091  ;;  %v1765_v57 = vmul.f32 %v5090_v24, %v5088_v13 }
 0x87c   :  { %v1764_v31 = vmul.f32 %v5092_v54, %v5978_v30  ;;  %v6133_v30 = vrot.slane %v3680_v42, %v227_v44  ;;  %v5094_v22 = vpop.eup %5093 }
 0x87e   :  { %v1996_v37 = vpop.f32.mrb[16].mxu0  ;;  %v2109_v50 = vpop.f32.mrb[16].mxu1  ;;  %v1766_v14 = vadd.f32 %v1765_v57, %v1764_v31 }
 0x87f   :  { %v1997_v32 = vadd.f32 %v1996_v37, %v6122_v6  ;;  %v1998_v45 = vpop.f32.mrb[17].mxu0  ;;  %v2111_v49 = vpop.f32.mrb[17].mxu1  ;;  %v2110_v38 = vadd.f32 %v2109_v50, %v6138_v9 }
 0x880   :  { %v1999_v59 = vadd.f32 %v1998_v45, %v6127_v23  ;;  %5095 = vtanh.f32 %v1766_v14  ;;  %v2112_v39 = vadd.f32 %v2111_v49, %v6133_v30 }
 0x881   :  { %v3681_v62 = vmul.f32 -1.442695, %v1997_v32 }
 0x882   :  { %v3682_v36 = vmul.f32 -1.442695, %v1999_v59  ;;  %v3683_v34 = vmul.f32 -1.442695, %v2112_v39 }
 0x883   :  { %5097 = vpow2.f32 %v3681_v62 }
 0x884   :  { %5099 = vpow2.f32 %v3682_v36 }
 0x885   :  { %5101 = vpow2.f32 %v3683_v34 }
 0x886   :  { %5103 = vtanh.f32 %v2110_v38 }
 0x88a   :  { %v5096_v25 = vpop.eup %5095 }
 0x88b   :  { %v1768_v52 = vmul.f32 %v5096_v25, %v5094_v22 }
 0x88d   :  { %v5098_v56 = vpop.eup %5097  ;;  %2037 = vmatmul.mubr.f32.gmra.mrb[30].mxu0 %v1768_v52  ;;  %2150 = vmatmul.mubr.f32.gmra.mrb[30].mxu1 %v1768_v52 }
 0x88e   :  { %v5100_v40 = vpop.eup %5099  ;;  %v2195_v44 = vadd.f32 1.0, %v5098_v56  ;;  %2284 = vmatprep.mubr.f32.mxu0 %v5399_v0  ;;  %2355 = vmatprep.mubr.f32.mxu1 %v5399_v0 }
 0x88f   :  { %v2201_v33 = vadd.f32 1.0, %v5100_v40  ;;  %v5102_v61 = vpop.eup %5101 }
 0x890   :  { %5105 = vrcp.f32 %v2195_v44  ;;  %v5104_v42 = vpop.eup %5103  ;;  %v2208_v57 = vadd.f32 1.0, %v5102_v61 }
 0x891   :  { %5107 = vrcp.f32 %v2201_v33 }
 0x892   :  { %5109 = vrcp.f32 %v2208_v57 }
 0x89a   :  { %v5106_v13 = vpop.eup %5105 }
 0x89b   :  { %v5108_v24 = vpop.eup %5107  ;;  %v2212_v54 = vmul.f32 %v5106_v13, %v5104_v42 }
 0x89c   :  { %v2211_v7 = vmul.f32 0.0, %v5108_v24  ;;  %v5110_v37 = vpop.eup %5109 }
 0x89e   :  { %v6143_v31 = vadd.f32 %v2212_v54, %v2211_v7 }
 0x8a0   :  { %5111 = vtanh.f32 %v6143_v31 }
 0x8aa   :  { %v5112_v50 = vpop.eup %5111 }
 0x8ab   :  { %v2215_v14 = vmul.f32 %v5112_v50, %v5110_v37 }
 0x8ad   :  { %2285 = vmatmul.mubr.f32.vlgmr.msra.gmra.mrb[18].mxu0 %v2215_v14  ;;  %2356 = vmatmul.mubr.f32.vlgmr.msra.gmra.mrb[18].mxu1 %v2215_v14 }
 0x8ae   :  { %4414 = vmatpush1.bf16.msra.mxu0 %v6017_v60  ;;  %4446 = vmatpush1.bf16.msra.mxu1 %v6022_v2 }
 0x8af   :  { %4416 = vmatprep.subr.bf16.mxu0 %v6027_v4  ;;  %4448 = vmatprep.subr.bf16.mxu1 %v6031_v19 }
 0x8b0   :  { %2458 = vmatprep.mubr.f32.mxu0 %v5399_v0  ;;  %2529 = vmatprep.mubr.f32.mxu1 %v5399_v0 }
 0x8b2   :  { %4418 = vmatpush1.bf16.msra.mxu0 %v6029_v28  ;;  %4450 = vmatpush1.bf16.msra.mxu1 %v6034_v10 }
 0x8b3   :  { %4420 = vmatprep.subr.bf16.mxu0 %v6039_v53  ;;  %4452 = vmatprep.subr.bf16.mxu1 %v6043_v8 }
 0x8b6   :  { %4422 = vmatpush1.bf16.msra.mxu0 %v6041_v3  ;;  %4454 = vmatpush1.bf16.msra.mxu1 %v6046_v16 }
 0x8b7   :  { %4424 = vmatprep.subr.bf16.mxu0 %v6051_v29  ;;  %4456 = vmatprep.subr.bf16.mxu1 %v6055_v51 }
 0x8ba   :  { %4426 = vmatpush1.bf16.msra.mxu0 %v6053_v43  ;;  %4458 = vmatpush1.bf16.msra.mxu1 %v6058_v63 }
 0x8bb   :  { %4428 = vmatprep.subr.bf16.mxu0 %v6063_v18  ;;  %4460 = vmatprep.subr.bf16.mxu1 %v6067_v15 }
 0x8be   :  { %4430 = vmatpush1.bf16.msra.mxu0 %v6065_v20  ;;  %4462 = vmatpush1.bf16.msra.mxu1 %v6070_v17 }
 0x8bf   :  { %4432 = vmatprep.subr.bf16.mxu0 %v6075_v46  ;;  %4464 = vmatprep.subr.bf16.mxu1 %v6079_v26 }
 0x8c2   :  { %4434 = vmatpush1.bf16.msra.mxu0 %v6077_v27  ;;  %4466 = vmatpush1.bf16.msra.mxu1 %v6082_v58 }
 0x8c3   :  { %4436 = vmatprep.subr.bf16.mxu0 %v6086_v12  ;;  %4468 = vmatprep.subr.bf16.mxu1 %v6091_v35 }
 0x8c6   :  { %4438 = vmatpush1.bf16.msra.mxu0 %v6088_v21  ;;  %4470 = vmatpush1.bf16.msra.mxu1 %v6094_v5 }
 0x8c7   :  { %4440 = vmatprep.subr.bf16.mxu0 %v6096_v11  ;;  %4472 = vmatprep.subr.bf16.mxu1 %v6102_v41 }
 0x8ca   :  { %4442 = vmatpush1.bf16.msra.mxu0 %v6100_v55  ;;  %4474 = vmatpush1.bf16.msra.mxu1 %v6106_v1 }
 0x8cb   :  { %4476 = vmatprep.subr.bf16.mxu0 %v6015_v48  ;;  %4508 = vmatprep.subr.bf16.mxu1 %v6019_v47 }
 0x980   :  { %v2286_v32 = vpop.f32.mrb[18].mxu0  ;;  %v2357_v45 = vpop.f32.mrb[18].mxu1 }
 0x981   :  { %v4871_v49 = vadd.f32 %v2286_v32, %v6122_v6  ;;  %v2288_v59 = vpop.f32.mrb[19].mxu0  ;;  %v2359_v62 = vpop.f32.mrb[19].mxu1  ;;  %v4885_v38 = vadd.f32 %v2357_v45, %v6138_v9 }
 0x982   :  { %v4872_v36 = vadd.f32 %v2288_v59, %v6127_v23  ;;  %v4886_v25 = vadd.f32 %v2359_v62, %v6133_v30 }
 0x983   :  { %v3684_v39 = vmul.f32 -1.442695, %v4871_v49 }
 0x984   :  { %v3685_v22 = vmul.f32 -1.442695, %v4872_v36  ;;  %v3686_v34 = vmul.f32 -1.442695, %v4886_v25 }
 0x985   :  { %5113 = vpow2.f32 %v3684_v39 }
 0x986   :  { %5115 = vpow2.f32 %v3685_v22 }
 0x987   :  { %5117 = vpow2.f32 %v3686_v34 }
 0x988   :  { %5119 = vtanh.f32 %v4885_v38 }
 0x98f   :  { %v5114_v52 = vpop.eup %5113 }
 0x990   :  { %v5116_v56 = vpop.eup %5115  ;;  %v2369_v40 = vadd.f32 1.0, %v5114_v52 }
 0x991   :  { %v2375_v44 = vadd.f32 1.0, %v5116_v56  ;;  %v5118_v33 = vpop.eup %5117 }
 0x992   :  { %5121 = vrcp.f32 %v2369_v40  ;;  %v5120_v61 = vpop.eup %5119  ;;  %v2382_v54 = vadd.f32 1.0, %v5118_v33 }
 0x993   :  { %5123 = vrcp.f32 %v2375_v44 }
 0x994   :  { %5125 = vrcp.f32 %v2382_v54 }
 0x99c   :  { %v5122_v42 = vpop.eup %5121 }
 0x99d   :  { %v5124_v13 = vpop.eup %5123  ;;  %v2386_v24 = vmul.f32 %v5122_v42, %v5120_v61 }
 0x99e   :  { %v2385_v57 = vmul.f32 %v5124_v13, %v6143_v31  ;;  %v5126_v37 = vpop.eup %5125 }
 0x9a0   :  { %v6185_v7 = vadd.f32 %v2386_v24, %v2385_v57 }
 0x9a2   :  { %5127 = vtanh.f32 %v6185_v7 }
 0x9ac   :  { %v5128_v50 = vpop.eup %5127 }
 0x9ad   :  { %v2389_v14 = vmul.f32 %v5128_v50, %v5126_v37 }
 0x9af   :  { %2459 = vmatmul.mubr.f32.vlgmr.msra.gmra.mrb[20].mxu0 %v2389_v14  ;;  %2530 = vmatmul.mubr.f32.vlgmr.msra.gmra.mrb[20].mxu1 %v2389_v14 }
 0x9b0   :  { %4478 = vmatpush1.bf16.msra.mxu0 %v6017_v60  ;;  %4510 = vmatpush1.bf16.msra.mxu1 %v6022_v2 }
 0x9b1   :  { %4480 = vmatprep.subr.bf16.mxu0 %v6027_v4  ;;  %4512 = vmatprep.subr.bf16.mxu1 %v6031_v19 }
 0x9b2   :  { %2632 = vmatprep.mubr.f32.mxu0 %v5399_v0  ;;  %2703 = vmatprep.mubr.f32.mxu1 %v5399_v0 }
 0x9b4   :  { %4482 = vmatpush1.bf16.msra.mxu0 %v6029_v28  ;;  %4514 = vmatpush1.bf16.msra.mxu1 %v6034_v10 }
 0x9b5   :  { %4484 = vmatprep.subr.bf16.mxu0 %v6039_v53  ;;  %4516 = vmatprep.subr.bf16.mxu1 %v6043_v8 }
 0x9b8   :  { %4486 = vmatpush1.bf16.msra.mxu0 %v6041_v3  ;;  %4518 = vmatpush1.bf16.msra.mxu1 %v6046_v16 }
 0x9b9   :  { %4488 = vmatprep.subr.bf16.mxu0 %v6051_v29  ;;  %4520 = vmatprep.subr.bf16.mxu1 %v6055_v51 }
 0x9bc   :  { %4490 = vmatpush1.bf16.msra.mxu0 %v6053_v43  ;;  %4522 = vmatpush1.bf16.msra.mxu1 %v6058_v63 }
 0x9bd   :  { %4492 = vmatprep.subr.bf16.mxu0 %v6063_v18  ;;  %4524 = vmatprep.subr.bf16.mxu1 %v6067_v15 }
 0x9c0   :  { %4494 = vmatpush1.bf16.msra.mxu0 %v6065_v20  ;;  %4526 = vmatpush1.bf16.msra.mxu1 %v6070_v17 }
 0x9c1   :  { %4496 = vmatprep.subr.bf16.mxu0 %v6075_v46  ;;  %4528 = vmatprep.subr.bf16.mxu1 %v6079_v26 }
 0x9c4   :  { %4498 = vmatpush1.bf16.msra.mxu0 %v6077_v27  ;;  %4530 = vmatpush1.bf16.msra.mxu1 %v6082_v58 }
 0x9c5   :  { %4500 = vmatprep.subr.bf16.mxu0 %v6086_v12  ;;  %4532 = vmatprep.subr.bf16.mxu1 %v6091_v35 }
 0x9c8   :  { %4502 = vmatpush1.bf16.msra.mxu0 %v6088_v21  ;;  %4534 = vmatpush1.bf16.msra.mxu1 %v6094_v5 }
 0x9c9   :  { %4504 = vmatprep.subr.bf16.mxu0 %v6096_v11  ;;  %4536 = vmatprep.subr.bf16.mxu1 %v6102_v41 }
 0x9cc   :  { %4506 = vmatpush1.bf16.msra.mxu0 %v6100_v55  ;;  %4538 = vmatpush1.bf16.msra.mxu1 %v6106_v1 }
 0x9cd   :  { %4540 = vmatprep.subr.bf16.mxu0 %v6015_v48  ;;  %4572 = vmatprep.subr.bf16.mxu1 %v6019_v47 }
 0xa82   :  { %v2460_v31 = vpop.f32.mrb[20].mxu0  ;;  %v2531_v32 = vpop.f32.mrb[20].mxu1 }
 0xa83   :  { %v4873_v45 = vadd.f32 %v2460_v31, %v6122_v6  ;;  %v2462_v49 = vpop.f32.mrb[21].mxu0  ;;  %v2533_v59 = vpop.f32.mrb[21].mxu1  ;;  %v4887_v34 = vadd.f32 %v2531_v32, %v6138_v9 }
 0xa84   :  { %v4874_v62 = vadd.f32 %v2462_v49, %v6127_v23  ;;  %v4888_v22 = vadd.f32 %v2533_v59, %v6133_v30 }
 0xa85   :  { %v3687_v36 = vmul.f32 -1.442695, %v4873_v45 }
 0xa86   :  { %v3688_v39 = vmul.f32 -1.442695, %v4874_v62  ;;  %v3689_v25 = vmul.f32 -1.442695, %v4888_v22 }
 0xa87   :  { %5129 = vpow2.f32 %v3687_v36 }
 0xa88   :  { %5131 = vpow2.f32 %v3688_v39 }
 0xa89   :  { %5133 = vpow2.f32 %v3689_v25 }
 0xa8a   :  { %5135 = vtanh.f32 %v4887_v34 }
 0xa91   :  { %v5130_v38 = vpop.eup %5129 }
 0xa92   :  { %v5132_v52 = vpop.eup %5131  ;;  %v2543_v56 = vadd.f32 1.0, %v5130_v38 }
 0xa93   :  { %v2549_v40 = vadd.f32 1.0, %v5132_v52  ;;  %v5134_v44 = vpop.eup %5133 }
 0xa94   :  { %5137 = vrcp.f32 %v2543_v56  ;;  %v5136_v33 = vpop.eup %5135  ;;  %v2556_v24 = vadd.f32 1.0, %v5134_v44 }
 0xa95   :  { %5139 = vrcp.f32 %v2549_v40 }
 0xa96   :  { %5141 = vrcp.f32 %v2556_v24 }
 0xa9e   :  { %v5138_v61 = vpop.eup %5137 }
 0xa9f   :  { %v5140_v42 = vpop.eup %5139  ;;  %v2560_v13 = vmul.f32 %v5138_v61, %v5136_v33 }
 0xaa0   :  { %v2559_v54 = vmul.f32 %v5140_v42, %v6185_v7  ;;  %v5142_v37 = vpop.eup %5141 }
 0xaa2   :  { %v6227_v57 = vadd.f32 %v2560_v13, %v2559_v54 }
 0xaa4   :  { %5143 = vtanh.f32 %v6227_v57 }
 0xaae   :  { %v5144_v50 = vpop.eup %5143 }
 0xaaf   :  { %v2563_v14 = vmul.f32 %v5144_v50, %v5142_v37 }
 0xab1   :  { %2633 = vmatmul.mubr.f32.vlgmr.msra.gmra.mrb[22].mxu0 %v2563_v14  ;;  %2704 = vmatmul.mubr.f32.vlgmr.msra.gmra.mrb[22].mxu1 %v2563_v14 }
 0xab2   :  { %4542 = vmatpush1.bf16.msra.mxu0 %v6017_v60  ;;  %4574 = vmatpush1.bf16.msra.mxu1 %v6022_v2 }
 0xab3   :  { %4544 = vmatprep.subr.bf16.mxu0 %v6027_v4  ;;  %4576 = vmatprep.subr.bf16.mxu1 %v6031_v19 }
 0xab4   :  { %2806 = vmatprep.mubr.f32.mxu0 %v5399_v0  ;;  %2877 = vmatprep.mubr.f32.mxu1 %v5399_v0 }
 0xab6   :  { %4546 = vmatpush1.bf16.msra.mxu0 %v6029_v28  ;;  %4578 = vmatpush1.bf16.msra.mxu1 %v6034_v10 }
 0xab7   :  { %4548 = vmatprep.subr.bf16.mxu0 %v6039_v53  ;;  %4580 = vmatprep.subr.bf16.mxu1 %v6043_v8 }
 0xaba   :  { %4550 = vmatpush1.bf16.msra.mxu0 %v6041_v3  ;;  %4582 = vmatpush1.bf16.msra.mxu1 %v6046_v16 }
 0xabb   :  { %4552 = vmatprep.subr.bf16.mxu0 %v6051_v29  ;;  %4584 = vmatprep.subr.bf16.mxu1 %v6055_v51 }
 0xabe   :  { %4554 = vmatpush1.bf16.msra.mxu0 %v6053_v43  ;;  %4586 = vmatpush1.bf16.msra.mxu1 %v6058_v63 }
 0xabf   :  { %4556 = vmatprep.subr.bf16.mxu0 %v6063_v18  ;;  %4588 = vmatprep.subr.bf16.mxu1 %v6067_v15 }
 0xac2   :  { %4558 = vmatpush1.bf16.msra.mxu0 %v6065_v20  ;;  %4590 = vmatpush1.bf16.msra.mxu1 %v6070_v17 }
 0xac3   :  { %4560 = vmatprep.subr.bf16.mxu0 %v6075_v46  ;;  %4592 = vmatprep.subr.bf16.mxu1 %v6079_v26 }
 0xac6   :  { %4562 = vmatpush1.bf16.msra.mxu0 %v6077_v27  ;;  %4594 = vmatpush1.bf16.msra.mxu1 %v6082_v58 }
 0xac7   :  { %4564 = vmatprep.subr.bf16.mxu0 %v6086_v12  ;;  %4596 = vmatprep.subr.bf16.mxu1 %v6091_v35 }
 0xaca   :  { %4566 = vmatpush1.bf16.msra.mxu0 %v6088_v21  ;;  %4598 = vmatpush1.bf16.msra.mxu1 %v6094_v5 }
 0xacb   :  { %4568 = vmatprep.subr.bf16.mxu0 %v6096_v11  ;;  %4600 = vmatprep.subr.bf16.mxu1 %v6102_v41 }
 0xace   :  { %4570 = vmatpush1.bf16.msra.mxu0 %v6100_v55  ;;  %4602 = vmatpush1.bf16.msra.mxu1 %v6106_v1 }
 0xacf   :  { %4604 = vmatprep.subr.bf16.mxu0 %v6015_v48  ;;  %4636 = vmatprep.subr.bf16.mxu1 %v6019_v47 }
 0xb84   :  { %v2634_v7 = vpop.f32.mrb[22].mxu0  ;;  %v2705_v31 = vpop.f32.mrb[22].mxu1 }
 0xb85   :  { %v4875_v32 = vadd.f32 %v2634_v7, %v6122_v6  ;;  %v2636_v45 = vpop.f32.mrb[23].mxu0  ;;  %v2707_v49 = vpop.f32.mrb[23].mxu1  ;;  %v4889_v25 = vadd.f32 %v2705_v31, %v6138_v9 }
 0xb86   :  { %v4876_v59 = vadd.f32 %v2636_v45, %v6127_v23  ;;  %v4890_v39 = vadd.f32 %v2707_v49, %v6133_v30 }
 0xb87   :  { %v3690_v62 = vmul.f32 -1.442695, %v4875_v32 }
 0xb88   :  { %v3691_v36 = vmul.f32 -1.442695, %v4876_v59  ;;  %v3692_v22 = vmul.f32 -1.442695, %v4890_v39 }
 0xb89   :  { %5145 = vpow2.f32 %v3690_v62 }
 0xb8a   :  { %5147 = vpow2.f32 %v3691_v36 }
 0xb8b   :  { %5149 = vpow2.f32 %v3692_v22 }
 0xb8c   :  { %5151 = vtanh.f32 %v4889_v25 }
 0xb93   :  { %v5146_v34 = vpop.eup %5145 }
 0xb94   :  { %v5148_v38 = vpop.eup %5147  ;;  %v2717_v52 = vadd.f32 1.0, %v5146_v34 }
 0xb95   :  { %v2723_v56 = vadd.f32 1.0, %v5148_v38  ;;  %v5150_v40 = vpop.eup %5149 }
 0xb96   :  { %5153 = vrcp.f32 %v2717_v52  ;;  %v5152_v44 = vpop.eup %5151  ;;  %v2730_v13 = vadd.f32 1.0, %v5150_v40 }
 0xb97   :  { %5155 = vrcp.f32 %v2723_v56 }
 0xb98   :  { %5157 = vrcp.f32 %v2730_v13 }
 0xba0   :  { %v5154_v33 = vpop.eup %5153 }
 0xba1   :  { %v5156_v61 = vpop.eup %5155  ;;  %v2734_v42 = vmul.f32 %v5154_v33, %v5152_v44 }
 0xba2   :  { %v2733_v24 = vmul.f32 %v5156_v61, %v6227_v57  ;;  %v5158_v37 = vpop.eup %5157 }
 0xba4   :  { %v6269_v54 = vadd.f32 %v2734_v42, %v2733_v24 }
 0xba6   :  { %5159 = vtanh.f32 %v6269_v54 }
 0xbb0   :  { %v5160_v50 = vpop.eup %5159 }
 0xbb1   :  { %v2737_v14 = vmul.f32 %v5160_v50, %v5158_v37 }
 0xbb3   :  { %2807 = vmatmul.mubr.f32.vlgmr.msra.gmra.mrb[24].mxu0 %v2737_v14  ;;  %2878 = vmatmul.mubr.f32.vlgmr.msra.gmra.mrb[24].mxu1 %v2737_v14 }
 0xbb4   :  { %4606 = vmatpush1.bf16.msra.mxu0 %v6017_v60  ;;  %4638 = vmatpush1.bf16.msra.mxu1 %v6022_v2 }
 0xbb5   :  { %4608 = vmatprep.subr.bf16.mxu0 %v6027_v4  ;;  %4640 = vmatprep.subr.bf16.mxu1 %v6031_v19 }
 0xbb6   :  { %2980 = vmatprep.mubr.f32.mxu0 %v5399_v0  ;;  %3051 = vmatprep.mubr.f32.mxu1 %v5399_v0 }
 0xbb8   :  { %4610 = vmatpush1.bf16.msra.mxu0 %v6029_v28  ;;  %4642 = vmatpush1.bf16.msra.mxu1 %v6034_v10 }
 0xbb9   :  { %4612 = vmatprep.subr.bf16.mxu0 %v6039_v53  ;;  %4644 = vmatprep.subr.bf16.mxu1 %v6043_v8 }
 0xbbc   :  { %4614 = vmatpush1.bf16.msra.mxu0 %v6041_v3  ;;  %4646 = vmatpush1.bf16.msra.mxu1 %v6046_v16 }
 0xbbd   :  { %4616 = vmatprep.subr.bf16.mxu0 %v6051_v29  ;;  %4648 = vmatprep.subr.bf16.mxu1 %v6055_v51 }
 0xbc0   :  { %4618 = vmatpush1.bf16.msra.mxu0 %v6053_v43  ;;  %4650 = vmatpush1.bf16.msra.mxu1 %v6058_v63 }
 0xbc1   :  { %4620 = vmatprep.subr.bf16.mxu0 %v6063_v18  ;;  %4652 = vmatprep.subr.bf16.mxu1 %v6067_v15 }
 0xbc4   :  { %4622 = vmatpush1.bf16.msra.mxu0 %v6065_v20  ;;  %4654 = vmatpush1.bf16.msra.mxu1 %v6070_v17 }
 0xbc5   :  { %4624 = vmatprep.subr.bf16.mxu0 %v6075_v46  ;;  %4656 = vmatprep.subr.bf16.mxu1 %v6079_v26 }
 0xbc8   :  { %4626 = vmatpush1.bf16.msra.mxu0 %v6077_v27  ;;  %4658 = vmatpush1.bf16.msra.mxu1 %v6082_v58 }
 0xbc9   :  { %4628 = vmatprep.subr.bf16.mxu0 %v6086_v12  ;;  %4660 = vmatprep.subr.bf16.mxu1 %v6091_v35 }
 0xbcc   :  { %4630 = vmatpush1.bf16.msra.mxu0 %v6088_v21  ;;  %4662 = vmatpush1.bf16.msra.mxu1 %v6094_v5 }
 0xbcd   :  { %4632 = vmatprep.subr.bf16.mxu0 %v6096_v11  ;;  %4664 = vmatprep.subr.bf16.mxu1 %v6102_v41 }
 0xbd0   :  { %4634 = vmatpush1.bf16.msra.mxu0 %v6100_v55  ;;  %4666 = vmatpush1.bf16.msra.mxu1 %v6106_v1 }
 0xbd1   :  { %4668 = vmatprep.subr.bf16.mxu0 %v6015_v48  ;;  %4700 = vmatprep.subr.bf16.mxu1 %v6019_v47 }
 0xc86   :  { %v2808_v57 = vpop.f32.mrb[24].mxu0  ;;  %v2879_v7 = vpop.f32.mrb[24].mxu1 }
 0xc87   :  { %v4877_v31 = vadd.f32 %v2808_v57, %v6122_v6  ;;  %v2810_v32 = vpop.f32.mrb[25].mxu0  ;;  %v2881_v45 = vpop.f32.mrb[25].mxu1  ;;  %v4891_v22 = vadd.f32 %v2879_v7, %v6138_v9 }
 0xc88   :  { %v4878_v49 = vadd.f32 %v2810_v32, %v6127_v23  ;;  %v4892_v36 = vadd.f32 %v2881_v45, %v6133_v30 }
 0xc89   :  { %v3693_v59 = vmul.f32 -1.442695, %v4877_v31 }
 0xc8a   :  { %v3694_v62 = vmul.f32 -1.442695, %v4878_v49  ;;  %v3695_v39 = vmul.f32 -1.442695, %v4892_v36 }
 0xc8b   :  { %5161 = vpow2.f32 %v3693_v59 }
 0xc8c   :  { %5163 = vpow2.f32 %v3694_v62 }
 0xc8d   :  { %5165 = vpow2.f32 %v3695_v39 }
 0xc8e   :  { %5167 = vtanh.f32 %v4891_v22 }
 0xc95   :  { %v5162_v25 = vpop.eup %5161 }
 0xc96   :  { %v5164_v34 = vpop.eup %5163  ;;  %v2891_v38 = vadd.f32 1.0, %v5162_v25 }
 0xc97   :  { %v2897_v52 = vadd.f32 1.0, %v5164_v34  ;;  %v5166_v56 = vpop.eup %5165 }
 0xc98   :  { %5169 = vrcp.f32 %v2891_v38  ;;  %v5168_v40 = vpop.eup %5167  ;;  %v2904_v42 = vadd.f32 1.0, %v5166_v56 }
 0xc99   :  { %5171 = vrcp.f32 %v2897_v52 }
 0xc9a   :  { %5173 = vrcp.f32 %v2904_v42 }
 0xca2   :  { %v5170_v44 = vpop.eup %5169 }
 0xca3   :  { %v5172_v33 = vpop.eup %5171  ;;  %v2908_v61 = vmul.f32 %v5170_v44, %v5168_v40 }
 0xca4   :  { %v2907_v13 = vmul.f32 %v5172_v33, %v6269_v54  ;;  %v5174_v37 = vpop.eup %5173 }
 0xca6   :  { %v6311_v24 = vadd.f32 %v2908_v61, %v2907_v13 }
 0xca8   :  { %5175 = vtanh.f32 %v6311_v24 }
 0xcb2   :  { %v5176_v50 = vpop.eup %5175 }
 0xcb3   :  { %v2911_v14 = vmul.f32 %v5176_v50, %v5174_v37  ;;  %v3437_v50 = vld [vmem:[#allocation12 + $0x18] sm:$0xff] }
 0xcb5   :  { %2981 = vmatmul.mubr.f32.vlgmr.msra.gmra.mrb[26].mxu0 %v2911_v14  ;;  %3052 = vmatmul.mubr.f32.vlgmr.msra.gmra.mrb[26].mxu1 %v2911_v14 }
 0xcb6   :  { %4670 = vmatpush1.bf16.msra.mxu0 %v6017_v60  ;;  %4702 = vmatpush1.bf16.msra.mxu1 %v6022_v2 }
 0xcb7   :  { %4672 = vmatprep.subr.bf16.mxu0 %v6027_v4  ;;  %4704 = vmatprep.subr.bf16.mxu1 %v6031_v19 }
 0xcb8   :  { %3154 = vmatprep.mubr.f32.mxu0 %v5399_v0  ;;  %3225 = vmatprep.mubr.f32.mxu1 %v5399_v0 }
 0xcba   :  { %4674 = vmatpush1.bf16.msra.mxu0 %v6029_v28  ;;  %4706 = vmatpush1.bf16.msra.mxu1 %v6034_v10 }
 0xcbb   :  { %4676 = vmatprep.subr.bf16.mxu0 %v6039_v53  ;;  %4708 = vmatprep.subr.bf16.mxu1 %v6043_v8 }
 0xcbe   :  { %4678 = vmatpush1.bf16.msra.mxu0 %v6041_v3  ;;  %4710 = vmatpush1.bf16.msra.mxu1 %v6046_v16 }
 0xcbf   :  { %4680 = vmatprep.subr.bf16.mxu0 %v6051_v29  ;;  %4712 = vmatprep.subr.bf16.mxu1 %v6055_v51 }
 0xcc2   :  { %4682 = vmatpush1.bf16.msra.mxu0 %v6053_v43  ;;  %4714 = vmatpush1.bf16.msra.mxu1 %v6058_v63 }
 0xcc3   :  { %4684 = vmatprep.subr.bf16.mxu0 %v6063_v18  ;;  %4716 = vmatprep.subr.bf16.mxu1 %v6067_v15 }
 0xcc6   :  { %4686 = vmatpush1.bf16.msra.mxu0 %v6065_v20  ;;  %4718 = vmatpush1.bf16.msra.mxu1 %v6070_v17 }
 0xcc7   :  { %4688 = vmatprep.subr.bf16.mxu0 %v6075_v46  ;;  %4720 = vmatprep.subr.bf16.mxu1 %v6079_v26 }
 0xcca   :  { %4690 = vmatpush1.bf16.msra.mxu0 %v6077_v27  ;;  %4722 = vmatpush1.bf16.msra.mxu1 %v6082_v58 }
 0xccb   :  { %4692 = vmatprep.subr.bf16.mxu0 %v6086_v12  ;;  %4724 = vmatprep.subr.bf16.mxu1 %v6091_v35 }
 0xcce   :  { %4694 = vmatpush1.bf16.msra.mxu0 %v6088_v21  ;;  %4726 = vmatpush1.bf16.msra.mxu1 %v6094_v5 }
 0xccf   :  { %4696 = vmatprep.subr.bf16.mxu0 %v6096_v11  ;;  %4728 = vmatprep.subr.bf16.mxu1 %v6102_v41 }
 0xcd2   :  { %4698 = vmatpush1.bf16.msra.mxu0 %v6100_v55  ;;  %4730 = vmatpush1.bf16.msra.mxu1 %v6106_v1 }
 0xcd3   :  { %4732 = vmatprep.subr.bf16.mxu0 %v6015_v48  ;;  %4764 = vmatprep.subr.bf16.mxu1 %v6019_v47 }
 0xd88   :  { %v2982_v54 = vpop.f32.mrb[26].mxu0  ;;  %v3053_v57 = vpop.f32.mrb[26].mxu1 }
 0xd89   :  { %v4879_v7 = vadd.f32 %v2982_v54, %v6122_v6  ;;  %v2984_v31 = vpop.f32.mrb[27].mxu0  ;;  %v3055_v32 = vpop.f32.mrb[27].mxu1  ;;  %v4893_v39 = vadd.f32 %v3053_v57, %v6138_v9  ;;  %v3438_v54 = vld [vmem:[#allocation12 + $0x20] sm:$0xff]  ;;  %v3439_v57 = vld [vmem:[#allocation12 + $0x28] sm:$0xff] }
 0xd8a   :  { %v4880_v45 = vadd.f32 %v2984_v31, %v6127_v23  ;;  %v4894_v62 = vadd.f32 %v3055_v32, %v6133_v30  ;;  %v3440_v31 = vld [vmem:[#allocation12 + $0x30] sm:$0xff]  ;;  %v3441_v32 = vld [vmem:[#allocation12 + $0x38] sm:$0xff] }
 0xd8b   :  { %v3696_v49 = vmul.f32 -1.442695, %v4879_v7  ;;  %v4802_v7 = vpack.c.bf16 %v3439_v57, %v3438_v54 }
 0xd8c   :  { %v3697_v59 = vmul.f32 -1.442695, %v4880_v45  ;;  %v3698_v36 = vmul.f32 -1.442695, %v4894_v62  ;;  %v4805_v45 = vpack.c.bf16 %v3441_v32, %v3440_v31  ;;  %v3543_v31 = vld [vmem:[#allocation13 + $0x78] sm:$0xff] }
 0xd8d   :  { %5177 = vpow2.f32 %v3696_v49  ;;  %v3442_v49 = vld [vmem:[#allocation12 + $0x40] sm:$0xff] }
 0xd8e   :  { %5179 = vpow2.f32 %v3697_v59  ;;  %v3443_v59 = vld [vmem:[#allocation12 + $0x48] sm:$0xff] }
 0xd8f   :  { %5181 = vpow2.f32 %v3698_v36  ;;  %v4808_v62 = vpack.c.bf16 %v3443_v59, %v3442_v49  ;;  %v3444_v36 = vld [vmem:[#allocation12 + $0x50] sm:$0xff] }
 0xd90   :  { %5183 = vtanh.f32 %v4893_v39  ;;  %v3445_v39 = vld [vmem:[#allocation12 + $0x58] sm:$0xff] }
 0xd97   :  { %v5178_v48 = vpop.eup %5177 }
 0xd98   :  { %v5180_v22 = vpop.eup %5179  ;;  %v3065_v47 = vadd.f32 1.0, %v5178_v48  ;;  %v3446_v48 = vld [vmem:[#allocation12 + $0x60] sm:$0xff] }
 0xd99   :  { %v3071_v25 = vadd.f32 1.0, %v5180_v22  ;;  %v5182_v34 = vpop.eup %5181  ;;  %v4811_v22 = vpack.c.bf16 %v3445_v39, %v3444_v36 }
 0xd9a   :  { %5185 = vrcp.f32 %v3065_v47  ;;  %v5184_v38 = vpop.eup %5183  ;;  %v3078_v44 = vadd.f32 1.0, %v5182_v34  ;;  %v3447_v47 = vld [vmem:[#allocation12 + $0x68] sm:$0xff]  ;;  %v3448_v34 = vld [vmem:[#allocation12 + $0x70] sm:$0xff] }
 0xd9b   :  { %5187 = vrcp.f32 %v3071_v25  ;;  %v4814_v25 = vpack.c.bf16 %v3447_v47, %v3446_v48 }
 0xd9c   :  { %5189 = vrcp.f32 %v3078_v44  ;;  %v3530_v44 = vld [vmem:[#allocation13 + $0x10] sm:$0xff] }
 0xda4   :  { %v5186_v52 = vpop.eup %5185 }
 0xda5   :  { %v5188_v56 = vpop.eup %5187  ;;  %v3082_v40 = vmul.f32 %v5186_v52, %v5184_v38  ;;  %v3449_v38 = vld [vmem:[#allocation12 + $0x78] sm:$0xff] }
 0xda6   :  { %v3081_v33 = vmul.f32 %v5188_v56, %v6311_v24  ;;  %v5190_v42 = vpop.eup %5189  ;;  %v3436_v24 = vld [vmem:[#allocation12 + $0x10] sm:$0xff]  ;;  %v4817_v52 = vpack.c.bf16 %v3449_v38, %v3448_v34  ;;  %v3528_v56 = vld [vmem:[#allocation13] sm:$0xff] }
 0xda7   :  { %v4799_v14 = vpack.c.bf16 %v3437_v50, %v3436_v24 }
 0xda8   :  { %v6353_v61 = vadd.f32 %v3082_v40, %v3081_v33  ;;  %v3529_v40 = vld [vmem:[#allocation13 + $0x8] sm:$0xff] }
 0xda9   :  { %v4820_v33 = vpack.c.bf16 %v3529_v40, %v3528_v56 }
 0xdaa   :  { %5191 = vtanh.f32 %v6353_v61 }
 0xdb4   :  { %v5192_v13 = vpop.eup %5191 }
 0xdb5   :  { %v3085_v37 = vmul.f32 %v5192_v13, %v5190_v42  ;;  %v3533_v13 = vld [vmem:[#allocation13 + $0x28] sm:$0xff] }
 0xdb7   :  { %3155 = vmatmul.mubr.f32.vlgmr.msra.gmra.mrb[28].mxu0 %v3085_v37  ;;  %3226 = vmatmul.mubr.f32.vlgmr.msra.gmra.mrb[28].mxu1 %v3085_v37 }
 0xdb8   :  { %4734 = vmatpush1.bf16.msra.mxu0 %v6017_v60  ;;  %4766 = vmatpush1.bf16.msra.mxu1 %v6022_v2 }
 0xdb9   :  { %4736 = vmatprep.subr.bf16.mxu0 %v6027_v4  ;;  %4768 = vmatprep.subr.bf16.mxu1 %v6031_v19 }
 0xdba   :  { %3328 = vmatprep.mubr.f32.mxu0 %v5399_v0  ;;  %3399 = vmatprep.mubr.f32.mxu1 %v5399_v0 }
 0xdbc   :  { %4738 = vmatpush1.bf16.msra.mxu0 %v6029_v28  ;;  %4770 = vmatpush1.bf16.msra.mxu1 %v6034_v10 }
 0xdbd   :  { %4740 = vmatprep.subr.bf16.mxu0 %v6039_v53  ;;  %4772 = vmatprep.subr.bf16.mxu1 %v6043_v8 }
 0xdc0   :  { %4742 = vmatpush1.bf16.msra.mxu0 %v6041_v3  ;;  %4774 = vmatpush1.bf16.msra.mxu1 %v6046_v16 }
 0xdc1   :  { %4744 = vmatprep.subr.bf16.mxu0 %v6051_v29  ;;  %4776 = vmatprep.subr.bf16.mxu1 %v6055_v51 }
 0xdc4   :  { %4746 = vmatpush1.bf16.msra.mxu0 %v6053_v43  ;;  %4778 = vmatpush1.bf16.msra.mxu1 %v6058_v63 }
 0xdc5   :  { %4748 = vmatprep.subr.bf16.mxu0 %v6063_v18  ;;  %4780 = vmatprep.subr.bf16.mxu1 %v6067_v15 }
 0xdc8   :  { %4750 = vmatpush1.bf16.msra.mxu0 %v6065_v20  ;;  %4782 = vmatpush1.bf16.msra.mxu1 %v6070_v17 }
 0xdc9   :  { %4752 = vmatprep.subr.bf16.mxu0 %v6075_v46  ;;  %4784 = vmatprep.subr.bf16.mxu1 %v6079_v26 }
 0xdcc   :  { %4754 = vmatpush1.bf16.msra.mxu0 %v6077_v27  ;;  %4786 = vmatpush1.bf16.msra.mxu1 %v6082_v58 }
 0xdcd   :  { %4756 = vmatprep.subr.bf16.mxu0 %v6086_v12  ;;  %4788 = vmatprep.subr.bf16.mxu1 %v6091_v35 }
 0xdd0   :  { %4758 = vmatpush1.bf16.msra.mxu0 %v6088_v21  ;;  %4790 = vmatpush1.bf16.msra.mxu1 %v6094_v5 }
 0xdd1   :  { %4760 = vmatprep.subr.bf16.mxu0 %v6096_v11  ;;  %4792 = vmatprep.subr.bf16.mxu1 %v6102_v41  ;;  %v3434_v11 = vld [vmem:[#allocation12] sm:$0xff] }
 0xdd4   :  { %4762 = vmatpush1.bf16.msra.mxu0 %v6100_v55  ;;  %4794 = vmatpush1.bf16.msra.mxu1 %v6106_v1  ;;  %v3435_v55 = vld [vmem:[#allocation12 + $0x8] sm:$0xff]  ;;  %v5400_v1 = vmov 0.0|0.0  }
 0xdd5   :  { %v4796_v41 = vpack.c.bf16 %v3435_v55, %v3434_v11  ;;  %4795 = vmatprep.subr.bf16.mxu0 %v5400_v1  ;;  %4819 = vmatprep.subr.bf16.mxu1 %v5400_v1 }
 0xe8a   :  { %v3156_v60 = vpop.f32.mrb[28].mxu0  ;;  %v3227_v2 = vpop.f32.mrb[28].mxu1 }
 0xe8b   :  { %v4881_v4 = vadd.f32 %v3156_v60, %v6122_v6  ;;  %v3158_v28 = vpop.f32.mrb[29].mxu0  ;;  %v3229_v19 = vpop.f32.mrb[29].mxu1  ;;  %v4895_v29 = vadd.f32 %v3227_v2, %v6138_v9  ;;  %v3534_v60 = vld [vmem:[#allocation13 + $0x30] sm:$0xff]  ;;  %v3535_v2 = vld [vmem:[#allocation13 + $0x38] sm:$0xff] }
 0xe8c   :  { %v4882_v10 = vadd.f32 %v3158_v28, %v6127_v23  ;;  %v4896_v8 = vadd.f32 %v3229_v19, %v6133_v30  ;;  %v3536_v28 = vld [vmem:[#allocation13 + $0x40] sm:$0xff]  ;;  %v3537_v19 = vld [vmem:[#allocation13 + $0x48] sm:$0xff] }
 0xe8d   :  { %v3699_v53 = vmul.f32 -1.442695, %v4881_v4  ;;  %v4829_v4 = vpack.c.bf16 %v3535_v2, %v3534_v60 }
 0xe8e   :  { %v3700_v3 = vmul.f32 -1.442695, %v4882_v10  ;;  %v3701_v16 = vmul.f32 -1.442695, %v4896_v8  ;;  %v4832_v10 = vpack.c.bf16 %v3537_v19, %v3536_v28 }
 0xe8f   :  { %5193 = vpow2.f32 %v3699_v53  ;;  %v3538_v53 = vld [vmem:[#allocation13 + $0x50] sm:$0xff] }
 0xe90   :  { %5195 = vpow2.f32 %v3700_v3  ;;  %v3539_v3 = vld [vmem:[#allocation13 + $0x58] sm:$0xff] }
 0xe91   :  { %5197 = vpow2.f32 %v3701_v16  ;;  %v4835_v8 = vpack.c.bf16 %v3539_v3, %v3538_v53  ;;  %v3540_v16 = vld [vmem:[#allocation13 + $0x60] sm:$0xff] }
 0xe92   :  { %5199 = vtanh.f32 %v4895_v29  ;;  %v3541_v29 = vld [vmem:[#allocation13 + $0x68] sm:$0xff] }
 0xe99   :  { %v5194_v43 = vpop.eup %5193 }
 0xe9a   :  { %v5196_v51 = vpop.eup %5195  ;;  %v3239_v63 = vadd.f32 1.0, %v5194_v43  ;;  %v4838_v43 = vpack.c.bf16 %v3541_v29, %v3540_v16 }
 0xe9b   :  { %v3245_v18 = vadd.f32 1.0, %v5196_v51  ;;  %v5198_v20 = vpop.eup %5197 }
 0xe9c   :  { %5201 = vrcp.f32 %v3239_v63  ;;  %v5200_v15 = vpop.eup %5199  ;;  %v3252_v26 = vadd.f32 1.0, %v5198_v20 }
 0xe9d   :  { %5203 = vrcp.f32 %v3245_v18 }
 0xe9e   :  { %5205 = vrcp.f32 %v3252_v26 }
 0xea6   :  { %v5202_v17 = vpop.eup %5201 }
 0xea7   :  { %v5204_v46 = vpop.eup %5203  ;;  %v3256_v27 = vmul.f32 %v5202_v17, %v5200_v15 }
 0xea8   :  { %v3255_v58 = vmul.f32 %v5204_v46, %v6353_v61  ;;  %v5206_v21 = vpop.eup %5205  ;;  %v3531_v61 = vld [vmem:[#allocation13 + $0x18] sm:$0xff] }
 0xea9   :  { %v4823_v42 = vpack.c.bf16 %v3531_v61, %v3530_v44 }
 0xeaa   :  { %v6393_v12 = vadd.f32 %v3256_v27, %v3255_v58 }
 0xeac   :  { %5207 = vtanh.f32 %v6393_v12 }
 0xeb6   :  { %v5208_v35 = vpop.eup %5207 }
 0xeb7   :  { %v3259_v5 = vmul.f32 %v5208_v35, %v5206_v21 }
 0xeb9   :  { %3329 = vmatmul.mubr.f32.vlgmr.msra.gmra.mrb[30].mxu0 %v3259_v5  ;;  %3400 = vmatmul.mubr.f32.vlgmr.msra.gmra.mrb[30].mxu1 %v3259_v5 }
 0xeba   :  { %4797 = vmatpush3.bf16.msra.mxu0 %v4796_v41  ;;  %3773 = vmatprep.mubr.msk.f32.mxu0 %vm5401_vm1, %v5399_v0 }
 0xebb   :  { %4798 = vmatprep.subr.bf16.mxu0 %v5400_v1  ;;  %3808 = vmatprep.mubr.msk.f32.mxu1 %vm5401_vm1, %v5399_v0  ;;  %v3532_v0 = vld [vmem:[#allocation13 + $0x20] sm:$0xff] }
 0xebc   :  { %4821 = vmatpush3.bf16.msra.mxu1 %v4820_v33  ;;  %v4826_v37 = vpack.c.bf16 %v3533_v13, %v3532_v0 }
 0xebd   :  { %4822 = vmatprep.subr.bf16.mxu1 %v5400_v1 }
 0xebe   :  { %4800 = vmatpush3.bf16.msra.mxu0 %v4799_v14 }
 0xebf   :  { %4801 = vmatprep.subr.bf16.mxu0 %v5400_v1 }
 0xec0   :  { %4824 = vmatpush3.bf16.msra.mxu1 %v4823_v42 }
 0xec1   :  { %4825 = vmatprep.subr.bf16.mxu1 %v5400_v1 }
 0xec2   :  { %4803 = vmatpush3.bf16.msra.mxu0 %v4802_v7  ;;  %v3542_v7 = vld [vmem:[#allocation13 + $0x70] sm:$0xff] }
 0xec3   :  { %4804 = vmatprep.subr.bf16.mxu0 %v5400_v1  ;;  %v4841_v32 = vpack.c.bf16 %v3543_v31, %v3542_v7 }
 0xec4   :  { %4827 = vmatpush3.bf16.msra.mxu1 %v4826_v37 }
 0xec5   :  { %4828 = vmatprep.subr.bf16.mxu1 %v5400_v1 }
 0xec6   :  { %4806 = vmatpush3.bf16.msra.mxu0 %v4805_v45  ;;  %v3705_v45 = vld [vmem:[%s6443_s6] ss:$0 sm:$0xff] }
 0xec7   :  { %4807 = vmatprep.subr.bf16.mxu0 %v5400_v1 }
 0xec8   :  { %4830 = vmatpush3.bf16.msra.mxu1 %v4829_v4 }
 0xec9   :  { %4831 = vmatprep.subr.bf16.mxu1 %v5400_v1 }
 0xeca   :  { %4809 = vmatpush3.bf16.msra.mxu0 %v4808_v62 }
 0xecb   :  { %4810 = vmatprep.subr.bf16.mxu0 %v5400_v1 }
 0xecc   :  { %4833 = vmatpush3.bf16.msra.mxu1 %v4832_v10 }
 0xecd   :  { %4834 = vmatprep.subr.bf16.mxu1 %v5400_v1 }
 0xece   :  { %4812 = vmatpush3.bf16.msra.mxu0 %v4811_v22 }
 0xecf   :  { %4813 = vmatprep.subr.bf16.mxu0 %v5400_v1 }
 0xed0   :  { %4836 = vmatpush3.bf16.msra.mxu1 %v4835_v8 }
 0xed1   :  { %4837 = vmatprep.subr.bf16.mxu1 %v5400_v1 }
 0xed2   :  { %4815 = vmatpush3.bf16.msra.mxu0 %v4814_v25 }
 0xed3   :  { %4816 = vmatprep.subr.bf16.mxu0 %v5400_v1 }
 0xed4   :  { %4839 = vmatpush3.bf16.msra.mxu1 %v4838_v43 }
 0xed5   :  { %4840 = vmatprep.subr.bf16.mxu1 %v5400_v1 }
 0xed6   :  { %4818 = vmatpush3.bf16.msra.mxu0 %v4817_v52 }
 0xed8   :  { %4842 = vmatpush3.bf16.msra.mxu1 %v4841_v32 }
 0xf8c   :  { %v3330_v51 = vpop.f32.mrb[30].mxu0  ;;  %v3401_v63 = vpop.f32.mrb[30].mxu1 }
 0xf8d   :  { %v4883_v18 = vadd.f32 %v3330_v51, %v6122_v6  ;;  %v3332_v20 = vpop.f32.mrb[31].mxu0  ;;  %v3403_v15 = vpop.f32.mrb[31].mxu1  ;;  %v4897_v21 = vadd.f32 %v3401_v63, %v6138_v9 }
 0xf8e   :  { %v4884_v17 = vadd.f32 %v3332_v20, %v6127_v23  ;;  %v4898_v26 = vadd.f32 %v3403_v15, %v6133_v30 }
 0xf8f   :  { %v3702_v46 = vmul.f32 -1.442695, %v4883_v18 }
 0xf90   :  { %v3703_v27 = vmul.f32 -1.442695, %v4884_v17  ;;  %v3704_v58 = vmul.f32 -1.442695, %v4898_v26 }
 0xf91   :  { %5209 = vpow2.f32 %v3702_v46 }
 0xf92   :  { %5211 = vpow2.f32 %v3703_v27 }
 0xf93   :  { %5213 = vpow2.f32 %v3704_v58 }
 0xf94   :  { %5215 = vtanh.f32 %v4897_v21 }
 0xf9b   :  { %v5210_v35 = vpop.eup %5209 }
 0xf9c   :  { %v5212_v5 = vpop.eup %5211  ;;  %v3413_v11 = vadd.f32 1.0, %v5210_v35 }
 0xf9d   :  { %v3419_v55 = vadd.f32 1.0, %v5212_v5  ;;  %v5214_v6 = vpop.eup %5213 }
 0xf9e   :  { %5217 = vrcp.f32 %v3413_v11  ;;  %v5216_v41 = vpop.eup %5215  ;;  %v3426_v50 = vadd.f32 1.0, %v5214_v6 }
 0xf9f   :  { %5219 = vrcp.f32 %v3419_v55 }
 0xfa0   :  { %5221 = vrcp.f32 %v3426_v50 }
 0xfa8   :  { %v5218_v23 = vpop.eup %5217 }
 0xfa9   :  { %v5220_v1 = vpop.eup %5219  ;;  %v3430_v24 = vmul.f32 %v5218_v23, %v5216_v41 }
 0xfaa   :  { %v3429_v14 = vmul.f32 %v5220_v1, %v6393_v12  ;;  %v5222_v9 = vpop.eup %5221  ;;  %v3706_v12 = vld [vmem:[%s6445_s8] ss:$0 sm:$0xff] }
 0xfac   :  { %v3431_v30 = vadd.f32 %v3430_v24, %v3429_v14 }
 0xfae   :  { %5223 = vtanh.f32 %v3431_v30 }
 0xfb8   :  { %v5224_v54 = vpop.eup %5223 }
 0xfb9   :  { %v3433_v57 = vmul.f32 %v5224_v54, %v5222_v9 }
 0xfbb   :  { %3774 = vmatmul.mubr.f32.vlgmr.msra.gmra.mrb[32].mxu0 %v3433_v57 }
0x108e   :  { %v3523_v49 = vpop.f32.mrb[32].mxu0 }
0x108f   :  { %v3524_v59 = vadd.f32 %v3705_v45, %v3523_v49  ;;  %v3775_v62 = vpop.f32.mrb[33].mxu0 }
0x1091   :  { %v3527_v36 = vmax.f32 %v3524_v59, 0.0 }
0x1093   :  { %3809 = vmatmul.mubr.f32.vlgmr.msra.gmra.mrb[32].mxu1 %v3527_v36 }
0x1166   :  { %v3617_v39 = vpop.f32.mrb[32].mxu1 }
0x1167   :  { %v3618_v48 = vadd.f32 %v3706_v12, %v3617_v39  ;;  %v3810_v22 = vpop.f32.mrb[33].mxu1 }
0x1169   :  { %3621 = vst [vmem:[#allocation15] sm:$0xff] %v3618_v48 }
0x116a   :  { %5368 = shalt.err (!%p5365_p10)
}
0x116b   :  { %s5369_s29 = scalar_lea.hbm %s6446_s9, 128 }
0x116c   :  { %p5370_p11 = scmp.ne.s32.totalorder %s6446_s9, %s5369_s29  ;;  %p5373_p12 = scmp.lt.u32.totalorder %s5369_s29, %s6446_s9 }
0x116e   :  { %p5375_p13 = pnand %p5373_p12, %p5370_p11 }
0x1170   :  { %5378 = shalt.err (!%p5375_p13)
}
0x1171   :  { %3631 = dma.vmem_to_hbm [thread:$0]  %s3629_s25, 128, %s6446_s9, [#allocation6]  }
0x1172   :  { %5387 = dma.done.wait [#allocation6], 128  }
0x1173   :  { %5388 = vsyncadd [#allocation6], 4294967168 }
0x1174   :  { %3635 = vsyncpa [#allocation5], 1 }
0x1175   :  { %3636 = vsyncpa [#allocation8], 1 }
0x1176   :  { %3637 = vsyncpa [#allocation11], 1 }
0x1177   :  { %3638 = vsyncpa [#allocation14], 1 }
0x1178   :  { %3639 = vsyncpa [#allocation6], 1 }

</bundles_post_ra>
